<compile_context>
chip_gen: v6e
topology: v6e:2x2x1
jax: 0.10.0
libtpu: 0.0.40
codegen_flags: <defaults>
</compile_context>

<pallas_src>
import jax
import jax.numpy as jnp
from jax import lax
from jax.experimental import pallas as pl
from jax.experimental.pallas import tpu as pltpu

H = 32           # hidden size
IN_DIM = 2       # input feature dim
OUT_DIM = 2      # final linear output dim
NUM_LAYERS = 3   # LSTM layers


def _make_kernel(seq_len, bc):
    """Kernel for one chunk of `bc` sequences of length `seq_len`.

    Row layout of x / hid / pre_gates / out: row = t * bc + b  (time-major).
    """
    rows = seq_len * bc

    def kernel(x_ref, w0_ref, b0_ref, wih_ref, whh_ref, bl_ref,
               w2_ref, b2_ref, out_ref, hid, pre_gates):
        # x_ref:    (rows, 2)          f32
        # w0_ref:   (2, 128)  f32      b0_ref: (1, 128) f32   (Linear(2,32) folded into layer-0 W_ih)
        # wih_ref:  (2, 32, 128) bf16  bl_ref: (2, 1, 128) f32 (layers 1..2 input weights / biases)
        # whh_ref:  (3, 32, 128) bf16  (recurrent weights, all layers; 0.5 folded into i/f/o cols)
        # w2_ref:   (32, 2) bf16       b2_ref: (1, 2) f32
        # out_ref:  (rows, 2)  col 0 = pre_mean, col 1 = softplus(...) + 1e-6
        # hid:       (rows, 32)  VMEM scratch, hidden activations (reused per layer)
        # pre_gates: (rows, 128) VMEM scratch, x_t @ W_ih + b for all t (per layer)

        # Per-lane gate activation affine, hoisted once for all layers/steps:
        #   i/f/o lanes: sigmoid(x) = 0.5*tanh(0.5x) + 0.5 (0.5 already folded
        #   into the weights)  ->  a = 0.5, b = 0.5
        #   g lanes: plain tanh                          ->  a = 1.0, b = 0.0
        lane = lax.broadcasted_iota(jnp.int32, (1, 4 * H), 1)
        is_g = (lane >= 2 * H) & (lane < 3 * H)
        act_a = jnp.where(is_g, 1.0, 0.5).astype(jnp.float32)
        act_b = jnp.where(is_g, 0.0, 0.5).astype(jnp.float32)

        unroll = True if seq_len <= 32 else 8   # full unroll for short sequences

        def run_layer(w_hh_bf16):
            # Sequential recurrence.  pre_gates already holds the input
            # projection for every timestep, so the serialized critical path
            # per step is one (bc,32)@(32,128) bf16 MXU matmul, ONE full-width
            # tanh + tanh(c_new) on the EUP, and a handful of VPU ops.
            def step(t, carry):
                h_prev, c_prev = carry                     # (bc, 32) each, f32
                r0 = pl.multiple_of(t * bc, bc)            # sublane-aligned
                gates = (
                    pre_gates[pl.ds(r0, bc), :]            # (bc, 128) full-lane load
                    + jnp.dot(h_prev.astype(jnp.bfloat16), w_hh_bf16,
                              preferred_element_type=jnp.float32)
                )                                          # (bc, 128): i, f, g, o
                act = act_a * jnp.tanh(gates) + act_b      # one EUP pass, full width
                i_g = act[:, 0 * H:1 * H]
                f_g = act[:, 1 * H:2 * H]
                g_g = act[:, 2 * H:3 * H]
                o_g = act[:, 3 * H:4 * H]
                c_new = f_g * c_prev + i_g * g_g
                h_new = o_g * jnp.tanh(c_new)
                hid[pl.ds(r0, bc), :] = h_new
                return (h_new, c_new)

            zeros = jnp.zeros((bc, H), jnp.float32)
            lax.fori_loop(0, seq_len, step, (zeros, zeros), unroll=unroll)

        # ---- Layer 0: Linear(2->32) folded into the layer-0 input projection ----
        pre_gates[...] = (
            jnp.dot(x_ref[...], w0_ref[...], preferred_element_type=jnp.float32)
            + b0_ref[...]
        )
        run_layer(whh_ref[0])

        # ---- Layers 1..2: dense bf16 pre-gate matmul, then recurrence ----
        for layer in range(1, NUM_LAYERS):      # static unroll over layers
            pre_gates[...] = (
                jnp.dot(hid[...].astype(jnp.bfloat16), wih_ref[layer - 1],
                        preferred_element_type=jnp.float32)
                + bl_ref[layer - 1]
            )
            run_layer(whh_ref[layer])

        # ---- Linear(32 -> 2); single lane-denser (rows, 2) output ----
        out = (
            jnp.dot(hid[...].astype(jnp.bfloat16), w2_ref[...],
                    preferred_element_type=jnp.float32)
            + b2_ref[...]
        )                                        # (rows, 2)
        col = lax.broadcasted_iota(jnp.int32, (rows, OUT_DIM), 1)
        out_ref[...] = jnp.where(col == 0, out, jax.nn.softplus(out) + 1e-6)

    return kernel


def mlp_gaussian_forward_batched(xb, params, batch_chunk=8):
    """xb: (B, N, 2) float32 — B independent sequences through one kernel.

    Returns (pre_mean (B, N, 1), pre_std (B, N, 1)).
    """
    xb = xb.astype(jnp.float32)
    b_in, n, _ = xb.shape
    f32 = jnp.float32

    # Chunk size: multiple of 8 sublanes; one chunk per grid step.
    bc = max(8, int(batch_chunk))
    bc = ((bc + 7) // 8) * 8
    g = (b_in + bc - 1) // bc
    bp = g * bc
    if bp != b_in:
        xb = jnp.concatenate(
            [xb, jnp.zeros((bp - b_in, n, IN_DIM), f32)], axis=0)
    rows = n * bc

    # Interleave batch into rows, time-major per chunk: row = t*bc + b.
    x_rows = xb.reshape(g, bc, n, IN_DIM).transpose(0, 2, 1, 3).reshape(
        g, rows, IN_DIM)

    # ---- Weight preparation (exact in real arithmetic; only fp reassoc) ----
    # 1) Fold Linear(2->32) into layer-0's input projection:
    #    (x @ w1 + b1) @ w_ih0 + b0  ==  x @ (w1 @ w_ih0) + (b1 @ w_ih0 + b0).
    # 2) Fold the 0.5 of sigmoid(x)=0.5*tanh(0.5x)+0.5 into the i/f/o gate
    #    column blocks of every gate weight & bias (g block stays unscaled).
    gate_scale = jnp.concatenate([
        jnp.full((1, 2 * H), 0.5, f32),   # i, f
        jnp.ones((1, H), f32),            # g
        jnp.full((1, H), 0.5, f32),       # o
    ], axis=1)                            # (1, 4H)

    w_ih0 = params["w_ih"][0]                                    # (32, 128)
    w0 = (params["w1"] @ w_ih0) * gate_scale                     # (2, 128) f32
    b0 = (params["b1"] @ w_ih0 + params["b_lstm"][0]) * gate_scale  # (1, 128)
    wih_rest = (params["w_ih"][1:] * gate_scale).astype(jnp.bfloat16)  # (2,32,128)
    whh = (params["w_hh"] * gate_scale).astype(jnp.bfloat16)          # (3,32,128)
    b_rest = params["b_lstm"][1:] * gate_scale                        # (2,1,128)
    w2 = params["w2"].astype(jnp.bfloat16)                            # (32, 2)
    b2 = params["b2"]                                                 # (1, 2)

    # ---- VMEM budget: scratch + double-buffered IO/weights + slack ----
    def _nbytes(a):
        return int(a.size) * a.dtype.itemsize
    weight_bytes = sum(_nbytes(a) for a in (w0, b0, wih_rest, whh, b_rest, w2, b2))
    scratch_bytes = rows * (H + 4 * H) * 4                 # hid + pre_gates (f32)
    io_bytes = rows * (IN_DIM + OUT_DIM) * 4               # one x chunk + one out chunk
    vmem_limit = int(1.5 * (scratch_bytes + 2 * (io_bytes + weight_bytes))) + (2 << 20)
    vmem_limit = max(vmem_limit, 16 << 20)
    vmem_limit = min(vmem_limit, 64 << 20)   # v7x physical ceiling; beyond -> tile (TODO above)

    kernel = _make_kernel(n, bc)
    out = pl.pallas_call(
        kernel,
        out_shape=jax.ShapeDtypeStruct((g, rows, OUT_DIM), f32),
        grid=(g,),
        in_specs=[
            pl.BlockSpec((None, rows, IN_DIM), lambda i: (i, 0, 0)),          # x chunk
            pl.BlockSpec((IN_DIM, 4 * H), lambda i: (0, 0)),                  # w0
            pl.BlockSpec((1, 4 * H), lambda i: (0, 0)),                       # b0
            pl.BlockSpec((NUM_LAYERS - 1, H, 4 * H), lambda i: (0, 0, 0)),    # wih_rest
            pl.BlockSpec((NUM_LAYERS, H, 4 * H), lambda i: (0, 0, 0)),        # w_hh
            pl.BlockSpec((NUM_LAYERS - 1, 1, 4 * H), lambda i: (0, 0, 0)),    # b_rest
            pl.BlockSpec((H, OUT_DIM), lambda i: (0, 0)),                     # w2
            pl.BlockSpec((1, OUT_DIM), lambda i: (0, 0)),                     # b2
        ],
        out_specs=pl.BlockSpec((None, rows, OUT_DIM), lambda i: (i, 0, 0)),
        scratch_shapes=[
            pltpu.VMEM((rows, H), f32),       # hidden activations (reused per layer)
            pltpu.VMEM((rows, 4 * H), f32),   # pre-computed input gates
        ],
        compiler_params=pltpu.CompilerParams(
            dimension_semantics=("parallel",),     # chunks are independent (v7x: 2 TCs)
            vmem_limit_bytes=vmem_limit,
        ),
    )(x_rows, w0, b0, wih_rest, whh, b_rest, w2, b2)

    # Undo the row interleave, drop batch padding, split mean / std.
    out = out.reshape(g, n, bc, OUT_DIM).transpose(0, 2, 1, 3).reshape(
        bp, n, OUT_DIM)[:b_in]
    pre_mean = out[..., 0:1]
    pre_std = out[..., 1:2]
    return pre_mean, pre_std


def mlp_gaussian_forward(x, params, batch_chunk=8):
    """x: (N, 2) float32 — single sequence, exact module semantics.

    Returns (pre_mean (N, 1), pre_std (N, 1)).
    """
    pm, ps = mlp_gaussian_forward_batched(x[None, ...], params,
                                          batch_chunk=batch_chunk)
    return pm[0], ps[0]


def init_params(key):
    """Deterministic parameter init, PyTorch-style U(-1/sqrt(fan_in), +...)."""
    ks = jax.random.split(key, 10)

    def unif(k, shape, fan_in):
        bound = 1.0 / jnp.sqrt(jnp.float32(fan_in))
        return jax.random.uniform(k, shape, jnp.float32, -bound, bound)

    # Linear(2, 32): stored transposed -> (2, 32); bias as (1, 32)
    w1 = unif(ks[0], (IN_DIM, H), IN_DIM)
    b1 = unif(ks[1], (1, H), IN_DIM)

    # LSTM(32, 32, 3): per layer w_ih (32, 4*32), w_hh (32, 4*32),
    # combined bias (b_ih + b_hh) -> (1, 4*32). Gate order i,f,g,o.
    w_ih = unif(ks[2], (NUM_LAYERS, H, 4 * H), H)
    w_hh = unif(ks[3], (NUM_LAYERS, H, 4 * H), H)
    b_lstm = (unif(ks[4], (NUM_LAYERS, 1, 4 * H), H)
              + unif(ks[5], (NUM_LAYERS, 1, 4 * H), H))

    # Linear(32, 2): transposed -> (32, 2); bias (1, 2)
    w2 = unif(ks[6], (H, OUT_DIM), H)
    b2 = unif(ks[7], (1, OUT_DIM), H)

    return dict(w1=w1, b1=b1, w_ih=w_ih, w_hh=w_hh, b_lstm=b_lstm, w2=w2, b2=b2)


def mlp_gaussian_reference(x, params):
    """Pure-JAX reference (original, un-folded, f32 math) for correctness."""
    h_in = x @ params["w1"] + params["b1"]
    n = x.shape[0]
    for layer in range(NUM_LAYERS):
        w_ih = params["w_ih"][layer]
        w_hh = params["w_hh"][layer]
        bias = params["b_lstm"][layer]
        h = jnp.zeros((1, H), jnp.float32)
        c = jnp.zeros((1, H), jnp.float32)
        outs = []
        for t in range(n):
            x_t = h_in[t:t + 1]
            gates = x_t @ w_ih + h @ w_hh + bias
            i_g = jax.nn.sigmoid(gates[:, 0 * H:1 * H])
            f_g = jax.nn.sigmoid(gates[:, 1 * H:2 * H])
            g_g = jnp.tanh(gates[:, 2 * H:3 * H])
            o_g = jax.nn.sigmoid(gates[:, 3 * H:4 * H])
            c = f_g * c + i_g * g_g
            h = o_g * jnp.tanh(c)
            outs.append(h)
        h_in = jnp.concatenate(outs, axis=0)
    out = h_in @ params["w2"] + params["b2"]
    return out[:, 0:1], jax.nn.softplus(out[:, 1:2]) + 1e-6


if __name__ == "__main__":
    key = jax.random.PRNGKey(0)
    k_param, k_x = jax.random.split(key)
    params = init_params(k_param)

    N = 8   # sequence length (unbatched LSTM input, as implied by chunk dim=1)
    B = 12  # independent sequences for the batched path (2 grid chunks of 8)

    ref_fn = jax.jit(lambda xi: mlp_gaussian_reference(xi, params))
    # Tolerance: 2e-2 — the kernel uses bf16 MXU operands (f32 accumulate) on
    # the recurrence, which introduces ~1e-3-level drift vs. the f32 reference.
    RTOL = ATOL = 2e-2

    # 1) Single sequence — exact module semantics.
    x = jax.random.normal(k_x, (N, IN_DIM), jnp.float32)
    pre_mean, pre_std = mlp_gaussian_forward(x, params)
    jax.block_until_ready((pre_mean, pre_std))

    ref_mean, ref_std = ref_fn(x)
    assert pre_mean.shape == (N, 1) and pre_std.shape == (N, 1)
    assert jnp.allclose(pre_mean, ref_mean, rtol=RTOL, atol=ATOL)
    assert jnp.allclose(pre_std, ref_std, rtol=RTOL, atol=ATOL)
    assert bool(jnp.all(pre_std > 0))

    # 2) Batched: B independent sequences through one kernel (grid of 2 chunks,
    #    batch padded 12 -> 16, 8 sequences per chunk interleaved into rows).
    xb = jax.random.normal(jax.random.PRNGKey(1), (B, N, IN_DIM), jnp.float32)
    bm, bs = mlp_gaussian_forward_batched(xb, params, batch_chunk=8)
    jax.block_until_ready((bm, bs))
    assert bm.shape == (B, N, 1) and bs.shape == (B, N, 1)
    for i in range(B):
        rm, rs = ref_fn(xb[i])
        assert jnp.allclose(bm[i], rm, rtol=RTOL, atol=ATOL)
        assert jnp.allclose(bs[i], rs, rtol=RTOL, atol=ATOL)
    assert bool(jnp.all(bs > 0))

    print("KERNEL_OK")
</pallas_src>

<mosaic_0001>
module attributes {stable_mosaic.version = 11 : i64} {
  func.func @kernel(%arg0: i32, %arg1: memref<1x64x2xf32, #tpu.memory_space<vmem>>, %arg2: memref<2x128xf32, #tpu.memory_space<vmem>>, %arg3: memref<1x128xf32, #tpu.memory_space<vmem>>, %arg4: memref<2x32x128xbf16, #tpu.memory_space<vmem>>, %arg5: memref<3x32x128xbf16, #tpu.memory_space<vmem>>, %arg6: memref<2x1x128xf32, #tpu.memory_space<vmem>>, %arg7: memref<32x2xbf16, #tpu.memory_space<vmem>>, %arg8: memref<1x2xf32, #tpu.memory_space<vmem>>, %arg9: memref<1x64x2xf32, #tpu.memory_space<vmem>>, %arg10: memref<64x32xf32, #tpu.memory_space<vmem>>, %arg11: memref<64x128xf32, #tpu.memory_space<vmem>>) attributes {dimension_semantics = [#tpu.dimension_semantics<parallel>], iteration_bounds = array<i64: 1>, scalar_prefetch = 0 : i64, scratch_operands = 2 : i64, tpu.core_type = #tpu.core_type<tc>, window_params = [{transform_indices = @transform_0, window_bounds = array<i64: 1, 64, 2>}, {pipeline_mode = #tpu.pipeline_mode<synchronous>, transform_indices = @transform_1, window_bounds = array<i64: 2, 128>}, {pipeline_mode = #tpu.pipeline_mode<synchronous>, transform_indices = @transform_2, window_bounds = array<i64: 1, 128>}, {pipeline_mode = #tpu.pipeline_mode<synchronous>, transform_indices = @transform_3, window_bounds = array<i64: 2, 32, 128>}, {pipeline_mode = #tpu.pipeline_mode<synchronous>, transform_indices = @transform_4, window_bounds = array<i64: 3, 32, 128>}, {pipeline_mode = #tpu.pipeline_mode<synchronous>, transform_indices = @transform_5, window_bounds = array<i64: 2, 1, 128>}, {pipeline_mode = #tpu.pipeline_mode<synchronous>, transform_indices = @transform_6, window_bounds = array<i64: 32, 2>}, {pipeline_mode = #tpu.pipeline_mode<synchronous>, transform_indices = @transform_7, window_bounds = array<i64: 1, 2>}, {transform_indices = @transform_8, window_bounds = array<i64: 1, 64, 2>}]} {
    %0 = tpu.iota {dimensions = array<i32: 1>} : vector<1x128xi32>
    %c64_i32 = arith.constant 64 : i32
    %1 = vector.broadcast %c64_i32 : i32 to vector<1x128xi32>
    %2 = arith.cmpi sge, %0, %1 : vector<1x128xi32>
    %c96_i32 = arith.constant 96 : i32
    %3 = vector.broadcast %c96_i32 : i32 to vector<1x128xi32>
    %4 = arith.cmpi slt, %0, %3 : vector<1x128xi32>
    %5 = arith.andi %2, %4 : vector<1x128xi1>
    %cst = arith.constant 1.000000e+00 : f32
    %cst_0 = arith.constant 5.000000e-01 : f32
    %6 = vector.broadcast %cst : f32 to vector<1x128xf32>
    %7 = vector.broadcast %cst_0 : f32 to vector<1x128xf32>
    %8 = arith.select %5, %6, %7 : vector<1x128xi1>, vector<1x128xf32>
    %cst_1 = arith.constant 0.000000e+00 : f32
    %cst_2 = arith.constant 5.000000e-01 : f32
    %9 = vector.broadcast %cst_1 : f32 to vector<1x128xf32>
    %10 = vector.broadcast %cst_2 : f32 to vector<1x128xf32>
    %11 = arith.select %5, %9, %10 : vector<1x128xi1>, vector<1x128xf32>
    %c0 = arith.constant 0 : index
    %c0_3 = arith.constant 0 : index
    %c0_4 = arith.constant 0 : index
    %12 = vector.load %arg1[%c0, %c0_3, %c0_4] : memref<1x64x2xf32, #tpu.memory_space<vmem>>, vector<1x64x2xf32>
    %13 = vector.shape_cast %12 : vector<1x64x2xf32> to vector<64x2xf32>
    %c0_5 = arith.constant 0 : index
    %c0_6 = arith.constant 0 : index
    %14 = vector.load %arg2[%c0_5, %c0_6] : memref<2x128xf32, #tpu.memory_space<vmem>>, vector<2x128xf32>
    %cst_7 = arith.constant dense<0.000000e+00> : vector<64x128xf32>
    %15 = tpu.matmul %13, %14, %cst_7 {dimension_numbers = #tpu.dot_dimension_numbers<[1], [0], [0], [1], [0, 0, 1, 1], [], []>} : vector<64x2xf32>, vector<2x128xf32>, vector<64x128xf32> -> vector<64x128xf32>
    %c0_8 = arith.constant 0 : index
    %c0_9 = arith.constant 0 : index
    %16 = vector.load %arg3[%c0_8, %c0_9] : memref<1x128xf32, #tpu.memory_space<vmem>>, vector<1x128xf32>
    %17 = vector.broadcast %16 : vector<1x128xf32> to vector<64x128xf32>
    %18 = arith.addf %15, %17 : vector<64x128xf32>
    %c0_10 = arith.constant 0 : index
    %c0_11 = arith.constant 0 : index
    %19 = vector.load %arg11[%c0_10, %c0_11] : memref<64x128xf32, #tpu.memory_space<vmem>>, vector<64x128xf32>
    tpu.vector_store %arg11[%c0_10, %c0_11], %18 {strides = array<i32>} : memref<64x128xf32, #tpu.memory_space<vmem>>, vector<64x128xf32>,
    %c0_12 = arith.constant 0 : index
    %c0_13 = arith.constant 0 : index
    %c0_14 = arith.constant 0 : index
    %20 = vector.load %arg5[%c0_12, %c0_13, %c0_14] : memref<3x32x128xbf16, #tpu.memory_space<vmem>>, vector<1x32x128xbf16>
    %21 = vector.shape_cast %20 : vector<1x32x128xbf16> to vector<32x128xbf16>
    %cst_15 = arith.constant 0.000000e+00 : f32
    %22 = vector.broadcast %cst_15 : f32 to vector<8x32xf32>
    %c0_i32 = arith.constant 0 : i32
    %c8_i32 = arith.constant 8 : i32
    %23 = arith.muli %c0_i32, %c8_i32 : i32
    %24 = tpu.assume_multiple %23, 8 : i32
    %25 = arith.index_cast %24 : i32 to index
    %c0_16 = arith.constant 0 : index
    %26 = vector.load %arg11[%25, %c0_16] : memref<64x128xf32, #tpu.memory_space<vmem>>, vector<8x128xf32>
    %27 = arith.truncf %22 : vector<8x32xf32> to vector<8x32xbf16>
    %cst_17 = arith.constant dense<0.000000e+00> : vector<8x128xf32>
    %28 = tpu.matmul %27, %21, %cst_17 {dimension_numbers = #tpu.dot_dimension_numbers<[1], [0], [0], [1], [0, 0, 1, 1], [], []>} : vector<8x32xbf16>, vector<32x128xbf16>, vector<8x128xf32> -> vector<8x128xf32>
    %29 = arith.addf %26, %28 : vector<8x128xf32>
    %30 = math.tanh %29 : vector<8x128xf32>
    %31 = vector.broadcast %8 : vector<1x128xf32> to vector<8x128xf32>
    %32 = arith.mulf %31, %30 : vector<8x128xf32>
    %33 = vector.broadcast %11 : vector<1x128xf32> to vector<8x128xf32>
    %34 = arith.addf %32, %33 : vector<8x128xf32>
    %35 = vector.extract_strided_slice %34 {offsets = [0, 0], sizes = [8, 32], strides = [1, 1]} : vector<8x128xf32> to vector<8x32xf32>
    %36 = vector.extract_strided_slice %34 {offsets = [0, 32], sizes = [8, 32], strides = [1, 1]} : vector<8x128xf32> to vector<8x32xf32>
    %37 = vector.extract_strided_slice %34 {offsets = [0, 64], sizes = [8, 32], strides = [1, 1]} : vector<8x128xf32> to vector<8x32xf32>
    %38 = vector.extract_strided_slice %34 {offsets = [0, 96], sizes = [8, 32], strides = [1, 1]} : vector<8x128xf32> to vector<8x32xf32>
    %39 = arith.mulf %36, %22 : vector<8x32xf32>
    %40 = arith.mulf %35, %37 : vector<8x32xf32>
    %41 = arith.addf %39, %40 : vector<8x32xf32>
    %42 = math.tanh %41 : vector<8x32xf32>
    %43 = arith.mulf %38, %42 : vector<8x32xf32>
    %44 = arith.index_cast %24 : i32 to index
    %c0_18 = arith.constant 0 : index
    %45 = vector.load %arg10[%44, %c0_18] : memref<64x32xf32, #tpu.memory_space<vmem>>, vector<8x32xf32>
    tpu.vector_store %arg10[%44, %c0_18], %43 {strides = array<i32>} : memref<64x32xf32, #tpu.memory_space<vmem>>, vector<8x32xf32>,
    %c1_i32 = arith.constant 1 : i32
    %c8_i32_19 = arith.constant 8 : i32
    %46 = arith.muli %c1_i32, %c8_i32_19 : i32
    %47 = tpu.assume_multiple %46, 8 : i32
    %48 = arith.index_cast %47 : i32 to index
    %c0_20 = arith.constant 0 : index
    %49 = vector.load %arg11[%48, %c0_20] : memref<64x128xf32, #tpu.memory_space<vmem>>, vector<8x128xf32>
    %50 = arith.truncf %43 : vector<8x32xf32> to vector<8x32xbf16>
    %cst_21 = arith.constant dense<0.000000e+00> : vector<8x128xf32>
    %51 = tpu.matmul %50, %21, %cst_21 {dimension_numbers = #tpu.dot_dimension_numbers<[1], [0], [0], [1], [0, 0, 1, 1], [], []>} : vector<8x32xbf16>, vector<32x128xbf16>, vector<8x128xf32> -> vector<8x128xf32>
    %52 = arith.addf %49, %51 : vector<8x128xf32>
    %53 = math.tanh %52 : vector<8x128xf32>
    %54 = vector.broadcast %8 : vector<1x128xf32> to vector<8x128xf32>
    %55 = arith.mulf %54, %53 : vector<8x128xf32>
    %56 = vector.broadcast %11 : vector<1x128xf32> to vector<8x128xf32>
    %57 = arith.addf %55, %56 : vector<8x128xf32>
    %58 = vector.extract_strided_slice %57 {offsets = [0, 0], sizes = [8, 32], strides = [1, 1]} : vector<8x128xf32> to vector<8x32xf32>
    %59 = vector.extract_strided_slice %57 {offsets = [0, 32], sizes = [8, 32], strides = [1, 1]} : vector<8x128xf32> to vector<8x32xf32>
    %60 = vector.extract_strided_slice %57 {offsets = [0, 64], sizes = [8, 32], strides = [1, 1]} : vector<8x128xf32> to vector<8x32xf32>
    %61 = vector.extract_strided_slice %57 {offsets = [0, 96], sizes = [8, 32], strides = [1, 1]} : vector<8x128xf32> to vector<8x32xf32>
    %62 = arith.mulf %59, %41 : vector<8x32xf32>
    %63 = arith.mulf %58, %60 : vector<8x32xf32>
    %64 = arith.addf %62, %63 : vector<8x32xf32>
    %65 = math.tanh %64 : vector<8x32xf32>
    %66 = arith.mulf %61, %65 : vector<8x32xf32>
    %67 = arith.index_cast %47 : i32 to index
    %c0_22 = arith.constant 0 : index
    %68 = vector.load %arg10[%67, %c0_22] : memref<64x32xf32, #tpu.memory_space<vmem>>, vector<8x32xf32>
    tpu.vector_store %arg10[%67, %c0_22], %66 {strides = array<i32>} : memref<64x32xf32, #tpu.memory_space<vmem>>, vector<8x32xf32>,
    %c2_i32 = arith.constant 2 : i32
    %c8_i32_23 = arith.constant 8 : i32
    %69 = arith.muli %c2_i32, %c8_i32_23 : i32
    %70 = tpu.assume_multiple %69, 8 : i32
    %71 = arith.index_cast %70 : i32 to index
    %c0_24 = arith.constant 0 : index
    %72 = vector.load %arg11[%71, %c0_24] : memref<64x128xf32, #tpu.memory_space<vmem>>, vector<8x128xf32>
    %73 = arith.truncf %66 : vector<8x32xf32> to vector<8x32xbf16>
    %cst_25 = arith.constant dense<0.000000e+00> : vector<8x128xf32>
    %74 = tpu.matmul %73, %21, %cst_25 {dimension_numbers = #tpu.dot_dimension_numbers<[1], [0], [0], [1], [0, 0, 1, 1], [], []>} : vector<8x32xbf16>, vector<32x128xbf16>, vector<8x128xf32> -> vector<8x128xf32>
    %75 = arith.addf %72, %74 : vector<8x128xf32>
    %76 = math.tanh %75 : vector<8x128xf32>
    %77 = vector.broadcast %8 : vector<1x128xf32> to vector<8x128xf32>
    %78 = arith.mulf %77, %76 : vector<8x128xf32>
    %79 = vector.broadcast %11 : vector<1x128xf32> to vector<8x128xf32>
    %80 = arith.addf %78, %79 : vector<8x128xf32>
    %81 = vector.extract_strided_slice %80 {offsets = [0, 0], sizes = [8, 32], strides = [1, 1]} : vector<8x128xf32> to vector<8x32xf32>
    %82 = vector.extract_strided_slice %80 {offsets = [0, 32], sizes = [8, 32], strides = [1, 1]} : vector<8x128xf32> to vector<8x32xf32>
    %83 = vector.extract_strided_slice %80 {offsets = [0, 64], sizes = [8, 32], strides = [1, 1]} : vector<8x128xf32> to vector<8x32xf32>
    %84 = vector.extract_strided_slice %80 {offsets = [0, 96], sizes = [8, 32], strides = [1, 1]} : vector<8x128xf32> to vector<8x32xf32>
    %85 = arith.mulf %82, %64 : vector<8x32xf32>
    %86 = arith.mulf %81, %83 : vector<8x32xf32>
    %87 = arith.addf %85, %86 : vector<8x32xf32>
    %88 = math.tanh %87 : vector<8x32xf32>
    %89 = arith.mulf %84, %88 : vector<8x32xf32>
    %90 = arith.index_cast %70 : i32 to index
    %c0_26 = arith.constant 0 : index
    %91 = vector.load %arg10[%90, %c0_26] : memref<64x32xf32, #tpu.memory_space<vmem>>, vector<8x32xf32>
    tpu.vector_store %arg10[%90, %c0_26], %89 {strides = array<i32>} : memref<64x32xf32, #tpu.memory_space<vmem>>, vector<8x32xf32>,
    %c3_i32 = arith.constant 3 : i32
    %c8_i32_27 = arith.constant 8 : i32
    %92 = arith.muli %c3_i32, %c8_i32_27 : i32
    %93 = tpu.assume_multiple %92, 8 : i32
    %94 = arith.index_cast %93 : i32 to index
    %c0_28 = arith.constant 0 : index
    %95 = vector.load %arg11[%94, %c0_28] : memref<64x128xf32, #tpu.memory_space<vmem>>, vector<8x128xf32>
    %96 = arith.truncf %89 : vector<8x32xf32> to vector<8x32xbf16>
    %cst_29 = arith.constant dense<0.000000e+00> : vector<8x128xf32>
    %97 = tpu.matmul %96, %21, %cst_29 {dimension_numbers = #tpu.dot_dimension_numbers<[1], [0], [0], [1], [0, 0, 1, 1], [], []>} : vector<8x32xbf16>, vector<32x128xbf16>, vector<8x128xf32> -> vector<8x128xf32>
    %98 = arith.addf %95, %97 : vector<8x128xf32>
    %99 = math.tanh %98 : vector<8x128xf32>
    %100 = vector.broadcast %8 : vector<1x128xf32> to vector<8x128xf32>
    %101 = arith.mulf %100, %99 : vector<8x128xf32>
    %102 = vector.broadcast %11 : vector<1x128xf32> to vector<8x128xf32>
    %103 = arith.addf %101, %102 : vector<8x128xf32>
    %104 = vector.extract_strided_slice %103 {offsets = [0, 0], sizes = [8, 32], strides = [1, 1]} : vector<8x128xf32> to vector<8x32xf32>
    %105 = vector.extract_strided_slice %103 {offsets = [0, 32], sizes = [8, 32], strides = [1, 1]} : vector<8x128xf32> to vector<8x32xf32>
    %106 = vector.extract_strided_slice %103 {offsets = [0, 64], sizes = [8, 32], strides = [1, 1]} : vector<8x128xf32> to vector<8x32xf32>
    %107 = vector.extract_strided_slice %103 {offsets = [0, 96], sizes = [8, 32], strides = [1, 1]} : vector<8x128xf32> to vector<8x32xf32>
    %108 = arith.mulf %105, %87 : vector<8x32xf32>
    %109 = arith.mulf %104, %106 : vector<8x32xf32>
    %110 = arith.addf %108, %109 : vector<8x32xf32>
    %111 = math.tanh %110 : vector<8x32xf32>
    %112 = arith.mulf %107, %111 : vector<8x32xf32>
    %113 = arith.index_cast %93 : i32 to index
    %c0_30 = arith.constant 0 : index
    %114 = vector.load %arg10[%113, %c0_30] : memref<64x32xf32, #tpu.memory_space<vmem>>, vector<8x32xf32>
    tpu.vector_store %arg10[%113, %c0_30], %112 {strides = array<i32>} : memref<64x32xf32, #tpu.memory_space<vmem>>, vector<8x32xf32>,
    %c4_i32 = arith.constant 4 : i32
    %c8_i32_31 = arith.constant 8 : i32
    %115 = arith.muli %c4_i32, %c8_i32_31 : i32
    %116 = tpu.assume_multiple %115, 8 : i32
    %117 = arith.index_cast %116 : i32 to index
    %c0_32 = arith.constant 0 : index
    %118 = vector.load %arg11[%117, %c0_32] : memref<64x128xf32, #tpu.memory_space<vmem>>, vector<8x128xf32>
    %119 = arith.truncf %112 : vector<8x32xf32> to vector<8x32xbf16>
    %cst_33 = arith.constant dense<0.000000e+00> : vector<8x128xf32>
    %120 = tpu.matmul %119, %21, %cst_33 {dimension_numbers = #tpu.dot_dimension_numbers<[1], [0], [0], [1], [0, 0, 1, 1], [], []>} : vector<8x32xbf16>, vector<32x128xbf16>, vector<8x128xf32> -> vector<8x128xf32>
    %121 = arith.addf %118, %120 : vector<8x128xf32>
    %122 = math.tanh %121 : vector<8x128xf32>
    %123 = vector.broadcast %8 : vector<1x128xf32> to vector<8x128xf32>
    %124 = arith.mulf %123, %122 : vector<8x128xf32>
    %125 = vector.broadcast %11 : vector<1x128xf32> to vector<8x128xf32>
    %126 = arith.addf %124, %125 : vector<8x128xf32>
    %127 = vector.extract_strided_slice %126 {offsets = [0, 0], sizes = [8, 32], strides = [1, 1]} : vector<8x128xf32> to vector<8x32xf32>
    %128 = vector.extract_strided_slice %126 {offsets = [0, 32], sizes = [8, 32], strides = [1, 1]} : vector<8x128xf32> to vector<8x32xf32>
    %129 = vector.extract_strided_slice %126 {offsets = [0, 64], sizes = [8, 32], strides = [1, 1]} : vector<8x128xf32> to vector<8x32xf32>
    %130 = vector.extract_strided_slice %126 {offsets = [0, 96], sizes = [8, 32], strides = [1, 1]} : vector<8x128xf32> to vector<8x32xf32>
    %131 = arith.mulf %128, %110 : vector<8x32xf32>
    %132 = arith.mulf %127, %129 : vector<8x32xf32>
    %133 = arith.addf %131, %132 : vector<8x32xf32>
    %134 = math.tanh %133 : vector<8x32xf32>
    %135 = arith.mulf %130, %134 : vector<8x32xf32>
    %136 = arith.index_cast %116 : i32 to index
    %c0_34 = arith.constant 0 : index
    %137 = vector.load %arg10[%136, %c0_34] : memref<64x32xf32, #tpu.memory_space<vmem>>, vector<8x32xf32>
    tpu.vector_store %arg10[%136, %c0_34], %135 {strides = array<i32>} : memref<64x32xf32, #tpu.memory_space<vmem>>, vector<8x32xf32>,
    %c5_i32 = arith.constant 5 : i32
    %c8_i32_35 = arith.constant 8 : i32
    %138 = arith.muli %c5_i32, %c8_i32_35 : i32
    %139 = tpu.assume_multiple %138, 8 : i32
    %140 = arith.index_cast %139 : i32 to index
    %c0_36 = arith.constant 0 : index
    %141 = vector.load %arg11[%140, %c0_36] : memref<64x128xf32, #tpu.memory_space<vmem>>, vector<8x128xf32>
    %142 = arith.truncf %135 : vector<8x32xf32> to vector<8x32xbf16>
    %cst_37 = arith.constant dense<0.000000e+00> : vector<8x128xf32>
    %143 = tpu.matmul %142, %21, %cst_37 {dimension_numbers = #tpu.dot_dimension_numbers<[1], [0], [0], [1], [0, 0, 1, 1], [], []>} : vector<8x32xbf16>, vector<32x128xbf16>, vector<8x128xf32> -> vector<8x128xf32>
    %144 = arith.addf %141, %143 : vector<8x128xf32>
    %145 = math.tanh %144 : vector<8x128xf32>
    %146 = vector.broadcast %8 : vector<1x128xf32> to vector<8x128xf32>
    %147 = arith.mulf %146, %145 : vector<8x128xf32>
    %148 = vector.broadcast %11 : vector<1x128xf32> to vector<8x128xf32>
    %149 = arith.addf %147, %148 : vector<8x128xf32>
    %150 = vector.extract_strided_slice %149 {offsets = [0, 0], sizes = [8, 32], strides = [1, 1]} : vector<8x128xf32> to vector<8x32xf32>
    %151 = vector.extract_strided_slice %149 {offsets = [0, 32], sizes = [8, 32], strides = [1, 1]} : vector<8x128xf32> to vector<8x32xf32>
    %152 = vector.extract_strided_slice %149 {offsets = [0, 64], sizes = [8, 32], strides = [1, 1]} : vector<8x128xf32> to vector<8x32xf32>
    %153 = vector.extract_strided_slice %149 {offsets = [0, 96], sizes = [8, 32], strides = [1, 1]} : vector<8x128xf32> to vector<8x32xf32>
    %154 = arith.mulf %151, %133 : vector<8x32xf32>
    %155 = arith.mulf %150, %152 : vector<8x32xf32>
    %156 = arith.addf %154, %155 : vector<8x32xf32>
    %157 = math.tanh %156 : vector<8x32xf32>
    %158 = arith.mulf %153, %157 : vector<8x32xf32>
    %159 = arith.index_cast %139 : i32 to index
    %c0_38 = arith.constant 0 : index
    %160 = vector.load %arg10[%159, %c0_38] : memref<64x32xf32, #tpu.memory_space<vmem>>, vector<8x32xf32>
    tpu.vector_store %arg10[%159, %c0_38], %158 {strides = array<i32>} : memref<64x32xf32, #tpu.memory_space<vmem>>, vector<8x32xf32>,
    %c6_i32 = arith.constant 6 : i32
    %c8_i32_39 = arith.constant 8 : i32
    %161 = arith.muli %c6_i32, %c8_i32_39 : i32
    %162 = tpu.assume_multiple %161, 8 : i32
    %163 = arith.index_cast %162 : i32 to index
    %c0_40 = arith.constant 0 : index
    %164 = vector.load %arg11[%163, %c0_40] : memref<64x128xf32, #tpu.memory_space<vmem>>, vector<8x128xf32>
    %165 = arith.truncf %158 : vector<8x32xf32> to vector<8x32xbf16>
    %cst_41 = arith.constant dense<0.000000e+00> : vector<8x128xf32>
    %166 = tpu.matmul %165, %21, %cst_41 {dimension_numbers = #tpu.dot_dimension_numbers<[1], [0], [0], [1], [0, 0, 1, 1], [], []>} : vector<8x32xbf16>, vector<32x128xbf16>, vector<8x128xf32> -> vector<8x128xf32>
    %167 = arith.addf %164, %166 : vector<8x128xf32>
    %168 = math.tanh %167 : vector<8x128xf32>
    %169 = vector.broadcast %8 : vector<1x128xf32> to vector<8x128xf32>
    %170 = arith.mulf %169, %168 : vector<8x128xf32>
    %171 = vector.broadcast %11 : vector<1x128xf32> to vector<8x128xf32>
    %172 = arith.addf %170, %171 : vector<8x128xf32>
    %173 = vector.extract_strided_slice %172 {offsets = [0, 0], sizes = [8, 32], strides = [1, 1]} : vector<8x128xf32> to vector<8x32xf32>
    %174 = vector.extract_strided_slice %172 {offsets = [0, 32], sizes = [8, 32], strides = [1, 1]} : vector<8x128xf32> to vector<8x32xf32>
    %175 = vector.extract_strided_slice %172 {offsets = [0, 64], sizes = [8, 32], strides = [1, 1]} : vector<8x128xf32> to vector<8x32xf32>
    %176 = vector.extract_strided_slice %172 {offsets = [0, 96], sizes = [8, 32], strides = [1, 1]} : vector<8x128xf32> to vector<8x32xf32>
    %177 = arith.mulf %174, %156 : vector<8x32xf32>
    %178 = arith.mulf %173, %175 : vector<8x32xf32>
    %179 = arith.addf %177, %178 : vector<8x32xf32>
    %180 = math.tanh %179 : vector<8x32xf32>
    %181 = arith.mulf %176, %180 : vector<8x32xf32>
    %182 = arith.index_cast %162 : i32 to index
    %c0_42 = arith.constant 0 : index
    %183 = vector.load %arg10[%182, %c0_42] : memref<64x32xf32, #tpu.memory_space<vmem>>, vector<8x32xf32>
    tpu.vector_store %arg10[%182, %c0_42], %181 {strides = array<i32>} : memref<64x32xf32, #tpu.memory_space<vmem>>, vector<8x32xf32>,
    %c7_i32 = arith.constant 7 : i32
    %c8_i32_43 = arith.constant 8 : i32
    %184 = arith.muli %c7_i32, %c8_i32_43 : i32
    %185 = tpu.assume_multiple %184, 8 : i32
    %186 = arith.index_cast %185 : i32 to index
    %c0_44 = arith.constant 0 : index
    %187 = vector.load %arg11[%186, %c0_44] : memref<64x128xf32, #tpu.memory_space<vmem>>, vector<8x128xf32>
    %188 = arith.truncf %181 : vector<8x32xf32> to vector<8x32xbf16>
    %cst_45 = arith.constant dense<0.000000e+00> : vector<8x128xf32>
    %189 = tpu.matmul %188, %21, %cst_45 {dimension_numbers = #tpu.dot_dimension_numbers<[1], [0], [0], [1], [0, 0, 1, 1], [], []>} : vector<8x32xbf16>, vector<32x128xbf16>, vector<8x128xf32> -> vector<8x128xf32>
    %190 = arith.addf %187, %189 : vector<8x128xf32>
    %191 = math.tanh %190 : vector<8x128xf32>
    %192 = vector.broadcast %8 : vector<1x128xf32> to vector<8x128xf32>
    %193 = arith.mulf %192, %191 : vector<8x128xf32>
    %194 = vector.broadcast %11 : vector<1x128xf32> to vector<8x128xf32>
    %195 = arith.addf %193, %194 : vector<8x128xf32>
    %196 = vector.extract_strided_slice %195 {offsets = [0, 0], sizes = [8, 32], strides = [1, 1]} : vector<8x128xf32> to vector<8x32xf32>
    %197 = vector.extract_strided_slice %195 {offsets = [0, 32], sizes = [8, 32], strides = [1, 1]} : vector<8x128xf32> to vector<8x32xf32>
    %198 = vector.extract_strided_slice %195 {offsets = [0, 64], sizes = [8, 32], strides = [1, 1]} : vector<8x128xf32> to vector<8x32xf32>
    %199 = vector.extract_strided_slice %195 {offsets = [0, 96], sizes = [8, 32], strides = [1, 1]} : vector<8x128xf32> to vector<8x32xf32>
    %200 = arith.mulf %197, %179 : vector<8x32xf32>
    %201 = arith.mulf %196, %198 : vector<8x32xf32>
    %202 = arith.addf %200, %201 : vector<8x32xf32>
    %203 = math.tanh %202 : vector<8x32xf32>
    %204 = arith.mulf %199, %203 : vector<8x32xf32>
    %205 = arith.index_cast %185 : i32 to index
    %c0_46 = arith.constant 0 : index
    %206 = vector.load %arg10[%205, %c0_46] : memref<64x32xf32, #tpu.memory_space<vmem>>, vector<8x32xf32>
    tpu.vector_store %arg10[%205, %c0_46], %204 {strides = array<i32>} : memref<64x32xf32, #tpu.memory_space<vmem>>, vector<8x32xf32>,
    %c8_i32_47 = arith.constant 8 : i32
    %c0_48 = arith.constant 0 : index
    %c0_49 = arith.constant 0 : index
    %207 = vector.load %arg10[%c0_48, %c0_49] : memref<64x32xf32, #tpu.memory_space<vmem>>, vector<64x32xf32>
    %208 = arith.truncf %207 : vector<64x32xf32> to vector<64x32xbf16>
    %c0_50 = arith.constant 0 : index
    %c0_51 = arith.constant 0 : index
    %c0_52 = arith.constant 0 : index
    %209 = vector.load %arg4[%c0_50, %c0_51, %c0_52] : memref<2x32x128xbf16, #tpu.memory_space<vmem>>, vector<1x32x128xbf16>
    %210 = vector.shape_cast %209 : vector<1x32x128xbf16> to vector<32x128xbf16>
    %cst_53 = arith.constant dense<0.000000e+00> : vector<64x128xf32>
    %211 = tpu.matmul %208, %210, %cst_53 {dimension_numbers = #tpu.dot_dimension_numbers<[1], [0], [0], [1], [0, 0, 1, 1], [], []>} : vector<64x32xbf16>, vector<32x128xbf16>, vector<64x128xf32> -> vector<64x128xf32>
    %c0_54 = arith.constant 0 : index
    %c0_55 = arith.constant 0 : index
    %c0_56 = arith.constant 0 : index
    %212 = vector.load %arg6[%c0_54, %c0_55, %c0_56] : memref<2x1x128xf32, #tpu.memory_space<vmem>>, vector<1x1x128xf32>
    %213 = vector.shape_cast %212 : vector<1x1x128xf32> to vector<1x128xf32>
    %214 = vector.broadcast %213 : vector<1x128xf32> to vector<64x128xf32>
    %215 = arith.addf %211, %214 : vector<64x128xf32>
    %c0_57 = arith.constant 0 : index
    %c0_58 = arith.constant 0 : index
    %216 = vector.load %arg11[%c0_57, %c0_58] : memref<64x128xf32, #tpu.memory_space<vmem>>, vector<64x128xf32>
    tpu.vector_store %arg11[%c0_57, %c0_58], %215 {strides = array<i32>} : memref<64x128xf32, #tpu.memory_space<vmem>>, vector<64x128xf32>,
    %c1 = arith.constant 1 : index
    %c0_59 = arith.constant 0 : index
    %c0_60 = arith.constant 0 : index
    %217 = vector.load %arg5[%c1, %c0_59, %c0_60] : memref<3x32x128xbf16, #tpu.memory_space<vmem>>, vector<1x32x128xbf16>
    %218 = vector.shape_cast %217 : vector<1x32x128xbf16> to vector<32x128xbf16>
    %cst_61 = arith.constant 0.000000e+00 : f32
    %219 = vector.broadcast %cst_61 : f32 to vector<8x32xf32>
    %c0_i32_62 = arith.constant 0 : i32
    %c8_i32_63 = arith.constant 8 : i32
    %220 = arith.muli %c0_i32_62, %c8_i32_63 : i32
    %221 = tpu.assume_multiple %220, 8 : i32
    %222 = arith.index_cast %221 : i32 to index
    %c0_64 = arith.constant 0 : index
    %223 = vector.load %arg11[%222, %c0_64] : memref<64x128xf32, #tpu.memory_space<vmem>>, vector<8x128xf32>
    %224 = arith.truncf %219 : vector<8x32xf32> to vector<8x32xbf16>
    %cst_65 = arith.constant dense<0.000000e+00> : vector<8x128xf32>
    %225 = tpu.matmul %224, %218, %cst_65 {dimension_numbers = #tpu.dot_dimension_numbers<[1], [0], [0], [1], [0, 0, 1, 1], [], []>} : vector<8x32xbf16>, vector<32x128xbf16>, vector<8x128xf32> -> vector<8x128xf32>
    %226 = arith.addf %223, %225 : vector<8x128xf32>
    %227 = math.tanh %226 : vector<8x128xf32>
    %228 = vector.broadcast %8 : vector<1x128xf32> to vector<8x128xf32>
    %229 = arith.mulf %228, %227 : vector<8x128xf32>
    %230 = vector.broadcast %11 : vector<1x128xf32> to vector<8x128xf32>
    %231 = arith.addf %229, %230 : vector<8x128xf32>
    %232 = vector.extract_strided_slice %231 {offsets = [0, 0], sizes = [8, 32], strides = [1, 1]} : vector<8x128xf32> to vector<8x32xf32>
    %233 = vector.extract_strided_slice %231 {offsets = [0, 32], sizes = [8, 32], strides = [1, 1]} : vector<8x128xf32> to vector<8x32xf32>
    %234 = vector.extract_strided_slice %231 {offsets = [0, 64], sizes = [8, 32], strides = [1, 1]} : vector<8x128xf32> to vector<8x32xf32>
    %235 = vector.extract_strided_slice %231 {offsets = [0, 96], sizes = [8, 32], strides = [1, 1]} : vector<8x128xf32> to vector<8x32xf32>
    %236 = arith.mulf %233, %219 : vector<8x32xf32>
    %237 = arith.mulf %232, %234 : vector<8x32xf32>
    %238 = arith.addf %236, %237 : vector<8x32xf32>
    %239 = math.tanh %238 : vector<8x32xf32>
    %240 = arith.mulf %235, %239 : vector<8x32xf32>
    %241 = arith.index_cast %221 : i32 to index
    %c0_66 = arith.constant 0 : index
    %242 = vector.load %arg10[%241, %c0_66] : memref<64x32xf32, #tpu.memory_space<vmem>>, vector<8x32xf32>
    tpu.vector_store %arg10[%241, %c0_66], %240 {strides = array<i32>} : memref<64x32xf32, #tpu.memory_space<vmem>>, vector<8x32xf32>,
    %c1_i32_67 = arith.constant 1 : i32
    %c8_i32_68 = arith.constant 8 : i32
    %243 = arith.muli %c1_i32_67, %c8_i32_68 : i32
    %244 = tpu.assume_multiple %243, 8 : i32
    %245 = arith.index_cast %244 : i32 to index
    %c0_69 = arith.constant 0 : index
    %246 = vector.load %arg11[%245, %c0_69] : memref<64x128xf32, #tpu.memory_space<vmem>>, vector<8x128xf32>
    %247 = arith.truncf %240 : vector<8x32xf32> to vector<8x32xbf16>
    %cst_70 = arith.constant dense<0.000000e+00> : vector<8x128xf32>
    %248 = tpu.matmul %247, %218, %cst_70 {dimension_numbers = #tpu.dot_dimension_numbers<[1], [0], [0], [1], [0, 0, 1, 1], [], []>} : vector<8x32xbf16>, vector<32x128xbf16>, vector<8x128xf32> -> vector<8x128xf32>
    %249 = arith.addf %246, %248 : vector<8x128xf32>
    %250 = math.tanh %249 : vector<8x128xf32>
    %251 = vector.broadcast %8 : vector<1x128xf32> to vector<8x128xf32>
    %252 = arith.mulf %251, %250 : vector<8x128xf32>
    %253 = vector.broadcast %11 : vector<1x128xf32> to vector<8x128xf32>
    %254 = arith.addf %252, %253 : vector<8x128xf32>
    %255 = vector.extract_strided_slice %254 {offsets = [0, 0], sizes = [8, 32], strides = [1, 1]} : vector<8x128xf32> to vector<8x32xf32>
    %256 = vector.extract_strided_slice %254 {offsets = [0, 32], sizes = [8, 32], strides = [1, 1]} : vector<8x128xf32> to vector<8x32xf32>
    %257 = vector.extract_strided_slice %254 {offsets = [0, 64], sizes = [8, 32], strides = [1, 1]} : vector<8x128xf32> to vector<8x32xf32>
    %258 = vector.extract_strided_slice %254 {offsets = [0, 96], sizes = [8, 32], strides = [1, 1]} : vector<8x128xf32> to vector<8x32xf32>
    %259 = arith.mulf %256, %238 : vector<8x32xf32>
    %260 = arith.mulf %255, %257 : vector<8x32xf32>
    %261 = arith.addf %259, %260 : vector<8x32xf32>
    %262 = math.tanh %261 : vector<8x32xf32>
    %263 = arith.mulf %258, %262 : vector<8x32xf32>
    %264 = arith.index_cast %244 : i32 to index
    %c0_71 = arith.constant 0 : index
    %265 = vector.load %arg10[%264, %c0_71] : memref<64x32xf32, #tpu.memory_space<vmem>>, vector<8x32xf32>
    tpu.vector_store %arg10[%264, %c0_71], %263 {strides = array<i32>} : memref<64x32xf32, #tpu.memory_space<vmem>>, vector<8x32xf32>,
    %c2_i32_72 = arith.constant 2 : i32
    %c8_i32_73 = arith.constant 8 : i32
    %266 = arith.muli %c2_i32_72, %c8_i32_73 : i32
    %267 = tpu.assume_multiple %266, 8 : i32
    %268 = arith.index_cast %267 : i32 to index
    %c0_74 = arith.constant 0 : index
    %269 = vector.load %arg11[%268, %c0_74] : memref<64x128xf32, #tpu.memory_space<vmem>>, vector<8x128xf32>
    %270 = arith.truncf %263 : vector<8x32xf32> to vector<8x32xbf16>
    %cst_75 = arith.constant dense<0.000000e+00> : vector<8x128xf32>
    %271 = tpu.matmul %270, %218, %cst_75 {dimension_numbers = #tpu.dot_dimension_numbers<[1], [0], [0], [1], [0, 0, 1, 1], [], []>} : vector<8x32xbf16>, vector<32x128xbf16>, vector<8x128xf32> -> vector<8x128xf32>
    %272 = arith.addf %269, %271 : vector<8x128xf32>
    %273 = math.tanh %272 : vector<8x128xf32>
    %274 = vector.broadcast %8 : vector<1x128xf32> to vector<8x128xf32>
    %275 = arith.mulf %274, %273 : vector<8x128xf32>
    %276 = vector.broadcast %11 : vector<1x128xf32> to vector<8x128xf32>
    %277 = arith.addf %275, %276 : vector<8x128xf32>
    %278 = vector.extract_strided_slice %277 {offsets = [0, 0], sizes = [8, 32], strides = [1, 1]} : vector<8x128xf32> to vector<8x32xf32>
    %279 = vector.extract_strided_slice %277 {offsets = [0, 32], sizes = [8, 32], strides = [1, 1]} : vector<8x128xf32> to vector<8x32xf32>
    %280 = vector.extract_strided_slice %277 {offsets = [0, 64], sizes = [8, 32], strides = [1, 1]} : vector<8x128xf32> to vector<8x32xf32>
    %281 = vector.extract_strided_slice %277 {offsets = [0, 96], sizes = [8, 32], strides = [1, 1]} : vector<8x128xf32> to vector<8x32xf32>
    %282 = arith.mulf %279, %261 : vector<8x32xf32>
    %283 = arith.mulf %278, %280 : vector<8x32xf32>
    %284 = arith.addf %282, %283 : vector<8x32xf32>
    %285 = math.tanh %284 : vector<8x32xf32>
    %286 = arith.mulf %281, %285 : vector<8x32xf32>
    %287 = arith.index_cast %267 : i32 to index
    %c0_76 = arith.constant 0 : index
    %288 = vector.load %arg10[%287, %c0_76] : memref<64x32xf32, #tpu.memory_space<vmem>>, vector<8x32xf32>
    tpu.vector_store %arg10[%287, %c0_76], %286 {strides = array<i32>} : memref<64x32xf32, #tpu.memory_space<vmem>>, vector<8x32xf32>,
    %c3_i32_77 = arith.constant 3 : i32
    %c8_i32_78 = arith.constant 8 : i32
    %289 = arith.muli %c3_i32_77, %c8_i32_78 : i32
    %290 = tpu.assume_multiple %289, 8 : i32
    %291 = arith.index_cast %290 : i32 to index
    %c0_79 = arith.constant 0 : index
    %292 = vector.load %arg11[%291, %c0_79] : memref<64x128xf32, #tpu.memory_space<vmem>>, vector<8x128xf32>
    %293 = arith.truncf %286 : vector<8x32xf32> to vector<8x32xbf16>
    %cst_80 = arith.constant dense<0.000000e+00> : vector<8x128xf32>
    %294 = tpu.matmul %293, %218, %cst_80 {dimension_numbers = #tpu.dot_dimension_numbers<[1], [0], [0], [1], [0, 0, 1, 1], [], []>} : vector<8x32xbf16>, vector<32x128xbf16>, vector<8x128xf32> -> vector<8x128xf32>
    %295 = arith.addf %292, %294 : vector<8x128xf32>
    %296 = math.tanh %295 : vector<8x128xf32>
    %297 = vector.broadcast %8 : vector<1x128xf32> to vector<8x128xf32>
    %298 = arith.mulf %297, %296 : vector<8x128xf32>
    %299 = vector.broadcast %11 : vector<1x128xf32> to vector<8x128xf32>
    %300 = arith.addf %298, %299 : vector<8x128xf32>
    %301 = vector.extract_strided_slice %300 {offsets = [0, 0], sizes = [8, 32], strides = [1, 1]} : vector<8x128xf32> to vector<8x32xf32>
    %302 = vector.extract_strided_slice %300 {offsets = [0, 32], sizes = [8, 32], strides = [1, 1]} : vector<8x128xf32> to vector<8x32xf32>
    %303 = vector.extract_strided_slice %300 {offsets = [0, 64], sizes = [8, 32], strides = [1, 1]} : vector<8x128xf32> to vector<8x32xf32>
    %304 = vector.extract_strided_slice %300 {offsets = [0, 96], sizes = [8, 32], strides = [1, 1]} : vector<8x128xf32> to vector<8x32xf32>
    %305 = arith.mulf %302, %284 : vector<8x32xf32>
    %306 = arith.mulf %301, %303 : vector<8x32xf32>
    %307 = arith.addf %305, %306 : vector<8x32xf32>
    %308 = math.tanh %307 : vector<8x32xf32>
    %309 = arith.mulf %304, %308 : vector<8x32xf32>
    %310 = arith.index_cast %290 : i32 to index
    %c0_81 = arith.constant 0 : index
    %311 = vector.load %arg10[%310, %c0_81] : memref<64x32xf32, #tpu.memory_space<vmem>>, vector<8x32xf32>
    tpu.vector_store %arg10[%310, %c0_81], %309 {strides = array<i32>} : memref<64x32xf32, #tpu.memory_space<vmem>>, vector<8x32xf32>,
    %c4_i32_82 = arith.constant 4 : i32
    %c8_i32_83 = arith.constant 8 : i32
    %312 = arith.muli %c4_i32_82, %c8_i32_83 : i32
    %313 = tpu.assume_multiple %312, 8 : i32
    %314 = arith.index_cast %313 : i32 to index
    %c0_84 = arith.constant 0 : index
    %315 = vector.load %arg11[%314, %c0_84] : memref<64x128xf32, #tpu.memory_space<vmem>>, vector<8x128xf32>
    %316 = arith.truncf %309 : vector<8x32xf32> to vector<8x32xbf16>
    %cst_85 = arith.constant dense<0.000000e+00> : vector<8x128xf32>
    %317 = tpu.matmul %316, %218, %cst_85 {dimension_numbers = #tpu.dot_dimension_numbers<[1], [0], [0], [1], [0, 0, 1, 1], [], []>} : vector<8x32xbf16>, vector<32x128xbf16>, vector<8x128xf32> -> vector<8x128xf32>
    %318 = arith.addf %315, %317 : vector<8x128xf32>
    %319 = math.tanh %318 : vector<8x128xf32>
    %320 = vector.broadcast %8 : vector<1x128xf32> to vector<8x128xf32>
    %321 = arith.mulf %320, %319 : vector<8x128xf32>
    %322 = vector.broadcast %11 : vector<1x128xf32> to vector<8x128xf32>
    %323 = arith.addf %321, %322 : vector<8x128xf32>
    %324 = vector.extract_strided_slice %323 {offsets = [0, 0], sizes = [8, 32], strides = [1, 1]} : vector<8x128xf32> to vector<8x32xf32>
    %325 = vector.extract_strided_slice %323 {offsets = [0, 32], sizes = [8, 32], strides = [1, 1]} : vector<8x128xf32> to vector<8x32xf32>
    %326 = vector.extract_strided_slice %323 {offsets = [0, 64], sizes = [8, 32], strides = [1, 1]} : vector<8x128xf32> to vector<8x32xf32>
    %327 = vector.extract_strided_slice %323 {offsets = [0, 96], sizes = [8, 32], strides = [1, 1]} : vector<8x128xf32> to vector<8x32xf32>
    %328 = arith.mulf %325, %307 : vector<8x32xf32>
    %329 = arith.mulf %324, %326 : vector<8x32xf32>
    %330 = arith.addf %328, %329 : vector<8x32xf32>
    %331 = math.tanh %330 : vector<8x32xf32>
    %332 = arith.mulf %327, %331 : vector<8x32xf32>
    %333 = arith.index_cast %313 : i32 to index
    %c0_86 = arith.constant 0 : index
    %334 = vector.load %arg10[%333, %c0_86] : memref<64x32xf32, #tpu.memory_space<vmem>>, vector<8x32xf32>
    tpu.vector_store %arg10[%333, %c0_86], %332 {strides = array<i32>} : memref<64x32xf32, #tpu.memory_space<vmem>>, vector<8x32xf32>,
    %c5_i32_87 = arith.constant 5 : i32
    %c8_i32_88 = arith.constant 8 : i32
    %335 = arith.muli %c5_i32_87, %c8_i32_88 : i32
    %336 = tpu.assume_multiple %335, 8 : i32
    %337 = arith.index_cast %336 : i32 to index
    %c0_89 = arith.constant 0 : index
    %338 = vector.load %arg11[%337, %c0_89] : memref<64x128xf32, #tpu.memory_space<vmem>>, vector<8x128xf32>
    %339 = arith.truncf %332 : vector<8x32xf32> to vector<8x32xbf16>
    %cst_90 = arith.constant dense<0.000000e+00> : vector<8x128xf32>
    %340 = tpu.matmul %339, %218, %cst_90 {dimension_numbers = #tpu.dot_dimension_numbers<[1], [0], [0], [1], [0, 0, 1, 1], [], []>} : vector<8x32xbf16>, vector<32x128xbf16>, vector<8x128xf32> -> vector<8x128xf32>
    %341 = arith.addf %338, %340 : vector<8x128xf32>
    %342 = math.tanh %341 : vector<8x128xf32>
    %343 = vector.broadcast %8 : vector<1x128xf32> to vector<8x128xf32>
    %344 = arith.mulf %343, %342 : vector<8x128xf32>
    %345 = vector.broadcast %11 : vector<1x128xf32> to vector<8x128xf32>
    %346 = arith.addf %344, %345 : vector<8x128xf32>
    %347 = vector.extract_strided_slice %346 {offsets = [0, 0], sizes = [8, 32], strides = [1, 1]} : vector<8x128xf32> to vector<8x32xf32>
    %348 = vector.extract_strided_slice %346 {offsets = [0, 32], sizes = [8, 32], strides = [1, 1]} : vector<8x128xf32> to vector<8x32xf32>
    %349 = vector.extract_strided_slice %346 {offsets = [0, 64], sizes = [8, 32], strides = [1, 1]} : vector<8x128xf32> to vector<8x32xf32>
    %350 = vector.extract_strided_slice %346 {offsets = [0, 96], sizes = [8, 32], strides = [1, 1]} : vector<8x128xf32> to vector<8x32xf32>
    %351 = arith.mulf %348, %330 : vector<8x32xf32>
    %352 = arith.mulf %347, %349 : vector<8x32xf32>
    %353 = arith.addf %351, %352 : vector<8x32xf32>
    %354 = math.tanh %353 : vector<8x32xf32>
    %355 = arith.mulf %350, %354 : vector<8x32xf32>
    %356 = arith.index_cast %336 : i32 to index
    %c0_91 = arith.constant 0 : index
    %357 = vector.load %arg10[%356, %c0_91] : memref<64x32xf32, #tpu.memory_space<vmem>>, vector<8x32xf32>
    tpu.vector_store %arg10[%356, %c0_91], %355 {strides = array<i32>} : memref<64x32xf32, #tpu.memory_space<vmem>>, vector<8x32xf32>,
    %c6_i32_92 = arith.constant 6 : i32
    %c8_i32_93 = arith.constant 8 : i32
    %358 = arith.muli %c6_i32_92, %c8_i32_93 : i32
    %359 = tpu.assume_multiple %358, 8 : i32
    %360 = arith.index_cast %359 : i32 to index
    %c0_94 = arith.constant 0 : index
    %361 = vector.load %arg11[%360, %c0_94] : memref<64x128xf32, #tpu.memory_space<vmem>>, vector<8x128xf32>
    %362 = arith.truncf %355 : vector<8x32xf32> to vector<8x32xbf16>
    %cst_95 = arith.constant dense<0.000000e+00> : vector<8x128xf32>
    %363 = tpu.matmul %362, %218, %cst_95 {dimension_numbers = #tpu.dot_dimension_numbers<[1], [0], [0], [1], [0, 0, 1, 1], [], []>} : vector<8x32xbf16>, vector<32x128xbf16>, vector<8x128xf32> -> vector<8x128xf32>
    %364 = arith.addf %361, %363 : vector<8x128xf32>
    %365 = math.tanh %364 : vector<8x128xf32>
    %366 = vector.broadcast %8 : vector<1x128xf32> to vector<8x128xf32>
    %367 = arith.mulf %366, %365 : vector<8x128xf32>
    %368 = vector.broadcast %11 : vector<1x128xf32> to vector<8x128xf32>
    %369 = arith.addf %367, %368 : vector<8x128xf32>
    %370 = vector.extract_strided_slice %369 {offsets = [0, 0], sizes = [8, 32], strides = [1, 1]} : vector<8x128xf32> to vector<8x32xf32>
    %371 = vector.extract_strided_slice %369 {offsets = [0, 32], sizes = [8, 32], strides = [1, 1]} : vector<8x128xf32> to vector<8x32xf32>
    %372 = vector.extract_strided_slice %369 {offsets = [0, 64], sizes = [8, 32], strides = [1, 1]} : vector<8x128xf32> to vector<8x32xf32>
    %373 = vector.extract_strided_slice %369 {offsets = [0, 96], sizes = [8, 32], strides = [1, 1]} : vector<8x128xf32> to vector<8x32xf32>
    %374 = arith.mulf %371, %353 : vector<8x32xf32>
    %375 = arith.mulf %370, %372 : vector<8x32xf32>
    %376 = arith.addf %374, %375 : vector<8x32xf32>
    %377 = math.tanh %376 : vector<8x32xf32>
    %378 = arith.mulf %373, %377 : vector<8x32xf32>
    %379 = arith.index_cast %359 : i32 to index
    %c0_96 = arith.constant 0 : index
    %380 = vector.load %arg10[%379, %c0_96] : memref<64x32xf32, #tpu.memory_space<vmem>>, vector<8x32xf32>
    tpu.vector_store %arg10[%379, %c0_96], %378 {strides = array<i32>} : memref<64x32xf32, #tpu.memory_space<vmem>>, vector<8x32xf32>,
    %c7_i32_97 = arith.constant 7 : i32
    %c8_i32_98 = arith.constant 8 : i32
    %381 = arith.muli %c7_i32_97, %c8_i32_98 : i32
    %382 = tpu.assume_multiple %381, 8 : i32
    %383 = arith.index_cast %382 : i32 to index
    %c0_99 = arith.constant 0 : index
    %384 = vector.load %arg11[%383, %c0_99] : memref<64x128xf32, #tpu.memory_space<vmem>>, vector<8x128xf32>
    %385 = arith.truncf %378 : vector<8x32xf32> to vector<8x32xbf16>
    %cst_100 = arith.constant dense<0.000000e+00> : vector<8x128xf32>
    %386 = tpu.matmul %385, %218, %cst_100 {dimension_numbers = #tpu.dot_dimension_numbers<[1], [0], [0], [1], [0, 0, 1, 1], [], []>} : vector<8x32xbf16>, vector<32x128xbf16>, vector<8x128xf32> -> vector<8x128xf32>
    %387 = arith.addf %384, %386 : vector<8x128xf32>
    %388 = math.tanh %387 : vector<8x128xf32>
    %389 = vector.broadcast %8 : vector<1x128xf32> to vector<8x128xf32>
    %390 = arith.mulf %389, %388 : vector<8x128xf32>
    %391 = vector.broadcast %11 : vector<1x128xf32> to vector<8x128xf32>
    %392 = arith.addf %390, %391 : vector<8x128xf32>
    %393 = vector.extract_strided_slice %392 {offsets = [0, 0], sizes = [8, 32], strides = [1, 1]} : vector<8x128xf32> to vector<8x32xf32>
    %394 = vector.extract_strided_slice %392 {offsets = [0, 32], sizes = [8, 32], strides = [1, 1]} : vector<8x128xf32> to vector<8x32xf32>
    %395 = vector.extract_strided_slice %392 {offsets = [0, 64], sizes = [8, 32], strides = [1, 1]} : vector<8x128xf32> to vector<8x32xf32>
    %396 = vector.extract_strided_slice %392 {offsets = [0, 96], sizes = [8, 32], strides = [1, 1]} : vector<8x128xf32> to vector<8x32xf32>
    %397 = arith.mulf %394, %376 : vector<8x32xf32>
    %398 = arith.mulf %393, %395 : vector<8x32xf32>
    %399 = arith.addf %397, %398 : vector<8x32xf32>
    %400 = math.tanh %399 : vector<8x32xf32>
    %401 = arith.mulf %396, %400 : vector<8x32xf32>
    %402 = arith.index_cast %382 : i32 to index
    %c0_101 = arith.constant 0 : index
    %403 = vector.load %arg10[%402, %c0_101] : memref<64x32xf32, #tpu.memory_space<vmem>>, vector<8x32xf32>
    tpu.vector_store %arg10[%402, %c0_101], %401 {strides = array<i32>} : memref<64x32xf32, #tpu.memory_space<vmem>>, vector<8x32xf32>,
    %c8_i32_102 = arith.constant 8 : i32
    %c0_103 = arith.constant 0 : index
    %c0_104 = arith.constant 0 : index
    %404 = vector.load %arg10[%c0_103, %c0_104] : memref<64x32xf32, #tpu.memory_space<vmem>>, vector<64x32xf32>
    %405 = arith.truncf %404 : vector<64x32xf32> to vector<64x32xbf16>
    %c1_105 = arith.constant 1 : index
    %c0_106 = arith.constant 0 : index
    %c0_107 = arith.constant 0 : index
    %406 = vector.load %arg4[%c1_105, %c0_106, %c0_107] : memref<2x32x128xbf16, #tpu.memory_space<vmem>>, vector<1x32x128xbf16>
    %407 = vector.shape_cast %406 : vector<1x32x128xbf16> to vector<32x128xbf16>
    %cst_108 = arith.constant dense<0.000000e+00> : vector<64x128xf32>
    %408 = tpu.matmul %405, %407, %cst_108 {dimension_numbers = #tpu.dot_dimension_numbers<[1], [0], [0], [1], [0, 0, 1, 1], [], []>} : vector<64x32xbf16>, vector<32x128xbf16>, vector<64x128xf32> -> vector<64x128xf32>
    %c1_109 = arith.constant 1 : index
    %c0_110 = arith.constant 0 : index
    %c0_111 = arith.constant 0 : index
    %409 = vector.load %arg6[%c1_109, %c0_110, %c0_111] : memref<2x1x128xf32, #tpu.memory_space<vmem>>, vector<1x1x128xf32>
    %410 = vector.shape_cast %409 : vector<1x1x128xf32> to vector<1x128xf32>
    %411 = vector.broadcast %410 : vector<1x128xf32> to vector<64x128xf32>
    %412 = arith.addf %408, %411 : vector<64x128xf32>
    %c0_112 = arith.constant 0 : index
    %c0_113 = arith.constant 0 : index
    %413 = vector.load %arg11[%c0_112, %c0_113] : memref<64x128xf32, #tpu.memory_space<vmem>>, vector<64x128xf32>
    tpu.vector_store %arg11[%c0_112, %c0_113], %412 {strides = array<i32>} : memref<64x128xf32, #tpu.memory_space<vmem>>, vector<64x128xf32>,
    %c2 = arith.constant 2 : index
    %c0_114 = arith.constant 0 : index
    %c0_115 = arith.constant 0 : index
    %414 = vector.load %arg5[%c2, %c0_114, %c0_115] : memref<3x32x128xbf16, #tpu.memory_space<vmem>>, vector<1x32x128xbf16>
    %415 = vector.shape_cast %414 : vector<1x32x128xbf16> to vector<32x128xbf16>
    %cst_116 = arith.constant 0.000000e+00 : f32
    %416 = vector.broadcast %cst_116 : f32 to vector<8x32xf32>
    %c0_i32_117 = arith.constant 0 : i32
    %c8_i32_118 = arith.constant 8 : i32
    %417 = arith.muli %c0_i32_117, %c8_i32_118 : i32
    %418 = tpu.assume_multiple %417, 8 : i32
    %419 = arith.index_cast %418 : i32 to index
    %c0_119 = arith.constant 0 : index
    %420 = vector.load %arg11[%419, %c0_119] : memref<64x128xf32, #tpu.memory_space<vmem>>, vector<8x128xf32>
    %421 = arith.truncf %416 : vector<8x32xf32> to vector<8x32xbf16>
    %cst_120 = arith.constant dense<0.000000e+00> : vector<8x128xf32>
    %422 = tpu.matmul %421, %415, %cst_120 {dimension_numbers = #tpu.dot_dimension_numbers<[1], [0], [0], [1], [0, 0, 1, 1], [], []>} : vector<8x32xbf16>, vector<32x128xbf16>, vector<8x128xf32> -> vector<8x128xf32>
    %423 = arith.addf %420, %422 : vector<8x128xf32>
    %424 = math.tanh %423 : vector<8x128xf32>
    %425 = vector.broadcast %8 : vector<1x128xf32> to vector<8x128xf32>
    %426 = arith.mulf %425, %424 : vector<8x128xf32>
    %427 = vector.broadcast %11 : vector<1x128xf32> to vector<8x128xf32>
    %428 = arith.addf %426, %427 : vector<8x128xf32>
    %429 = vector.extract_strided_slice %428 {offsets = [0, 0], sizes = [8, 32], strides = [1, 1]} : vector<8x128xf32> to vector<8x32xf32>
    %430 = vector.extract_strided_slice %428 {offsets = [0, 32], sizes = [8, 32], strides = [1, 1]} : vector<8x128xf32> to vector<8x32xf32>
    %431 = vector.extract_strided_slice %428 {offsets = [0, 64], sizes = [8, 32], strides = [1, 1]} : vector<8x128xf32> to vector<8x32xf32>
    %432 = vector.extract_strided_slice %428 {offsets = [0, 96], sizes = [8, 32], strides = [1, 1]} : vector<8x128xf32> to vector<8x32xf32>
    %433 = arith.mulf %430, %416 : vector<8x32xf32>
    %434 = arith.mulf %429, %431 : vector<8x32xf32>
    %435 = arith.addf %433, %434 : vector<8x32xf32>
    %436 = math.tanh %435 : vector<8x32xf32>
    %437 = arith.mulf %432, %436 : vector<8x32xf32>
    %438 = arith.index_cast %418 : i32 to index
    %c0_121 = arith.constant 0 : index
    %439 = vector.load %arg10[%438, %c0_121] : memref<64x32xf32, #tpu.memory_space<vmem>>, vector<8x32xf32>
    tpu.vector_store %arg10[%438, %c0_121], %437 {strides = array<i32>} : memref<64x32xf32, #tpu.memory_space<vmem>>, vector<8x32xf32>,
    %c1_i32_122 = arith.constant 1 : i32
    %c8_i32_123 = arith.constant 8 : i32
    %440 = arith.muli %c1_i32_122, %c8_i32_123 : i32
    %441 = tpu.assume_multiple %440, 8 : i32
    %442 = arith.index_cast %441 : i32 to index
    %c0_124 = arith.constant 0 : index
    %443 = vector.load %arg11[%442, %c0_124] : memref<64x128xf32, #tpu.memory_space<vmem>>, vector<8x128xf32>
    %444 = arith.truncf %437 : vector<8x32xf32> to vector<8x32xbf16>
    %cst_125 = arith.constant dense<0.000000e+00> : vector<8x128xf32>
    %445 = tpu.matmul %444, %415, %cst_125 {dimension_numbers = #tpu.dot_dimension_numbers<[1], [0], [0], [1], [0, 0, 1, 1], [], []>} : vector<8x32xbf16>, vector<32x128xbf16>, vector<8x128xf32> -> vector<8x128xf32>
    %446 = arith.addf %443, %445 : vector<8x128xf32>
    %447 = math.tanh %446 : vector<8x128xf32>
    %448 = vector.broadcast %8 : vector<1x128xf32> to vector<8x128xf32>
    %449 = arith.mulf %448, %447 : vector<8x128xf32>
    %450 = vector.broadcast %11 : vector<1x128xf32> to vector<8x128xf32>
    %451 = arith.addf %449, %450 : vector<8x128xf32>
    %452 = vector.extract_strided_slice %451 {offsets = [0, 0], sizes = [8, 32], strides = [1, 1]} : vector<8x128xf32> to vector<8x32xf32>
    %453 = vector.extract_strided_slice %451 {offsets = [0, 32], sizes = [8, 32], strides = [1, 1]} : vector<8x128xf32> to vector<8x32xf32>
    %454 = vector.extract_strided_slice %451 {offsets = [0, 64], sizes = [8, 32], strides = [1, 1]} : vector<8x128xf32> to vector<8x32xf32>
    %455 = vector.extract_strided_slice %451 {offsets = [0, 96], sizes = [8, 32], strides = [1, 1]} : vector<8x128xf32> to vector<8x32xf32>
    %456 = arith.mulf %453, %435 : vector<8x32xf32>
    %457 = arith.mulf %452, %454 : vector<8x32xf32>
    %458 = arith.addf %456, %457 : vector<8x32xf32>
    %459 = math.tanh %458 : vector<8x32xf32>
    %460 = arith.mulf %455, %459 : vector<8x32xf32>
    %461 = arith.index_cast %441 : i32 to index
    %c0_126 = arith.constant 0 : index
    %462 = vector.load %arg10[%461, %c0_126] : memref<64x32xf32, #tpu.memory_space<vmem>>, vector<8x32xf32>
    tpu.vector_store %arg10[%461, %c0_126], %460 {strides = array<i32>} : memref<64x32xf32, #tpu.memory_space<vmem>>, vector<8x32xf32>,
    %c2_i32_127 = arith.constant 2 : i32
    %c8_i32_128 = arith.constant 8 : i32
    %463 = arith.muli %c2_i32_127, %c8_i32_128 : i32
    %464 = tpu.assume_multiple %463, 8 : i32
    %465 = arith.index_cast %464 : i32 to index
    %c0_129 = arith.constant 0 : index
    %466 = vector.load %arg11[%465, %c0_129] : memref<64x128xf32, #tpu.memory_space<vmem>>, vector<8x128xf32>
    %467 = arith.truncf %460 : vector<8x32xf32> to vector<8x32xbf16>
    %cst_130 = arith.constant dense<0.000000e+00> : vector<8x128xf32>
    %468 = tpu.matmul %467, %415, %cst_130 {dimension_numbers = #tpu.dot_dimension_numbers<[1], [0], [0], [1], [0, 0, 1, 1], [], []>} : vector<8x32xbf16>, vector<32x128xbf16>, vector<8x128xf32> -> vector<8x128xf32>
    %469 = arith.addf %466, %468 : vector<8x128xf32>
    %470 = math.tanh %469 : vector<8x128xf32>
    %471 = vector.broadcast %8 : vector<1x128xf32> to vector<8x128xf32>
    %472 = arith.mulf %471, %470 : vector<8x128xf32>
    %473 = vector.broadcast %11 : vector<1x128xf32> to vector<8x128xf32>
    %474 = arith.addf %472, %473 : vector<8x128xf32>
    %475 = vector.extract_strided_slice %474 {offsets = [0, 0], sizes = [8, 32], strides = [1, 1]} : vector<8x128xf32> to vector<8x32xf32>
    %476 = vector.extract_strided_slice %474 {offsets = [0, 32], sizes = [8, 32], strides = [1, 1]} : vector<8x128xf32> to vector<8x32xf32>
    %477 = vector.extract_strided_slice %474 {offsets = [0, 64], sizes = [8, 32], strides = [1, 1]} : vector<8x128xf32> to vector<8x32xf32>
    %478 = vector.extract_strided_slice %474 {offsets = [0, 96], sizes = [8, 32], strides = [1, 1]} : vector<8x128xf32> to vector<8x32xf32>
    %479 = arith.mulf %476, %458 : vector<8x32xf32>
    %480 = arith.mulf %475, %477 : vector<8x32xf32>
    %481 = arith.addf %479, %480 : vector<8x32xf32>
    %482 = math.tanh %481 : vector<8x32xf32>
    %483 = arith.mulf %478, %482 : vector<8x32xf32>
    %484 = arith.index_cast %464 : i32 to index
    %c0_131 = arith.constant 0 : index
    %485 = vector.load %arg10[%484, %c0_131] : memref<64x32xf32, #tpu.memory_space<vmem>>, vector<8x32xf32>
    tpu.vector_store %arg10[%484, %c0_131], %483 {strides = array<i32>} : memref<64x32xf32, #tpu.memory_space<vmem>>, vector<8x32xf32>,
    %c3_i32_132 = arith.constant 3 : i32
    %c8_i32_133 = arith.constant 8 : i32
    %486 = arith.muli %c3_i32_132, %c8_i32_133 : i32
    %487 = tpu.assume_multiple %486, 8 : i32
    %488 = arith.index_cast %487 : i32 to index
    %c0_134 = arith.constant 0 : index
    %489 = vector.load %arg11[%488, %c0_134] : memref<64x128xf32, #tpu.memory_space<vmem>>, vector<8x128xf32>
    %490 = arith.truncf %483 : vector<8x32xf32> to vector<8x32xbf16>
    %cst_135 = arith.constant dense<0.000000e+00> : vector<8x128xf32>
    %491 = tpu.matmul %490, %415, %cst_135 {dimension_numbers = #tpu.dot_dimension_numbers<[1], [0], [0], [1], [0, 0, 1, 1], [], []>} : vector<8x32xbf16>, vector<32x128xbf16>, vector<8x128xf32> -> vector<8x128xf32>
    %492 = arith.addf %489, %491 : vector<8x128xf32>
    %493 = math.tanh %492 : vector<8x128xf32>
    %494 = vector.broadcast %8 : vector<1x128xf32> to vector<8x128xf32>
    %495 = arith.mulf %494, %493 : vector<8x128xf32>
    %496 = vector.broadcast %11 : vector<1x128xf32> to vector<8x128xf32>
    %497 = arith.addf %495, %496 : vector<8x128xf32>
    %498 = vector.extract_strided_slice %497 {offsets = [0, 0], sizes = [8, 32], strides = [1, 1]} : vector<8x128xf32> to vector<8x32xf32>
    %499 = vector.extract_strided_slice %497 {offsets = [0, 32], sizes = [8, 32], strides = [1, 1]} : vector<8x128xf32> to vector<8x32xf32>
    %500 = vector.extract_strided_slice %497 {offsets = [0, 64], sizes = [8, 32], strides = [1, 1]} : vector<8x128xf32> to vector<8x32xf32>
    %501 = vector.extract_strided_slice %497 {offsets = [0, 96], sizes = [8, 32], strides = [1, 1]} : vector<8x128xf32> to vector<8x32xf32>
    %502 = arith.mulf %499, %481 : vector<8x32xf32>
    %503 = arith.mulf %498, %500 : vector<8x32xf32>
    %504 = arith.addf %502, %503 : vector<8x32xf32>
    %505 = math.tanh %504 : vector<8x32xf32>
    %506 = arith.mulf %501, %505 : vector<8x32xf32>
    %507 = arith.index_cast %487 : i32 to index
    %c0_136 = arith.constant 0 : index
    %508 = vector.load %arg10[%507, %c0_136] : memref<64x32xf32, #tpu.memory_space<vmem>>, vector<8x32xf32>
    tpu.vector_store %arg10[%507, %c0_136], %506 {strides = array<i32>} : memref<64x32xf32, #tpu.memory_space<vmem>>, vector<8x32xf32>,
    %c4_i32_137 = arith.constant 4 : i32
    %c8_i32_138 = arith.constant 8 : i32
    %509 = arith.muli %c4_i32_137, %c8_i32_138 : i32
    %510 = tpu.assume_multiple %509, 8 : i32
    %511 = arith.index_cast %510 : i32 to index
    %c0_139 = arith.constant 0 : index
    %512 = vector.load %arg11[%511, %c0_139] : memref<64x128xf32, #tpu.memory_space<vmem>>, vector<8x128xf32>
    %513 = arith.truncf %506 : vector<8x32xf32> to vector<8x32xbf16>
    %cst_140 = arith.constant dense<0.000000e+00> : vector<8x128xf32>
    %514 = tpu.matmul %513, %415, %cst_140 {dimension_numbers = #tpu.dot_dimension_numbers<[1], [0], [0], [1], [0, 0, 1, 1], [], []>} : vector<8x32xbf16>, vector<32x128xbf16>, vector<8x128xf32> -> vector<8x128xf32>
    %515 = arith.addf %512, %514 : vector<8x128xf32>
    %516 = math.tanh %515 : vector<8x128xf32>
    %517 = vector.broadcast %8 : vector<1x128xf32> to vector<8x128xf32>
    %518 = arith.mulf %517, %516 : vector<8x128xf32>
    %519 = vector.broadcast %11 : vector<1x128xf32> to vector<8x128xf32>
    %520 = arith.addf %518, %519 : vector<8x128xf32>
    %521 = vector.extract_strided_slice %520 {offsets = [0, 0], sizes = [8, 32], strides = [1, 1]} : vector<8x128xf32> to vector<8x32xf32>
    %522 = vector.extract_strided_slice %520 {offsets = [0, 32], sizes = [8, 32], strides = [1, 1]} : vector<8x128xf32> to vector<8x32xf32>
    %523 = vector.extract_strided_slice %520 {offsets = [0, 64], sizes = [8, 32], strides = [1, 1]} : vector<8x128xf32> to vector<8x32xf32>
    %524 = vector.extract_strided_slice %520 {offsets = [0, 96], sizes = [8, 32], strides = [1, 1]} : vector<8x128xf32> to vector<8x32xf32>
    %525 = arith.mulf %522, %504 : vector<8x32xf32>
    %526 = arith.mulf %521, %523 : vector<8x32xf32>
    %527 = arith.addf %525, %526 : vector<8x32xf32>
    %528 = math.tanh %527 : vector<8x32xf32>
    %529 = arith.mulf %524, %528 : vector<8x32xf32>
    %530 = arith.index_cast %510 : i32 to index
    %c0_141 = arith.constant 0 : index
    %531 = vector.load %arg10[%530, %c0_141] : memref<64x32xf32, #tpu.memory_space<vmem>>, vector<8x32xf32>
    tpu.vector_store %arg10[%530, %c0_141], %529 {strides = array<i32>} : memref<64x32xf32, #tpu.memory_space<vmem>>, vector<8x32xf32>,
    %c5_i32_142 = arith.constant 5 : i32
    %c8_i32_143 = arith.constant 8 : i32
    %532 = arith.muli %c5_i32_142, %c8_i32_143 : i32
    %533 = tpu.assume_multiple %532, 8 : i32
    %534 = arith.index_cast %533 : i32 to index
    %c0_144 = arith.constant 0 : index
    %535 = vector.load %arg11[%534, %c0_144] : memref<64x128xf32, #tpu.memory_space<vmem>>, vector<8x128xf32>
    %536 = arith.truncf %529 : vector<8x32xf32> to vector<8x32xbf16>
    %cst_145 = arith.constant dense<0.000000e+00> : vector<8x128xf32>
    %537 = tpu.matmul %536, %415, %cst_145 {dimension_numbers = #tpu.dot_dimension_numbers<[1], [0], [0], [1], [0, 0, 1, 1], [], []>} : vector<8x32xbf16>, vector<32x128xbf16>, vector<8x128xf32> -> vector<8x128xf32>
    %538 = arith.addf %535, %537 : vector<8x128xf32>
    %539 = math.tanh %538 : vector<8x128xf32>
    %540 = vector.broadcast %8 : vector<1x128xf32> to vector<8x128xf32>
    %541 = arith.mulf %540, %539 : vector<8x128xf32>
    %542 = vector.broadcast %11 : vector<1x128xf32> to vector<8x128xf32>
    %543 = arith.addf %541, %542 : vector<8x128xf32>
    %544 = vector.extract_strided_slice %543 {offsets = [0, 0], sizes = [8, 32], strides = [1, 1]} : vector<8x128xf32> to vector<8x32xf32>
    %545 = vector.extract_strided_slice %543 {offsets = [0, 32], sizes = [8, 32], strides = [1, 1]} : vector<8x128xf32> to vector<8x32xf32>
    %546 = vector.extract_strided_slice %543 {offsets = [0, 64], sizes = [8, 32], strides = [1, 1]} : vector<8x128xf32> to vector<8x32xf32>
    %547 = vector.extract_strided_slice %543 {offsets = [0, 96], sizes = [8, 32], strides = [1, 1]} : vector<8x128xf32> to vector<8x32xf32>
    %548 = arith.mulf %545, %527 : vector<8x32xf32>
    %549 = arith.mulf %544, %546 : vector<8x32xf32>
    %550 = arith.addf %548, %549 : vector<8x32xf32>
    %551 = math.tanh %550 : vector<8x32xf32>
    %552 = arith.mulf %547, %551 : vector<8x32xf32>
    %553 = arith.index_cast %533 : i32 to index
    %c0_146 = arith.constant 0 : index
    %554 = vector.load %arg10[%553, %c0_146] : memref<64x32xf32, #tpu.memory_space<vmem>>, vector<8x32xf32>
    tpu.vector_store %arg10[%553, %c0_146], %552 {strides = array<i32>} : memref<64x32xf32, #tpu.memory_space<vmem>>, vector<8x32xf32>,
    %c6_i32_147 = arith.constant 6 : i32
    %c8_i32_148 = arith.constant 8 : i32
    %555 = arith.muli %c6_i32_147, %c8_i32_148 : i32
    %556 = tpu.assume_multiple %555, 8 : i32
    %557 = arith.index_cast %556 : i32 to index
    %c0_149 = arith.constant 0 : index
    %558 = vector.load %arg11[%557, %c0_149] : memref<64x128xf32, #tpu.memory_space<vmem>>, vector<8x128xf32>
    %559 = arith.truncf %552 : vector<8x32xf32> to vector<8x32xbf16>
    %cst_150 = arith.constant dense<0.000000e+00> : vector<8x128xf32>
    %560 = tpu.matmul %559, %415, %cst_150 {dimension_numbers = #tpu.dot_dimension_numbers<[1], [0], [0], [1], [0, 0, 1, 1], [], []>} : vector<8x32xbf16>, vector<32x128xbf16>, vector<8x128xf32> -> vector<8x128xf32>
    %561 = arith.addf %558, %560 : vector<8x128xf32>
    %562 = math.tanh %561 : vector<8x128xf32>
    %563 = vector.broadcast %8 : vector<1x128xf32> to vector<8x128xf32>
    %564 = arith.mulf %563, %562 : vector<8x128xf32>
    %565 = vector.broadcast %11 : vector<1x128xf32> to vector<8x128xf32>
    %566 = arith.addf %564, %565 : vector<8x128xf32>
    %567 = vector.extract_strided_slice %566 {offsets = [0, 0], sizes = [8, 32], strides = [1, 1]} : vector<8x128xf32> to vector<8x32xf32>
    %568 = vector.extract_strided_slice %566 {offsets = [0, 32], sizes = [8, 32], strides = [1, 1]} : vector<8x128xf32> to vector<8x32xf32>
    %569 = vector.extract_strided_slice %566 {offsets = [0, 64], sizes = [8, 32], strides = [1, 1]} : vector<8x128xf32> to vector<8x32xf32>
    %570 = vector.extract_strided_slice %566 {offsets = [0, 96], sizes = [8, 32], strides = [1, 1]} : vector<8x128xf32> to vector<8x32xf32>
    %571 = arith.mulf %568, %550 : vector<8x32xf32>
    %572 = arith.mulf %567, %569 : vector<8x32xf32>
    %573 = arith.addf %571, %572 : vector<8x32xf32>
    %574 = math.tanh %573 : vector<8x32xf32>
    %575 = arith.mulf %570, %574 : vector<8x32xf32>
    %576 = arith.index_cast %556 : i32 to index
    %c0_151 = arith.constant 0 : index
    %577 = vector.load %arg10[%576, %c0_151] : memref<64x32xf32, #tpu.memory_space<vmem>>, vector<8x32xf32>
    tpu.vector_store %arg10[%576, %c0_151], %575 {strides = array<i32>} : memref<64x32xf32, #tpu.memory_space<vmem>>, vector<8x32xf32>,
    %c7_i32_152 = arith.constant 7 : i32
    %c8_i32_153 = arith.constant 8 : i32
    %578 = arith.muli %c7_i32_152, %c8_i32_153 : i32
    %579 = tpu.assume_multiple %578, 8 : i32
    %580 = arith.index_cast %579 : i32 to index
    %c0_154 = arith.constant 0 : index
    %581 = vector.load %arg11[%580, %c0_154] : memref<64x128xf32, #tpu.memory_space<vmem>>, vector<8x128xf32>
    %582 = arith.truncf %575 : vector<8x32xf32> to vector<8x32xbf16>
    %cst_155 = arith.constant dense<0.000000e+00> : vector<8x128xf32>
    %583 = tpu.matmul %582, %415, %cst_155 {dimension_numbers = #tpu.dot_dimension_numbers<[1], [0], [0], [1], [0, 0, 1, 1], [], []>} : vector<8x32xbf16>, vector<32x128xbf16>, vector<8x128xf32> -> vector<8x128xf32>
    %584 = arith.addf %581, %583 : vector<8x128xf32>
    %585 = math.tanh %584 : vector<8x128xf32>
    %586 = vector.broadcast %8 : vector<1x128xf32> to vector<8x128xf32>
    %587 = arith.mulf %586, %585 : vector<8x128xf32>
    %588 = vector.broadcast %11 : vector<1x128xf32> to vector<8x128xf32>
    %589 = arith.addf %587, %588 : vector<8x128xf32>
    %590 = vector.extract_strided_slice %589 {offsets = [0, 0], sizes = [8, 32], strides = [1, 1]} : vector<8x128xf32> to vector<8x32xf32>
    %591 = vector.extract_strided_slice %589 {offsets = [0, 32], sizes = [8, 32], strides = [1, 1]} : vector<8x128xf32> to vector<8x32xf32>
    %592 = vector.extract_strided_slice %589 {offsets = [0, 64], sizes = [8, 32], strides = [1, 1]} : vector<8x128xf32> to vector<8x32xf32>
    %593 = vector.extract_strided_slice %589 {offsets = [0, 96], sizes = [8, 32], strides = [1, 1]} : vector<8x128xf32> to vector<8x32xf32>
    %594 = arith.mulf %591, %573 : vector<8x32xf32>
    %595 = arith.mulf %590, %592 : vector<8x32xf32>
    %596 = arith.addf %594, %595 : vector<8x32xf32>
    %597 = math.tanh %596 : vector<8x32xf32>
    %598 = arith.mulf %593, %597 : vector<8x32xf32>
    %599 = arith.index_cast %579 : i32 to index
    %c0_156 = arith.constant 0 : index
    %600 = vector.load %arg10[%599, %c0_156] : memref<64x32xf32, #tpu.memory_space<vmem>>, vector<8x32xf32>
    tpu.vector_store %arg10[%599, %c0_156], %598 {strides = array<i32>} : memref<64x32xf32, #tpu.memory_space<vmem>>, vector<8x32xf32>,
    %c8_i32_157 = arith.constant 8 : i32
    %c0_158 = arith.constant 0 : index
    %c0_159 = arith.constant 0 : index
    %601 = vector.load %arg10[%c0_158, %c0_159] : memref<64x32xf32, #tpu.memory_space<vmem>>, vector<64x32xf32>
    %602 = arith.truncf %601 : vector<64x32xf32> to vector<64x32xbf16>
    %c0_160 = arith.constant 0 : index
    %c0_161 = arith.constant 0 : index
    %603 = vector.load %arg7[%c0_160, %c0_161] : memref<32x2xbf16, #tpu.memory_space<vmem>>, vector<32x2xbf16>
    %cst_162 = arith.constant dense<0.000000e+00> : vector<64x2xf32>
    %604 = tpu.matmul %602, %603, %cst_162 {dimension_numbers = #tpu.dot_dimension_numbers<[1], [0], [0], [1], [0, 0, 1, 1], [], []>} : vector<64x32xbf16>, vector<32x2xbf16>, vector<64x2xf32> -> vector<64x2xf32>
    %c0_163 = arith.constant 0 : index
    %c0_164 = arith.constant 0 : index
    %605 = vector.load %arg8[%c0_163, %c0_164] : memref<1x2xf32, #tpu.memory_space<vmem>>, vector<1x2xf32>
    %606 = vector.broadcast %605 : vector<1x2xf32> to vector<64x2xf32>
    %607 = arith.addf %604, %606 : vector<64x2xf32>
    %608 = tpu.iota {dimensions = array<i32: 1>} : vector<64x2xi32>
    %c0_i32_165 = arith.constant 0 : i32
    %609 = vector.broadcast %c0_i32_165 : i32 to vector<64x2xi32>
    %610 = arith.cmpi eq, %608, %609 : vector<64x2xi32>
    %cst_166 = arith.constant 0.000000e+00 : f32
    %611 = vector.broadcast %cst_166 : f32 to vector<64x2xf32>
    %612 = arith.maximumf %607, %611 : vector<64x2xf32>
    %613 = vector.broadcast %cst_166 : f32 to vector<64x2xf32>
    %614 = arith.subf %607, %613 : vector<64x2xf32>
    %615 = arith.cmpf one, %614, %614 : vector<64x2xf32>
    %616 = vector.broadcast %cst_166 : f32 to vector<64x2xf32>
    %617 = arith.addf %607, %616 : vector<64x2xf32>
    %618 = math.absf %614 : vector<64x2xf32>
    %cst_167 = arith.constant 0.000000e+00 : f32
    %619 = vector.broadcast %cst_167 : f32 to vector<64x2xf32>
    %620 = arith.subf %619, %618 : vector<64x2xf32>
    %621 = math.exp %620 : vector<64x2xf32>
    %622 = math.log1p %621 : vector<64x2xf32>
    %623 = arith.addf %612, %622 : vector<64x2xf32>
    %624 = arith.select %615, %617, %623 : vector<64x2xi1>, vector<64x2xf32>
    %cst_168 = arith.constant 9.99999997E-7 : f32
    %625 = vector.broadcast %cst_168 : f32 to vector<64x2xf32>
    %626 = arith.addf %624, %625 : vector<64x2xf32>
    %627 = arith.select %610, %607, %626 : vector<64x2xi1>, vector<64x2xf32>
    %c0_169 = arith.constant 0 : index
    %c0_170 = arith.constant 0 : index
    %c0_171 = arith.constant 0 : index
    %628 = vector.load %arg9[%c0_169, %c0_170, %c0_171] : memref<1x64x2xf32, #tpu.memory_space<vmem>>, vector<1x64x2xf32>
    %629 = vector.shape_cast %628 : vector<1x64x2xf32> to vector<64x2xf32>
    %630 = vector.shape_cast %627 : vector<64x2xf32> to vector<1x64x2xf32>
    tpu.vector_store %arg9[%c0_169, %c0_170, %c0_171], %630 {strides = array<i32>} : memref<1x64x2xf32, #tpu.memory_space<vmem>>, vector<1x64x2xf32>,
    return
  }
  func.func @transform_0(%arg0: i32) -> (i32, i32, i32) {
    %c0_i32 = arith.constant 0 : i32
    %c0_i32_0 = arith.constant 0 : i32
    %c0_i32_1 = arith.constant 0 : i32
    return %arg0, %c0_i32, %c0_i32_0 : i32, i32, i32
  }
  func.func @transform_1(%arg0: i32) -> (i32, i32) {
    %c0_i32 = arith.constant 0 : i32
    %c0_i32_0 = arith.constant 0 : i32
    %c0_i32_1 = arith.constant 0 : i32
    return %c0_i32, %c0_i32_0 : i32, i32
  }
  func.func @transform_2(%arg0: i32) -> (i32, i32) {
    %c0_i32 = arith.constant 0 : i32
    %c0_i32_0 = arith.constant 0 : i32
    %c0_i32_1 = arith.constant 0 : i32
    return %c0_i32, %c0_i32_0 : i32, i32
  }
  func.func @transform_3(%arg0: i32) -> (i32, i32, i32) {
    %c0_i32 = arith.constant 0 : i32
    %c0_i32_0 = arith.constant 0 : i32
    %c0_i32_1 = arith.constant 0 : i32
    %c0_i32_2 = arith.constant 0 : i32
    return %c0_i32, %c0_i32_0, %c0_i32_1 : i32, i32, i32
  }
  func.func @transform_4(%arg0: i32) -> (i32, i32, i32) {
    %c0_i32 = arith.constant 0 : i32
    %c0_i32_0 = arith.constant 0 : i32
    %c0_i32_1 = arith.constant 0 : i32
    %c0_i32_2 = arith.constant 0 : i32
    return %c0_i32, %c0_i32_0, %c0_i32_1 : i32, i32, i32
  }
  func.func @transform_5(%arg0: i32) -> (i32, i32, i32) {
    %c0_i32 = arith.constant 0 : i32
    %c0_i32_0 = arith.constant 0 : i32
    %c0_i32_1 = arith.constant 0 : i32
    %c0_i32_2 = arith.constant 0 : i32
    return %c0_i32, %c0_i32_0, %c0_i32_1 : i32, i32, i32
  }
  func.func @transform_6(%arg0: i32) -> (i32, i32) {
    %c0_i32 = arith.constant 0 : i32
    %c0_i32_0 = arith.constant 0 : i32
    %c0_i32_1 = arith.constant 0 : i32
    return %c0_i32, %c0_i32_0 : i32, i32
  }
  func.func @transform_7(%arg0: i32) -> (i32, i32) {
    %c0_i32 = arith.constant 0 : i32
    %c0_i32_0 = arith.constant 0 : i32
    %c0_i32_1 = arith.constant 0 : i32
    return %c0_i32, %c0_i32_0 : i32, i32
  }
  func.func @transform_8(%arg0: i32) -> (i32, i32, i32) {
    %c0_i32 = arith.constant 0 : i32
    %c0_i32_0 = arith.constant 0 : i32
    %c0_i32_1 = arith.constant 0 : i32
    return %arg0, %c0_i32, %c0_i32_0 : i32, i32, i32
  }
}

</mosaic_0001>

<bundles_post_ra>
// kernel: tpu_custom_call.1
= control target key start
LH: loop header
LB: loop body
LE: loop exit
PB: predicated region body
PF: predicated region fallthrough
CT: control target
= control target key end

     0   :  { %vm78_vm0 = vcmask 1041408   ;;  %vm53_vm1 = vcmask 15360   ;;  %v3105_v6 = vmov 0.0   ;;  %vm3106_vm2 = vmmov 0   ;;  %s3110_s24 = smov 32   ;;  %s3941_s1 = inlined_call_operand.vmem [shape: f32[2,128], index: 1, kind: input, shape index: {}]   ;;  %s3942_s0 = inlined_call_operand.vmem [shape: f32[1,64,2], index: 0, kind: input, shape index: {}]   ;;  %s3943_s4 = inlined_call_operand.vmem [shape: bf16[3,32,128], index: 4, kind: input, shape index: {}]   ;;  %s3944_s2 = inlined_call_operand.vmem [shape: f32[1,128], index: 2, kind: input, shape index: {}]   ;;  %s3945_s3 = inlined_call_operand.vmem [shape: bf16[2,32,128], index: 3, kind: input, shape index: {}]   ;;  %s3946_s5 = inlined_call_operand.vmem [shape: f32[2,1,128], index: 5, kind: input, shape index: {}]   ;;  %s3947_s6 = inlined_call_operand.vmem [shape: bf16[32,2], index: 6, kind: input, shape index: {}]   ;;  %s3948_s7 = inlined_call_operand.vmem [shape: f32[1,2], index: 7, kind: input, shape index: {}]   ;;  %s3949_s8 = inlined_call_operand.vmem [shape: f32[1,64,2], index: 8, kind: output, shape index: {}]  }
   0x1   :  { %v45_v0 = vld [vmem:[%s3941_s1] sm:$0x3]  ;;  %v42_v2 = vld [vmem:[%s3942_s0 + $0x28] sm:$0xff]  ;;  %v43_v5 = vld [vmem:[%s3942_s0 + $0x30] sm:$0xff]  ;;  %v3107_v10 = vmov 0   ;;  %v30_v20 = vlaneseq  ;;  %v3108_v26 = vmov 0.5  }
   0x2   :  { %v41_v1 = vld [vmem:[%s3942_s0 + $0x20] sm:$0xff]  ;;  %2957 = vmatprep.subr.msk.mxu1 %vm78_vm0, %v45_v0  ;;  %v3170_v3 = vld [vmem:[%s3943_s4 + $0x8] sm:$0xff]   ;;  %2715 = vmatprep.subr.msk.mxu0 %vm78_vm0, %v45_v0  ;;  %v44_v8 = vld [vmem:[%s3942_s0 + $0x38] sm:$0xff]  ;;  %vm212_vm6 = vcmask 261120  }
   0x3   :  { %2723 = vmatprep.mubr.msk.f32.mxu1 %vm53_vm1, %v41_v1  ;;  %2958 = vmatpush3.msk.msra.mxu1 %vm78_vm0, %v45_v0  ;;  %v37_v4 = vld [vmem:[%s3942_s0] sm:$0xff]  ;;  %v38_v7 = vld [vmem:[%s3942_s0 + $0x8] sm:$0xff]  ;;  %v3230_v24 = vand.u32 127, %v30_v20  ;;  %v39_v56 = vld [vmem:[%s3942_s0 + $0x10] sm:$0xff] }
   0x4   :  { %2724 = vmatmul.mubr.msk.f32.vlgmr.msra.gmra.mxu1 %vm53_vm1, %v42_v2  ;;  %2729 = vmatprep.subr.bf16.mxu1 %v3105_v6  ;;  %v3193_v9 = vld [vmem:[%s3943_s4] sm:$0xff]   ;;  %v40_v57 = vld [vmem:[%s3942_s0 + $0x18] sm:$0xff] }
   0x5   :  { %2730 = vmatpush3.bf16.msra.mxu1 %v3170_v3  ;;  %2716 = vmatpush3.msk.msra.mxu0 %vm78_vm0, %v45_v0  ;;  %v3225_v16 = vld [vmem:[%s3944_s2] ss:$0 sm:$0xff]  ;;  %vm32_vm3 = vcmp.ge.s32.totalorder %v3230_v24, 64  ;;  %vm33_vm4 = vcmp.lt.s32.totalorder %v3230_v24, 96  ;;  %s3109_s2 = smov 64   ;;  %vm2372_vm7 = vcmp.eq.s32.totalorder %v3230_v24, 0 }
   0x6   :  { %2717 = vmatprep.mubr.msk.f32.mxu0 %vm53_vm1, %v37_v4  ;;  %2726 = vmatprep.mubr.msk.f32.mxu1 %vm53_vm1, %v43_v5  ;;  %vm34_vm5 = vmand %vm32_vm3, %vm33_vm4 }
   0x7   :  { %2718 = vmatmul.mubr.msk.f32.vlgmr.msra.gmra.mxu0 %vm53_vm1, %v38_v7  ;;  %2731 = vmatprep.subr.bf16.mxu1 %v3105_v6  ;;  %v3234_v27 = vsel %vm34_vm5, 1.0, %v3108_v26  ;;  %v3236_v29 = vsel %vm34_vm5, 0.0, %v3108_v26 }
   0x8   :  { %2727 = vmatmul.mubr.msk.f32.gmra.mxu1 %vm53_vm1, %v44_v8  ;;  %2745 = vmatprep.subr.bf16.mxu0 %v3105_v6 }
   0x9   :  { %2732 = vmatpush3.bf16.msra.mxu1 %v3193_v9  ;;  %2733 = vmatprep.mubr.msk.bf16.mxu1 %vm3106_vm2, %v3105_v6 }
   0xa   :  { %2737 = vmatprep.subr.bf16.mxu1 %v3105_v6  ;;  %2746 = vmatpush3.bf16.msra.mxu0 %v3170_v3 }
   0xb   :  { %2747 = vmatprep.subr.bf16.mxu0 %v3105_v6  ;;  %2720 = vmatprep.mubr.msk.f32.mxu0 %vm53_vm1, %v39_v56 }
   0xc   :  { %2734 = vmatmul.mubr.bf16.vlgmr.msra.gmra.mxu1 %v3107_v10  ;;  %2721 = vmatmul.mubr.msk.f32.gmra.mxu0 %vm53_vm1, %v40_v57 }
   0xd   :  { %2738 = vmatpush3.bf16.msra.mxu1 %v3170_v3  ;;  %2741 = vmatprep.mubr.msk.bf16.mxu1 %vm3106_vm2, %v3105_v6 }
   0xe   :  { %2739 = vmatprep.subr.bf16.mxu1 %v3105_v6  ;;  %2748 = vmatpush3.bf16.msra.mxu0 %v3193_v9 }
   0xf   :  { %2761 = vmatprep.subr.bf16.mxu0 %v3105_v6  ;;  %2749 = vmatprep.mubr.msk.bf16.mxu0 %vm3106_vm2, %v3105_v6 }
  0x11   :  { %2740 = vmatpush3.bf16.msra.mxu1 %v3193_v9 }
  0x12   :  { %2753 = vmatprep.subr.bf16.mxu1 %v3105_v6 }
  0xc4   :  { %v3216_v11 = vpop.f32.mrf.mxu1 }
  0xc6   :  { %v3218_v12 = vpop.f32.mrf.mxu1 }
  0xc7   :  { %v2719_v13 = vpop.f32.mrf.mxu0 }
  0xc8   :  { %v3220_v14 = vpop.f32.mrf.mxu1  ;;  %v154_v42 = vadd.f32 %v2719_v13, %v3225_v16 }
  0xc9   :  { %v148_v15 = vpop.f32.mrf.mxu0 }
  0xca   :  { %v3227_v17 = vpop.f32.mrf.mxu1  ;;  %v149_v18 = vadd.f32 %v3225_v16, %v148_v15 }
  0xcc   :  { %v250_v19 = vpop.f32.mrf.mxu1  ;;  %v2722_v63 = vpop.f32.mrf.mxu0 }
  0xcd   :  { %v256_v21 = vadd.f32 %v250_v19, %v149_v18 }
  0xce   :  { %v2735_v22 = vpop.f32.mrf.mxu1  ;;  %v158_v0 = vpop.f32.mrf.mxu0 }
  0xcf   :  { %2977 = vtanh.f32 %v256_v21  ;;  %v159_v1 = vadd.f32 %v3225_v16, %v158_v0 }
  0xd0   :  { %v253_v23 = vpop.f32.mrf.mxu1 }
  0xd2   :  { %v2736_v25 = vpop.f32.mrf.mxu1 }
  0xdc   :  { %v2978_v28 = vpop.eup %2977 }
  0xdd   :  { %v258_v30 = vmul.f32 %v2978_v28, %v3234_v27 }
  0xdf   :  { %v259_v31 = vadd.f32 %v258_v30, %v3236_v29 }
  0xe1   :  { %262 = vrot.lane.b32.xlu0 %v259_v31, %s3109_s2  ;;  %v260_v34 = vmul.f32 0.0, %v259_v31 }
 0x153   :  { %v263_v32 = vpop.permute.xlu0 %262 }
 0x154   :  { %v265_v33 = vmul.f32 %v263_v32, %v259_v31  ;;  %v164_v32 = vadd.f32 %v2722_v63, %v3225_v16 }
 0x156   :  { %267 = vrot.lane.b32.xlu0 %v265_v33, %s3110_s24 }
 0x1c8   :  { %v268_v35 = vpop.permute.xlu0 %267 }
 0x1c9   :  { %v270_v36 = vadd.f32 %v268_v35, %v260_v34 }
 0x1cb   :  { %2979 = vtanh.f32 %v270_v36 }
 0x1d8   :  { %v2980_v37 = vpop.eup %2979 }
 0x1d9   :  { %273 = vrot.lane.b32.xlu1 %v2980_v37, %s3109_s2 }
 0x24b   :  { %v274_v38 = vpop.permute.xlu1 %273 }
 0x24c   :  { %v3243_v39 = vmul.f32 %v274_v38, %v259_v31 }
 0x24e   :  { %v284_v40 = vpack.c.bf16 %v3243_v39, %v3243_v39 }
 0x250   :  { %286 = vrot.lane.b32.xlu1 %v284_v40, %s3110_s24 }
 0x2c2   :  { %v287_v41 = vpop.permute.xlu1 %286 }
 0x2c3   :  { %2742 = vmatmul.mubr.msk.bf16.vlgmr.msra.gmra.mxu1 %vm212_vm6, %v287_v41 }
 0x2c4   :  { %2754 = vmatpush3.bf16.msra.mxu1 %v3170_v3  ;;  %2757 = vmatprep.mubr.msk.bf16.mxu1 %vm3106_vm2, %v3105_v6 }
 0x2c5   :  { %2755 = vmatprep.subr.bf16.mxu1 %v3105_v6 }
 0x2c8   :  { %2756 = vmatpush3.bf16.msra.mxu1 %v3193_v9 }
 0x2c9   :  { %2769 = vmatprep.subr.bf16.mxu1 %v3105_v6 }
 0x383   :  { %v325_v43 = vpop.f32.mrf.mxu1 }
 0x384   :  { %v331_v44 = vadd.f32 %v325_v43, %v154_v42 }
 0x385   :  { %v2743_v45 = vpop.f32.mrf.mxu1 }
 0x386   :  { %2981 = vtanh.f32 %v331_v44 }
 0x387   :  { %v328_v46 = vpop.f32.mrf.mxu1 }
 0x389   :  { %v2744_v47 = vpop.f32.mrf.mxu1 }
 0x393   :  { %v2982_v48 = vpop.eup %2981 }
 0x394   :  { %v333_v49 = vmul.f32 %v2982_v48, %v3234_v27 }
 0x396   :  { %v334_v50 = vadd.f32 %v333_v49, %v3236_v29 }
 0x398   :  { %337 = vrot.lane.b32.xlu0 %v334_v50, %s3109_s2  ;;  %v335_v53 = vmul.f32 %v334_v50, %v270_v36 }
 0x40a   :  { %v338_v51 = vpop.permute.xlu0 %337 }
 0x40b   :  { %v340_v52 = vmul.f32 %v338_v51, %v334_v50 }
 0x40d   :  { %342 = vrot.lane.b32.xlu1 %v340_v52, %s3110_s24  ;;  %v169_v52 = vadd.f32 %v3225_v16, %v3218_v12 }
 0x47f   :  { %v343_v54 = vpop.permute.xlu1 %342 }
 0x480   :  { %v345_v55 = vadd.f32 %v343_v54, %v335_v53 }
 0x482   :  { %2983 = vtanh.f32 %v345_v55 }
 0x48f   :  { %v2984_v58 = vpop.eup %2983 }
 0x490   :  { %348 = vrot.lane.b32.xlu0 %v2984_v58, %s3109_s2 }
 0x502   :  { %v349_v59 = vpop.permute.xlu0 %348 }
 0x503   :  { %v3271_v60 = vmul.f32 %v349_v59, %v334_v50 }
 0x505   :  { %v360_v61 = vpack.c.bf16 %v3271_v60, %v3271_v60 }
 0x507   :  { %362 = vrot.lane.b32.xlu1 %v360_v61, %s3110_s24 }
 0x579   :  { %v363_v62 = vpop.permute.xlu1 %362 }
 0x57a   :  { %2750 = vmatmul.mubr.msk.bf16.vlgmr.msra.gmra.mxu0 %vm212_vm6, %v363_v62 }
 0x57b   :  { %2762 = vmatpush3.bf16.msra.mxu0 %v3170_v3  ;;  %2765 = vmatprep.mubr.msk.bf16.mxu0 %vm3106_vm2, %v3105_v6 }
 0x57c   :  { %2763 = vmatprep.subr.bf16.mxu0 %v3105_v6 }
 0x57f   :  { %2764 = vmatpush3.bf16.msra.mxu0 %v3193_v9 }
 0x580   :  { %2777 = vmatprep.subr.bf16.mxu0 %v3105_v6 }
 0x63a   :  { %v401_v2 = vpop.f32.mrf.mxu0 }
 0x63b   :  { %v407_v4 = vadd.f32 %v401_v2, %v159_v1 }
 0x63c   :  { %v2751_v5 = vpop.f32.mrf.mxu0 }
 0x63d   :  { %2985 = vtanh.f32 %v407_v4 }
 0x63e   :  { %v404_v7 = vpop.f32.mrf.mxu0 }
 0x640   :  { %v2752_v8 = vpop.f32.mrf.mxu0 }
 0x64a   :  { %v2986_v13 = vpop.eup %2985 }
 0x64b   :  { %v409_v15 = vmul.f32 %v2986_v13, %v3234_v27  ;;  %v174_v13 = vadd.f32 %v3216_v11, %v3225_v16 }
 0x64d   :  { %v410_v18 = vadd.f32 %v409_v15, %v3236_v29 }
 0x64f   :  { %413 = vrot.lane.b32.xlu0 %v410_v18, %s3109_s2  ;;  %v411_v21 = vmul.f32 %v410_v18, %v345_v55 }
 0x6c1   :  { %v414_v19 = vpop.permute.xlu0 %413 }
 0x6c2   :  { %v416_v20 = vmul.f32 %v414_v19, %v410_v18 }
 0x6c4   :  { %418 = vrot.lane.b32.xlu1 %v416_v20, %s3110_s24 }
 0x736   :  { %v419_v22 = vpop.permute.xlu1 %418 }
 0x737   :  { %v421_v23 = vadd.f32 %v419_v22, %v411_v21 }
 0x739   :  { %2987 = vtanh.f32 %v421_v23 }
 0x746   :  { %v2988_v25 = vpop.eup %2987 }
 0x747   :  { %424 = vrot.lane.b32.xlu0 %v2988_v25, %s3109_s2 }
 0x7b9   :  { %v425_v26 = vpop.permute.xlu0 %424 }
 0x7ba   :  { %v3289_v28 = vmul.f32 %v425_v26, %v410_v18 }
 0x7bc   :  { %v436_v30 = vpack.c.bf16 %v3289_v28, %v3289_v28 }
 0x7be   :  { %438 = vrot.lane.b32.xlu1 %v436_v30, %s3110_s24 }
 0x830   :  { %v439_v31 = vpop.permute.xlu1 %438 }
 0x831   :  { %2758 = vmatmul.mubr.msk.bf16.vlgmr.msra.gmra.mxu1 %vm212_vm6, %v439_v31 }
 0x832   :  { %2770 = vmatpush3.bf16.msra.mxu1 %v3170_v3  ;;  %2773 = vmatprep.mubr.msk.bf16.mxu1 %vm3106_vm2, %v3105_v6 }
 0x833   :  { %2771 = vmatprep.subr.bf16.mxu1 %v3105_v6 }
 0x836   :  { %2772 = vmatpush3.bf16.msra.mxu1 %v3193_v9 }
 0x837   :  { %2785 = vmatprep.subr.bf16.mxu1 %v3105_v6 }
 0x8f1   :  { %v477_v33 = vpop.f32.mrf.mxu1 }
 0x8f2   :  { %v483_v34 = vadd.f32 %v477_v33, %v164_v32 }
 0x8f3   :  { %v2759_v35 = vpop.f32.mrf.mxu1 }
 0x8f4   :  { %2989 = vtanh.f32 %v483_v34 }
 0x8f5   :  { %v480_v36 = vpop.f32.mrf.mxu1 }
 0x8f6   :  { %v179_v36 = vadd.f32 %v3225_v16, %v3227_v17 }
 0x8f7   :  { %v2760_v37 = vpop.f32.mrf.mxu1 }
 0x901   :  { %v2990_v38 = vpop.eup %2989 }
 0x902   :  { %v485_v40 = vmul.f32 %v2990_v38, %v3234_v27 }
 0x904   :  { %v486_v41 = vadd.f32 %v485_v40, %v3236_v29 }
 0x906   :  { %489 = vrot.lane.b32.xlu0 %v486_v41, %s3109_s2  ;;  %v487_v44 = vmul.f32 %v486_v41, %v421_v23 }
 0x978   :  { %v490_v42 = vpop.permute.xlu0 %489 }
 0x979   :  { %v492_v43 = vmul.f32 %v490_v42, %v486_v41 }
 0x97b   :  { %494 = vrot.lane.b32.xlu1 %v492_v43, %s3110_s24 }
 0x9ed   :  { %v495_v45 = vpop.permute.xlu1 %494 }
 0x9ee   :  { %v497_v46 = vadd.f32 %v495_v45, %v487_v44 }
 0x9f0   :  { %2991 = vtanh.f32 %v497_v46 }
 0x9fd   :  { %v2992_v47 = vpop.eup %2991 }
 0x9fe   :  { %500 = vrot.lane.b32.xlu0 %v2992_v47, %s3109_s2 }
 0xa70   :  { %v501_v48 = vpop.permute.xlu0 %500 }
 0xa71   :  { %v3307_v49 = vmul.f32 %v501_v48, %v486_v41 }
 0xa73   :  { %v512_v50 = vpack.c.bf16 %v3307_v49, %v3307_v49 }
 0xa75   :  { %514 = vrot.lane.b32.xlu1 %v512_v50, %s3110_s24 }
 0xae7   :  { %v515_v51 = vpop.permute.xlu1 %514 }
 0xae8   :  { %2766 = vmatmul.mubr.msk.bf16.vlgmr.msra.gmra.mxu0 %vm212_vm6, %v515_v51 }
 0xae9   :  { %2778 = vmatpush3.bf16.msra.mxu0 %v3170_v3  ;;  %2781 = vmatprep.mubr.msk.bf16.mxu0 %vm3106_vm2, %v3105_v6 }
 0xaea   :  { %2779 = vmatprep.subr.bf16.mxu0 %v3105_v6 }
 0xaed   :  { %2780 = vmatpush3.bf16.msra.mxu0 %v3193_v9 }
 0xba8   :  { %v553_v53 = vpop.f32.mrf.mxu0 }
 0xba9   :  { %v559_v54 = vadd.f32 %v553_v53, %v169_v52  ;;  %v2967_v53 = vld [vmem:[%s3945_s3 + $0x8] sm:$0xff]  }
 0xbaa   :  { %v2767_v55 = vpop.f32.mrf.mxu0  ;;  %2793 = vmatprep.subr.bf16.mxu0 %v2967_v53 }
 0xbab   :  { %2993 = vtanh.f32 %v559_v54 }
 0xbac   :  { %v556_v56 = vpop.f32.mrf.mxu0 }
 0xbae   :  { %v2768_v57 = vpop.f32.mrf.mxu0 }
 0xbb8   :  { %v2994_v58 = vpop.eup %2993 }
 0xbb9   :  { %v561_v59 = vmul.f32 %v2994_v58, %v3234_v27 }
 0xbbb   :  { %v562_v61 = vadd.f32 %v561_v59, %v3236_v29 }
 0xbbd   :  { %565 = vrot.lane.b32.xlu0 %v562_v61, %s3109_s2  ;;  %v563_v0 = vmul.f32 %v562_v61, %v497_v46 }
 0xc2f   :  { %v566_v62 = vpop.permute.xlu0 %565 }
 0xc30   :  { %v568_v63 = vmul.f32 %v566_v62, %v562_v61 }
 0xc32   :  { %570 = vrot.lane.b32.xlu1 %v568_v63, %s3110_s24 }
 0xca4   :  { %v571_v1 = vpop.permute.xlu1 %570 }
 0xca5   :  { %v573_v12 = vadd.f32 %v571_v1, %v563_v0  ;;  %v3388_v0 = vld [vmem:[%s3943_s4 + $0x18] sm:$0xff]   ;;  %v3396_v1 = vld [vmem:[%s3943_s4 + $0x10] sm:$0xff]  }
 0xca7   :  { %2995 = vtanh.f32 %v573_v12 }
 0xcb4   :  { %v2996_v2 = vpop.eup %2995 }
 0xcb5   :  { %576 = vrot.lane.b32.xlu0 %v2996_v2, %s3109_s2  ;;  %v184_v2 = vadd.f32 %v3220_v14, %v3225_v16 }
 0xd27   :  { %v577_v4 = vpop.permute.xlu0 %576 }
 0xd28   :  { %v3325_v5 = vmul.f32 %v577_v4, %v562_v61 }
 0xd2a   :  { %v588_v7 = vpack.c.bf16 %v3325_v5, %v3325_v5 }
 0xd2c   :  { %590 = vrot.lane.b32.xlu1 %v588_v7, %s3110_s24 }
 0xd9e   :  { %v591_v8 = vpop.permute.xlu1 %590 }
 0xd9f   :  { %2774 = vmatmul.mubr.msk.bf16.vlgmr.msra.gmra.mxu1 %vm212_vm6, %v591_v8 }
 0xda0   :  { %2786 = vmatpush3.bf16.msra.mxu1 %v3170_v3  ;;  %2789 = vmatprep.mubr.msk.bf16.mxu1 %vm3106_vm2, %v3105_v6 }
 0xda1   :  { %2787 = vmatprep.subr.bf16.mxu1 %v3105_v6 }
 0xda4   :  { %2788 = vmatpush3.bf16.msra.mxu1 %v3193_v9 }
 0xda5   :  { %2805 = vmatprep.subr.bf16.mxu1 %v3105_v6 }
 0xe5f   :  { %v629_v15 = vpop.f32.mrf.mxu1 }
 0xe60   :  { %v635_v18 = vadd.f32 %v629_v15, %v174_v13 }
 0xe61   :  { %v2775_v19 = vpop.f32.mrf.mxu1 }
 0xe62   :  { %2997 = vtanh.f32 %v635_v18  ;;  %v3421_v19 = vld [vmem:[%s3946_s5] ss:$0 sm:$0xff] }
 0xe63   :  { %v632_v20 = vpop.f32.mrf.mxu1 }
 0xe65   :  { %v2776_v21 = vpop.f32.mrf.mxu1 }
 0xe6f   :  { %v2998_v22 = vpop.eup %2997 }
 0xe70   :  { %v637_v3 = vmul.f32 %v2998_v22, %v3234_v27 }
 0xe72   :  { %v638_v23 = vadd.f32 %v637_v3, %v3236_v29 }
 0xe74   :  { %641 = vrot.lane.b32.xlu0 %v638_v23, %s3109_s2  ;;  %v639_v26 = vmul.f32 %v638_v23, %v573_v12 }
 0xee6   :  { %v642_v25 = vpop.permute.xlu0 %641 }
 0xee7   :  { %v644_v9 = vmul.f32 %v642_v25, %v638_v23 }
 0xee9   :  { %646 = vrot.lane.b32.xlu1 %v644_v9, %s3110_s24 }
 0xf5b   :  { %v647_v30 = vpop.permute.xlu1 %646 }
 0xf5c   :  { %v649_v11 = vadd.f32 %v647_v30, %v639_v26 }
 0xf5e   :  { %2999 = vtanh.f32 %v649_v11 }
 0xf6b   :  { %v3000_v31 = vpop.eup %2999 }
 0xf6c   :  { %652 = vrot.lane.b32.xlu0 %v3000_v31, %s3109_s2 }
 0xfde   :  { %v653_v32 = vpop.permute.xlu0 %652 }
 0xfdf   :  { %v3344_v33 = vmul.f32 %v653_v32, %v638_v23 }
 0xfe1   :  { %v664_v34 = vpack.c.bf16 %v3344_v33, %v3344_v33 }
 0xfe3   :  { %666 = vrot.lane.b32.xlu1 %v664_v34, %s3110_s24 }
0x1055   :  { %v667_v35 = vpop.permute.xlu1 %666 }
0x1056   :  { %2782 = vmatmul.mubr.msk.bf16.vlgmr.msra.gmra.mxu0 %vm212_vm6, %v667_v35 }
0x1057   :  { %2794 = vmatpush3.bf16.msra.mxu0 %v2967_v53 }
0x1116   :  { %v705_v37 = vpop.f32.mrf.mxu0 }
0x1117   :  { %v711_v38 = vadd.f32 %v705_v37, %v179_v36 }
0x1118   :  { %v2783_v40 = vpop.f32.mrf.mxu0 }
0x1119   :  { %3001 = vtanh.f32 %v711_v38 }
0x111a   :  { %v708_v41 = vpop.f32.mrf.mxu0 }
0x111c   :  { %v2784_v42 = vpop.f32.mrf.mxu0 }
0x1126   :  { %v3002_v43 = vpop.eup %3001 }
0x1127   :  { %v713_v44 = vmul.f32 %v3002_v43, %v3234_v27 }
0x1129   :  { %v714_v45 = vadd.f32 %v713_v44, %v3236_v29 }
0x112b   :  { %717 = vrot.lane.b32.xlu0 %v714_v45, %s3109_s2  ;;  %v715_v17 = vmul.f32 %v714_v45, %v649_v11 }
0x119d   :  { %v718_v46 = vpop.permute.xlu0 %717 }
0x119e   :  { %v720_v47 = vmul.f32 %v718_v46, %v714_v45 }
0x11a0   :  { %722 = vrot.lane.b32.xlu1 %v720_v47, %s3110_s24 }
0x11a4   :  { %278 = vrot.lane.b32.xlu1 %v3243_v39, %s3110_s24  ;;  %v2968_v39 = vld [vmem:[%s3945_s3] sm:$0xff]  }
0x11a5   :  { %2795 = vmatprep.subr.bf16.mxu0 %v2968_v39 }
0x11a6   :  { %2796 = vmatpush3.bf16.msra.mxu0 %v2968_v39 }
0x11a7   :  { %2821 = vmatprep.subr.bf16.mxu0 %v3105_v6 }
0x11a8   :  { %429 = vrot.lane.b32.xlu1 %v3289_v28, %s3110_s24 }
0x1212   :  { %v723_v48 = vpop.permute.xlu1 %722 }
0x1213   :  { %v3360_v50 = vadd.f32 %v723_v48, %v715_v17 }
0x1215   :  { %3003 = vtanh.f32 %v3360_v50 }
0x1216   :  { %v279_v51 = vpop.permute.xlu1 %278 }
0x1217   :  { %281 = vst.msk [vmem:[#allocation2] sm:$0xff] %vm212_vm6, %v279_v51 }
0x121a   :  { %v430_v52 = vpop.permute.xlu1 %429 }
0x121b   :  { %433 = vst.msk [vmem:[#allocation2 + $0x10] sm:$0xff] %vm212_vm6, %v430_v52 }
0x1222   :  { %v3004_v28 = vpop.eup %3003 }
0x1223   :  { %728 = vrot.lane.b32.xlu0 %v3004_v28, %s3109_s2 }
0x1227   :  { %353 = vrot.lane.b32.xlu0 %v3271_v60, %s3110_s24  ;;  %v814_v60 = vld [vmem:[#allocation2] sm:$0xff] }
0x122b   :  { %505 = vrot.lane.b32.xlu0 %v3307_v49, %s3110_s24  ;;  %v816_v49 = vld [vmem:[#allocation2 + $0x10] sm:$0xff] }
0x1295   :  { %v729_v54 = vpop.permute.xlu0 %728 }
0x1296   :  { %v3377_v55 = vmul.f32 %v729_v54, %v714_v45 }
0x1298   :  { %v740_v56 = vpack.c.bf16 %v3377_v55, %v3377_v55 }
0x1299   :  { %v354_v57 = vpop.permute.xlu0 %353 }
0x129a   :  { %357 = vst.msk [vmem:[#allocation2 + $0x8] sm:$0xff] %vm212_vm6, %v354_v57  ;;  %742 = vrot.lane.b32.xlu1 %v740_v56, %s3110_s24 }
0x129d   :  { %v506_v58 = vpop.permute.xlu0 %505 }
0x129e   :  { %509 = vst.msk [vmem:[#allocation2 + $0x18] sm:$0xff] %vm212_vm6, %v506_v58 }
0x12a1   :  { %v815_v59 = vld [vmem:[#allocation2 + $0x8] sm:$0xff] }
0x12a2   :  { %v822_v61 = vpack.c.bf16 %v815_v59, %v814_v60 }
0x12a4   :  { %2797 = vmatprep.mubr.msk.bf16.mxu0 %vm212_vm6, %v822_v61 }
0x12a5   :  { %v817_v62 = vld [vmem:[#allocation2 + $0x18] sm:$0xff] }
0x12a6   :  { %v823_v63 = vpack.c.bf16 %v817_v62, %v816_v49 }
0x12a8   :  { %2798 = vmatmul.mubr.msk.bf16.vlgmr.msra.gmra.mxu0 %vm212_vm6, %v823_v63 }
0x12a9   :  { %2822 = vmatpush3.bf16.msra.mxu0 %v3388_v0 }
0x12aa   :  { %2823 = vmatprep.subr.bf16.mxu0 %v3105_v6 }
0x12ad   :  { %2824 = vmatpush3.bf16.msra.mxu0 %v3396_v1 }
0x12ae   :  { %2837 = vmatprep.subr.bf16.mxu0 %v3105_v6 }
0x130c   :  { %v743_v12 = vpop.permute.xlu1 %742 }
0x130d   :  { %2790 = vmatmul.mubr.msk.bf16.vlgmr.msra.gmra.mxu1 %vm212_vm6, %v743_v12 }
0x130e   :  { %2806 = vmatpush3.bf16.msra.mxu1 %v3388_v0  ;;  %2809 = vmatprep.mubr.msk.bf16.mxu1 %vm3106_vm2, %v3105_v6 }
0x130f   :  { %2807 = vmatprep.subr.bf16.mxu1 %v3105_v6 }
0x1312   :  { %2808 = vmatpush3.bf16.msra.mxu1 %v3396_v1 }
0x1313   :  { %2813 = vmatprep.subr.bf16.mxu1 %v3105_v6 }
0x1315   :  { %2810 = vmatmul.mubr.bf16.vlgmr.msra.gmra.mxu1 %v3107_v10 }
0x1316   :  { %2814 = vmatpush3.bf16.msra.mxu1 %v3388_v0  ;;  %2817 = vmatprep.mubr.msk.bf16.mxu1 %vm3106_vm2, %v3105_v6 }
0x1317   :  { %2815 = vmatprep.subr.bf16.mxu1 %v3105_v6 }
0x131a   :  { %2816 = vmatpush3.bf16.msra.mxu1 %v3396_v1 }
0x131b   :  { %2829 = vmatprep.subr.bf16.mxu1 %v3105_v6 }
0x1368   :  { %v3416_v4 = vpop.f32.mrf.mxu0 }
0x136a   :  { %v895_v15 = vpop.f32.mrf.mxu0 }
0x136b   :  { %v896_v21 = vadd.f32 %v3421_v19, %v895_v15 }
0x136c   :  { %v3453_v53 = vpop.f32.mrf.mxu0 }
0x136e   :  { %v898_v39 = vpop.f32.mrf.mxu0 }
0x136f   :  { %v899_v28 = vadd.f32 %v3421_v19, %v898_v39 }
0x13cd   :  { %v781_v7 = vpop.f32.mrf.mxu1 }
0x13ce   :  { %v787_v8 = vadd.f32 %v781_v7, %v184_v2 }
0x13cf   :  { %v2791_v13 = vpop.f32.mrf.mxu1 }
0x13d1   :  { %v784_v18 = vpop.f32.mrf.mxu1 }
0x13d3   :  { %v2792_v20 = vpop.f32.mrf.mxu1 }
0x13d5   :  { %v986_v22 = vpop.f32.mrf.mxu1 }
0x13d6   :  { %v992_v3 = vadd.f32 %v986_v22, %v896_v21 }
0x13d7   :  { %v2811_v23 = vpop.f32.mrf.mxu1 }
0x13d8   :  { %3005 = vtanh.f32 %v992_v3 }
0x13d9   :  { %v989_v14 = vpop.f32.mrf.mxu1  ;;  %3007 = vtanh.f32 %v787_v8 }
0x13db   :  { %v2812_v16 = vpop.f32.mrf.mxu1 }
0x13e5   :  { %v3006_v25 = vpop.eup %3005 }
0x13e6   :  { %v994_v9 = vmul.f32 %v3006_v25, %v3234_v27  ;;  %v3008_v35 = vpop.eup %3007 }
0x13e7   :  { %v789_v36 = vmul.f32 %v3008_v35, %v3234_v27 }
0x13e8   :  { %v995_v26 = vadd.f32 %v994_v9, %v3236_v29 }
0x13e9   :  { %v790_v38 = vadd.f32 %v789_v36, %v3236_v29 }
0x13ea   :  { %998 = vrot.lane.b32.xlu0 %v995_v26, %s3109_s2  ;;  %v996_v31 = vmul.f32 0.0, %v995_v26 }
0x13eb   :  { %v791_v46 = vmul.f32 %v790_v38, %v3360_v50 }
0x145c   :  { %v999_v30 = vpop.permute.xlu0 %998 }
0x145d   :  { %v1001_v11 = vmul.f32 %v999_v30, %v995_v26 }
0x145f   :  { %1003 = vrot.lane.b32.xlu1 %v1001_v11, %s3110_s24  ;;  %v904_v11 = vadd.f32 %v3416_v4, %v3421_v19 }
0x14d1   :  { %v1004_v32 = vpop.permute.xlu1 %1003 }
0x14d2   :  { %v1006_v34 = vadd.f32 %v1004_v32, %v996_v31 }
0x14d4   :  { %3009 = vtanh.f32 %v1006_v34 }
0x14e1   :  { %v3010_v37 = vpop.eup %3009 }
0x14e2   :  { %1009 = vrot.lane.b32.xlu0 %v3010_v37, %s3109_s2 }
0x14e6   :  { %793 = vrot.lane.b32.xlu0 %v790_v38, %s3109_s2 }
0x1554   :  { %v1010_v40 = vpop.permute.xlu0 %1009 }
0x1555   :  { %v3432_v41 = vmul.f32 %v1010_v40, %v995_v26 }
0x1557   :  { %v1019_v42 = vpack.c.bf16 %v3432_v41, %v3432_v41 }
0x1558   :  { %v794_v43 = vpop.permute.xlu0 %793 }
0x1559   :  { %v796_v44 = vmul.f32 %v794_v43, %v790_v38  ;;  %1021 = vrot.lane.b32.xlu1 %v1019_v42, %s3110_s24 }
0x155b   :  { %798 = vrot.lane.b32.xlu0 %v796_v44, %s3110_s24 }
0x15cb   :  { %v1022_v45 = vpop.permute.xlu1 %1021 }
0x15cc   :  { %2818 = vmatmul.mubr.msk.bf16.vlgmr.msra.gmra.mxu1 %vm212_vm6, %v1022_v45 }
0x15cd   :  { %v799_v47 = vpop.permute.xlu0 %798  ;;  %2830 = vmatpush3.bf16.msra.mxu1 %v3388_v0  ;;  %2833 = vmatprep.mubr.msk.bf16.mxu1 %vm3106_vm2, %v3105_v6 }
0x15ce   :  { %v801_v17 = vadd.f32 %v799_v47, %v791_v46  ;;  %2831 = vmatprep.subr.bf16.mxu1 %v3105_v6 }
0x15d0   :  { %3011 = vtanh.f32 %v801_v17 }
0x15d1   :  { %2832 = vmatpush3.bf16.msra.mxu1 %v3396_v1 }
0x15d2   :  { %2845 = vmatprep.subr.bf16.mxu1 %v3105_v6 }
0x15dd   :  { %v3012_v48 = vpop.eup %3011 }
0x15de   :  { %804 = vrot.lane.b32.xlu0 %v3012_v48, %s3109_s2 }
0x15e2   :  { %581 = vrot.lane.b32.xlu0 %v3325_v5, %s3110_s24 }
0x15e6   :  { %733 = vrot.lane.b32.xlu0 %v3377_v55, %s3110_s24 }
0x1650   :  { %v805_v50 = vpop.permute.xlu0 %804 }
0x1651   :  { %v807_v7 = vmul.f32 %v805_v50, %v790_v38 }
0x1654   :  { %v582_v51 = vpop.permute.xlu0 %581 }
0x1655   :  { %585 = vst.msk [vmem:[#allocation2 + $0x20] sm:$0xff] %vm212_vm6, %v582_v51  ;;  %v907_v51 = vadd.f32 %v3453_v53, %v3421_v19 }
0x1658   :  { %v734_v52 = vpop.permute.xlu0 %733 }
0x1659   :  { %737 = vst.msk [vmem:[#allocation2 + $0x30] sm:$0xff] %vm212_vm6, %v734_v52 }
0x165c   :  { %v818_v21 = vld [vmem:[#allocation2 + $0x20] sm:$0xff] }
0x1660   :  { %v820_v3 = vld [vmem:[#allocation2 + $0x30] sm:$0xff] }
0x168c   :  { %v1060_v54 = vpop.f32.mrf.mxu1 }
0x168d   :  { %v1066_v56 = vadd.f32 %v1060_v54, %v899_v28 }
0x168e   :  { %v2819_v57 = vpop.f32.mrf.mxu1 }
0x168f   :  { %3013 = vtanh.f32 %v1066_v56 }
0x1690   :  { %v1063_v5 = vpop.f32.mrf.mxu1 }
0x1692   :  { %v2820_v58 = vpop.f32.mrf.mxu1 }
0x169c   :  { %v3014_v60 = vpop.eup %3013 }
0x169d   :  { %v1068_v55 = vmul.f32 %v3014_v60, %v3234_v27 }
0x169f   :  { %v1069_v59 = vadd.f32 %v1068_v55, %v3236_v29 }
0x16a1   :  { %1072 = vrot.lane.b32.xlu1 %v1069_v59, %s3109_s2  ;;  %v1070_v62 = vmul.f32 %v1069_v59, %v1006_v34 }
0x1713   :  { %v1073_v61 = vpop.permute.xlu1 %1072 }
0x1714   :  { %v1075_v49 = vmul.f32 %v1073_v61, %v1069_v59 }
0x1716   :  { %1077 = vrot.lane.b32.xlu1 %v1075_v49, %s3110_s24 }
0x1788   :  { %v1078_v63 = vpop.permute.xlu1 %1077 }
0x1789   :  { %v1080_v12 = vadd.f32 %v1078_v63, %v1070_v62 }
0x178b   :  { %3015 = vtanh.f32 %v1080_v12 }
0x1798   :  { %v3016_v2 = vpop.eup %3015 }
0x1799   :  { %1083 = vrot.lane.b32.xlu1 %v3016_v2, %s3109_s2 }
0x179d   :  { %657 = vrot.lane.b32.xlu1 %v3344_v33, %s3110_s24 }
0x17a1   :  { %809 = vrot.lane.b32.xlu1 %v807_v7, %s3110_s24 }
0x180b   :  { %v1084_v8 = vpop.permute.xlu1 %1083 }
0x180c   :  { %v3464_v13 = vmul.f32 %v1084_v8, %v1069_v59 }
0x180e   :  { %v1093_v15 = vpack.c.bf16 %v3464_v13, %v3464_v13 }
0x180f   :  { %v658_v18 = vpop.permute.xlu1 %657 }
0x1810   :  { %661 = vst.msk [vmem:[#allocation2 + $0x28] sm:$0xff] %vm212_vm6, %v658_v18  ;;  %1095 = vrot.lane.b32.xlu0 %v1093_v15, %s3110_s24 }
0x1813   :  { %v810_v20 = vpop.permute.xlu1 %809 }
0x1814   :  { %813 = vst.msk [vmem:[#allocation2 + $0x38] sm:$0xff] %vm212_vm6, %v810_v20 }
0x1817   :  { %v819_v22 = vld [vmem:[#allocation2 + $0x28] sm:$0xff] }
0x1818   :  { %v824_v33 = vpack.c.bf16 %v819_v22, %v818_v21 }
0x181a   :  { %2801 = vmatprep.mubr.msk.bf16.mxu0 %vm212_vm6, %v824_v33 }
0x181b   :  { %v821_v23 = vld [vmem:[#allocation2 + $0x38] sm:$0xff] }
0x181c   :  { %v825_v14 = vpack.c.bf16 %v821_v23, %v820_v3 }
0x181e   :  { %2802 = vmatmul.mubr.msk.bf16.gmra.mxu0 %vm212_vm6, %v825_v14 }
0x181f   :  { %2825 = vmatprep.mubr.msk.bf16.mxu0 %vm3106_vm2, %v3105_v6 }
0x1882   :  { %v1096_v16 = vpop.permute.xlu0 %1095 }
0x1883   :  { %2826 = vmatmul.mubr.msk.bf16.vlgmr.msra.gmra.mxu0 %vm212_vm6, %v1096_v16 }
0x1884   :  { %2838 = vmatpush3.bf16.msra.mxu0 %v3388_v0  ;;  %2841 = vmatprep.mubr.msk.bf16.mxu0 %vm3106_vm2, %v3105_v6 }
0x1885   :  { %2839 = vmatprep.subr.bf16.mxu0 %v3105_v6 }
0x1888   :  { %2840 = vmatpush3.bf16.msra.mxu0 %v3396_v1 }
0x1889   :  { %2853 = vmatprep.subr.bf16.mxu0 %v3105_v6 }
0x18de   :  { %v3482_v25 = vpop.f32.mrf.mxu0 }
0x18e0   :  { %v3484_v9 = vpop.f32.mrf.mxu0 }
0x18e1   :  { %v912_v7 = vadd.f32 %v3421_v19, %v3484_v9 }
0x18e2   :  { %v3486_v26 = vpop.f32.mrf.mxu0 }
0x18e4   :  { %v3488_v30 = vpop.f32.mrf.mxu0 }
0x1943   :  { %v1134_v31 = vpop.f32.mrf.mxu0 }
0x1944   :  { %v1140_v32 = vadd.f32 %v1134_v31, %v904_v11 }
0x1945   :  { %v2827_v34 = vpop.f32.mrf.mxu0 }
0x1946   :  { %3017 = vtanh.f32 %v1140_v32 }
0x1947   :  { %v1137_v35 = vpop.f32.mrf.mxu0 }
0x1949   :  { %v2828_v36 = vpop.f32.mrf.mxu0 }
0x1953   :  { %v3018_v37 = vpop.eup %3017 }
0x1954   :  { %v1142_v38 = vmul.f32 %v3018_v37, %v3234_v27  ;;  %v915_v37 = vadd.f32 %v3421_v19, %v3488_v30 }
0x1956   :  { %v1143_v40 = vadd.f32 %v1142_v38, %v3236_v29 }
0x1958   :  { %1146 = vrot.lane.b32.xlu1 %v1143_v40, %s3109_s2  ;;  %v1144_v44 = vmul.f32 %v1143_v40, %v1080_v12 }
0x19ca   :  { %v1147_v42 = vpop.permute.xlu1 %1146 }
0x19cb   :  { %v1149_v43 = vmul.f32 %v1147_v42, %v1143_v40 }
0x19cd   :  { %1151 = vrot.lane.b32.xlu0 %v1149_v43, %s3110_s24 }
0x1a3f   :  { %v1152_v45 = vpop.permute.xlu0 %1151 }
0x1a40   :  { %v1154_v4 = vadd.f32 %v1152_v45, %v1144_v44 }
0x1a42   :  { %3019 = vtanh.f32 %v1154_v4 }
0x1a4f   :  { %v3020_v46 = vpop.eup %3019 }
0x1a50   :  { %1157 = vrot.lane.b32.xlu1 %v3020_v46, %s3109_s2 }
0x1ac2   :  { %v1158_v47 = vpop.permute.xlu1 %1157 }
0x1ac3   :  { %v3497_v17 = vmul.f32 %v1158_v47, %v1143_v40 }
0x1ac5   :  { %v1167_v48 = vpack.c.bf16 %v3497_v17, %v3497_v17 }
0x1ac7   :  { %1169 = vrot.lane.b32.xlu0 %v1167_v48, %s3110_s24 }
0x1b39   :  { %v1170_v50 = vpop.permute.xlu0 %1169 }
0x1b3a   :  { %2834 = vmatmul.mubr.msk.bf16.vlgmr.msra.gmra.mxu1 %vm212_vm6, %v1170_v50 }
0x1b3b   :  { %2846 = vmatpush3.bf16.msra.mxu1 %v3388_v0  ;;  %2849 = vmatprep.mubr.msk.bf16.mxu1 %vm3106_vm2, %v3105_v6 }
0x1b3c   :  { %2847 = vmatprep.subr.bf16.mxu1 %v3105_v6 }
0x1b3f   :  { %2848 = vmatpush3.bf16.msra.mxu1 %v3396_v1 }
0x1b40   :  { %2861 = vmatprep.subr.bf16.mxu1 %v3105_v6 }
0x1bfa   :  { %v1208_v52 = vpop.f32.mrf.mxu1 }
0x1bfb   :  { %v1214_v39 = vadd.f32 %v1208_v52, %v907_v51 }
0x1bfc   :  { %v2835_v28 = vpop.f32.mrf.mxu1 }
0x1bfd   :  { %3021 = vtanh.f32 %v1214_v39 }
0x1bfe   :  { %v1211_v54 = vpop.f32.mrf.mxu1 }
0x1bff   :  { %v920_v54 = vadd.f32 %v3482_v25, %v3421_v19 }
0x1c00   :  { %v2836_v56 = vpop.f32.mrf.mxu1 }
0x1c0a   :  { %v3022_v57 = vpop.eup %3021 }
0x1c0b   :  { %v1216_v5 = vmul.f32 %v3022_v57, %v3234_v27 }
0x1c0d   :  { %v1217_v58 = vadd.f32 %v1216_v5, %v3236_v29 }
0x1c0f   :  { %1220 = vrot.lane.b32.xlu1 %v1217_v58, %s3109_s2  ;;  %v1218_v59 = vmul.f32 %v1217_v58, %v1154_v4 }
0x1c81   :  { %v1221_v60 = vpop.permute.xlu1 %1220 }
0x1c82   :  { %v1223_v55 = vmul.f32 %v1221_v60, %v1217_v58 }
0x1c84   :  { %1225 = vrot.lane.b32.xlu0 %v1223_v55, %s3110_s24 }
0x1cf6   :  { %v1226_v61 = vpop.permute.xlu0 %1225 }
0x1cf7   :  { %v1228_v53 = vadd.f32 %v1226_v61, %v1218_v59 }
0x1cf9   :  { %3023 = vtanh.f32 %v1228_v53 }
0x1d06   :  { %v3024_v49 = vpop.eup %3023 }
0x1d07   :  { %1231 = vrot.lane.b32.xlu1 %v3024_v49, %s3109_s2 }
0x1d79   :  { %v1232_v62 = vpop.permute.xlu1 %1231 }
0x1d7a   :  { %v3516_v63 = vmul.f32 %v1232_v62, %v1217_v58 }
0x1d7c   :  { %v1241_v12 = vpack.c.bf16 %v3516_v63, %v3516_v63 }
0x1d7e   :  { %1243 = vrot.lane.b32.xlu0 %v1241_v12, %s3110_s24 }
0x1df0   :  { %v1244_v2 = vpop.permute.xlu0 %1243 }
0x1df1   :  { %2842 = vmatmul.mubr.msk.bf16.vlgmr.msra.gmra.mxu0 %vm212_vm6, %v1244_v2 }
0x1df2   :  { %2854 = vmatpush3.bf16.msra.mxu0 %v3388_v0  ;;  %2857 = vmatprep.mubr.msk.bf16.mxu0 %vm3106_vm2, %v3105_v6 }
0x1df3   :  { %2855 = vmatprep.subr.bf16.mxu0 %v3105_v6 }
0x1df6   :  { %2856 = vmatpush3.bf16.msra.mxu0 %v3396_v1 }
0x1eb1   :  { %v1282_v8 = vpop.f32.mrf.mxu0 }
0x1eb2   :  { %v1288_v15 = vadd.f32 %v1282_v8, %v912_v7  ;;  %v2971_v8 = vld [vmem:[%s3945_s3 + $0x18] sm:$0xff]  }
0x1eb3   :  { %v2843_v18 = vpop.f32.mrf.mxu0  ;;  %2869 = vmatprep.subr.bf16.mxu0 %v2971_v8 }
0x1eb4   :  { %3025 = vtanh.f32 %v1288_v15 }
0x1eb5   :  { %v1285_v20 = vpop.f32.mrf.mxu0 }
0x1eb7   :  { %v2844_v21 = vpop.f32.mrf.mxu0 }
0x1ec1   :  { %v3026_v22 = vpop.eup %3025 }
0x1ec2   :  { %v1290_v33 = vmul.f32 %v3026_v22, %v3234_v27 }
0x1ec4   :  { %v1291_v3 = vadd.f32 %v1290_v33, %v3236_v29 }
0x1ec6   :  { %1294 = vrot.lane.b32.xlu1 %v1291_v3, %s3109_s2  ;;  %v1292_v16 = vmul.f32 %v1291_v3, %v1228_v53 }
0x1f38   :  { %v1295_v23 = vpop.permute.xlu1 %1294 }
0x1f39   :  { %v1297_v14 = vmul.f32 %v1295_v23, %v1291_v3 }
0x1f3b   :  { %1299 = vrot.lane.b32.xlu0 %v1297_v14, %s3110_s24 }
0x1fad   :  { %v1300_v11 = vpop.permute.xlu0 %1299 }
0x1fae   :  { %v1302_v9 = vadd.f32 %v1300_v11, %v1292_v16  ;;  %v3597_v16 = vld [vmem:[%s3943_s4 + $0x28] sm:$0xff]   ;;  %v3605_v11 = vld [vmem:[%s3943_s4 + $0x20] sm:$0xff]  }
0x1fb0   :  { %3027 = vtanh.f32 %v1302_v9 }
0x1fbd   :  { %v3028_v31 = vpop.eup %3027 }
0x1fbe   :  { %1305 = vrot.lane.b32.xlu1 %v3028_v31, %s3109_s2  ;;  %v923_v31 = vadd.f32 %v3486_v26, %v3421_v19 }
0x2030   :  { %v1306_v32 = vpop.permute.xlu1 %1305 }
0x2031   :  { %v3534_v34 = vmul.f32 %v1306_v32, %v1291_v3 }
0x2033   :  { %v1315_v35 = vpack.c.bf16 %v3534_v34, %v3534_v34 }
0x2035   :  { %1317 = vrot.lane.b32.xlu0 %v1315_v35, %s3110_s24 }
0x20a7   :  { %v1318_v36 = vpop.permute.xlu0 %1317 }
0x20a8   :  { %2850 = vmatmul.mubr.msk.bf16.vlgmr.msra.gmra.mxu1 %vm212_vm6, %v1318_v36 }
0x20a9   :  { %2862 = vmatpush3.bf16.msra.mxu1 %v3388_v0  ;;  %2865 = vmatprep.mubr.msk.bf16.mxu1 %vm3106_vm2, %v3105_v6 }
0x20aa   :  { %2863 = vmatprep.subr.bf16.mxu1 %v3105_v6 }
0x20ad   :  { %2864 = vmatpush3.bf16.msra.mxu1 %v3396_v1 }
0x20ae   :  { %2881 = vmatprep.subr.bf16.mxu1 %v3105_v6 }
0x2168   :  { %v1356_v38 = vpop.f32.mrf.mxu1 }
0x2169   :  { %v1362_v40 = vadd.f32 %v1356_v38, %v915_v37 }
0x216a   :  { %v2851_v42 = vpop.f32.mrf.mxu1 }
0x216b   :  { %3029 = vtanh.f32 %v1362_v40  ;;  %v3630_v40 = vld [vmem:[%s3946_s5 + $0x1] ss:$0 sm:$0xff] }
0x216c   :  { %v1359_v43 = vpop.f32.mrf.mxu1 }
0x216e   :  { %v2852_v44 = vpop.f32.mrf.mxu1 }
0x2178   :  { %v3030_v45 = vpop.eup %3029 }
0x2179   :  { %v1364_v0 = vmul.f32 %v3030_v45, %v3234_v27 }
0x217b   :  { %v1365_v4 = vadd.f32 %v1364_v0, %v3236_v29 }
0x217d   :  { %1368 = vrot.lane.b32.xlu1 %v1365_v4, %s3109_s2  ;;  %v1366_v47 = vmul.f32 %v1365_v4, %v1302_v9 }
0x21ef   :  { %v1369_v46 = vpop.permute.xlu1 %1368 }
0x21f0   :  { %v1371_v1 = vmul.f32 %v1369_v46, %v1365_v4 }
0x21f2   :  { %1373 = vrot.lane.b32.xlu0 %v1371_v1, %s3110_s24 }
0x2264   :  { %v1374_v48 = vpop.permute.xlu0 %1373 }
0x2265   :  { %v1376_v30 = vadd.f32 %v1374_v48, %v1366_v47 }
0x2267   :  { %3031 = vtanh.f32 %v1376_v30 }
0x2274   :  { %v3032_v50 = vpop.eup %3031 }
0x2275   :  { %1379 = vrot.lane.b32.xlu1 %v3032_v50, %s3109_s2 }
0x22e7   :  { %v1380_v51 = vpop.permute.xlu1 %1379 }
0x22e8   :  { %v3553_v52 = vmul.f32 %v1380_v51, %v1365_v4 }
0x22ea   :  { %v1389_v39 = vpack.c.bf16 %v3553_v52, %v3553_v52 }
0x22ec   :  { %1391 = vrot.lane.b32.xlu0 %v1389_v39, %s3110_s24 }
0x235e   :  { %v1392_v28 = vpop.permute.xlu0 %1391 }
0x235f   :  { %2858 = vmatmul.mubr.msk.bf16.vlgmr.msra.gmra.mxu0 %vm212_vm6, %v1392_v28 }
0x2360   :  { %2870 = vmatpush3.bf16.msra.mxu0 %v2971_v8 }
0x241f   :  { %v1430_v56 = vpop.f32.mrf.mxu0 }
0x2420   :  { %v1436_v57 = vadd.f32 %v1430_v56, %v920_v54 }
0x2421   :  { %v2859_v5 = vpop.f32.mrf.mxu0 }
0x2422   :  { %3033 = vtanh.f32 %v1436_v57 }
0x2423   :  { %v1433_v58 = vpop.f32.mrf.mxu0 }
0x2425   :  { %v2860_v60 = vpop.f32.mrf.mxu0 }
0x242f   :  { %v3034_v55 = vpop.eup %3033 }
0x2430   :  { %v1438_v59 = vmul.f32 %v3034_v55, %v3234_v27 }
0x2432   :  { %v1439_v61 = vadd.f32 %v1438_v59, %v3236_v29 }
0x2434   :  { %1442 = vrot.lane.b32.xlu1 %v1439_v61, %s3109_s2  ;;  %v1440_v25 = vmul.f32 %v1439_v61, %v1376_v30 }
0x24a6   :  { %v1443_v53 = vpop.permute.xlu1 %1442 }
0x24a7   :  { %v1445_v49 = vmul.f32 %v1443_v53, %v1439_v61 }
0x24a9   :  { %1447 = vrot.lane.b32.xlu0 %v1445_v49, %s3110_s24 }
0x24ad   :  { %1014 = vrot.lane.b32.xlu0 %v3432_v41, %s3110_s24  ;;  %v2972_v41 = vld [vmem:[%s3945_s3 + $0x10] sm:$0xff]  }
0x24ae   :  { %2871 = vmatprep.subr.bf16.mxu0 %v2972_v41 }
0x24af   :  { %2872 = vmatpush3.bf16.msra.mxu0 %v2972_v41 }
0x24b0   :  { %2897 = vmatprep.subr.bf16.mxu0 %v3105_v6 }
0x24b1   :  { %1162 = vrot.lane.b32.xlu0 %v3497_v17, %s3110_s24 }
0x251b   :  { %v1448_v62 = vpop.permute.xlu0 %1447 }
0x251c   :  { %v3569_v12 = vadd.f32 %v1448_v62, %v1440_v25 }
0x251e   :  { %3035 = vtanh.f32 %v3569_v12 }
0x251f   :  { %v1015_v2 = vpop.permute.xlu0 %1014 }
0x2520   :  { %1017 = vst.msk [vmem:[#allocation2] sm:$0xff] %vm212_vm6, %v1015_v2 }
0x2523   :  { %v1163_v7 = vpop.permute.xlu0 %1162 }
0x2524   :  { %1165 = vst.msk [vmem:[#allocation2 + $0x10] sm:$0xff] %vm212_vm6, %v1163_v7 }
0x2527   :  { %v1536_v33 = vld [vmem:[#allocation2] sm:$0xff] }
0x252b   :  { %v3036_v17 = vpop.eup %3035 }
0x252c   :  { %1453 = vrot.lane.b32.xlu1 %v3036_v17, %s3109_s2 }
0x2530   :  { %1088 = vrot.lane.b32.xlu1 %v3464_v13, %s3110_s24 }
0x2534   :  { %1236 = vrot.lane.b32.xlu1 %v3516_v63, %s3110_s24  ;;  %v1538_v63 = vld [vmem:[#allocation2 + $0x10] sm:$0xff] }
0x259e   :  { %v1454_v15 = vpop.permute.xlu1 %1453 }
0x259f   :  { %v3586_v18 = vmul.f32 %v1454_v15, %v1439_v61 }
0x25a1   :  { %v1463_v20 = vpack.c.bf16 %v3586_v18, %v3586_v18 }
0x25a2   :  { %v1089_v21 = vpop.permute.xlu1 %1088 }
0x25a3   :  { %1091 = vst.msk [vmem:[#allocation2 + $0x8] sm:$0xff] %vm212_vm6, %v1089_v21  ;;  %1465 = vrot.lane.b32.xlu0 %v1463_v20, %s3110_s24 }
0x25a6   :  { %v1237_v22 = vpop.permute.xlu1 %1236 }
0x25a7   :  { %1239 = vst.msk [vmem:[#allocation2 + $0x18] sm:$0xff] %vm212_vm6, %v1237_v22 }
0x25aa   :  { %v1537_v3 = vld [vmem:[#allocation2 + $0x8] sm:$0xff] }
0x25ab   :  { %v1544_v13 = vpack.c.bf16 %v1537_v3, %v1536_v33 }
0x25ad   :  { %2873 = vmatprep.mubr.msk.bf16.mxu0 %vm212_vm6, %v1544_v13 }
0x25ae   :  { %v1539_v23 = vld [vmem:[#allocation2 + $0x18] sm:$0xff] }
0x25af   :  { %v1545_v14 = vpack.c.bf16 %v1539_v23, %v1538_v63 }
0x25b1   :  { %2874 = vmatmul.mubr.msk.bf16.vlgmr.msra.gmra.mxu0 %vm212_vm6, %v1545_v14 }
0x25b2   :  { %2898 = vmatpush3.bf16.msra.mxu0 %v3597_v16 }
0x25b3   :  { %2899 = vmatprep.subr.bf16.mxu0 %v3105_v6 }
0x25b6   :  { %2900 = vmatpush3.bf16.msra.mxu0 %v3605_v11 }
0x25b7   :  { %2913 = vmatprep.subr.bf16.mxu0 %v3105_v6 }
0x2615   :  { %v1466_v9 = vpop.permute.xlu0 %1465 }
0x2616   :  { %2866 = vmatmul.mubr.msk.bf16.vlgmr.msra.gmra.mxu1 %vm212_vm6, %v1466_v9 }
0x2617   :  { %2882 = vmatpush3.bf16.msra.mxu1 %v3597_v16  ;;  %2885 = vmatprep.mubr.msk.bf16.mxu1 %vm3106_vm2, %v3105_v6 }
0x2618   :  { %2883 = vmatprep.subr.bf16.mxu1 %v3105_v6 }
0x261b   :  { %2884 = vmatpush3.bf16.msra.mxu1 %v3605_v11 }
0x261c   :  { %2889 = vmatprep.subr.bf16.mxu1 %v3105_v6 }
0x261e   :  { %2886 = vmatmul.mubr.bf16.vlgmr.msra.gmra.mxu1 %v3107_v10 }
0x261f   :  { %2890 = vmatpush3.bf16.msra.mxu1 %v3597_v16  ;;  %2893 = vmatprep.mubr.msk.bf16.mxu1 %vm3106_vm2, %v3105_v6 }
0x2620   :  { %2891 = vmatprep.subr.bf16.mxu1 %v3105_v6 }
0x2623   :  { %2892 = vmatpush3.bf16.msra.mxu1 %v3605_v11 }
0x2624   :  { %2905 = vmatprep.subr.bf16.mxu1 %v3105_v6 }
0x2671   :  { %v3625_v32 = vpop.f32.mrf.mxu0 }
0x2673   :  { %v1619_v10 = vpop.f32.mrf.mxu0 }
0x2674   :  { %v1620_v43 = vadd.f32 %v3630_v40, %v1619_v10 }
0x2675   :  { %v3662_v7 = vpop.f32.mrf.mxu0 }
0x2677   :  { %v1622_v8 = vpop.f32.mrf.mxu0 }
0x2678   :  { %v1623_v41 = vadd.f32 %v3630_v40, %v1622_v8 }
0x26d6   :  { %v1504_v35 = vpop.f32.mrf.mxu1 }
0x26d7   :  { %v1510_v36 = vadd.f32 %v1504_v35, %v923_v31 }
0x26d8   :  { %v2867_v37 = vpop.f32.mrf.mxu1 }
0x26da   :  { %v1507_v38 = vpop.f32.mrf.mxu1 }
0x26dc   :  { %v2868_v42 = vpop.f32.mrf.mxu1 }
0x26de   :  { %v1710_v44 = vpop.f32.mrf.mxu1 }
0x26df   :  { %v1716_v45 = vadd.f32 %v1710_v44, %v1620_v43 }
0x26e0   :  { %v2887_v0 = vpop.f32.mrf.mxu1 }
0x26e1   :  { %3037 = vtanh.f32 %v1716_v45 }
0x26e2   :  { %v1713_v19 = vpop.f32.mrf.mxu1  ;;  %3039 = vtanh.f32 %v1510_v36 }
0x26e4   :  { %v2888_v26 = vpop.f32.mrf.mxu1 }
0x26ee   :  { %v3038_v4 = vpop.eup %3037 }
0x26ef   :  { %v1718_v46 = vmul.f32 %v3038_v4, %v3234_v27  ;;  %v3040_v39 = vpop.eup %3039 }
0x26f0   :  { %v1512_v28 = vmul.f32 %v3040_v39, %v3234_v27 }
0x26f1   :  { %v1719_v1 = vadd.f32 %v1718_v46, %v3236_v29 }
0x26f2   :  { %v1513_v56 = vadd.f32 %v1512_v28, %v3236_v29 }
0x26f3   :  { %1722 = vrot.lane.b32.xlu1 %v1719_v1, %s3109_s2  ;;  %v1720_v30 = vmul.f32 0.0, %v1719_v1 }
0x26f4   :  { %v1514_v61 = vmul.f32 %v1513_v56, %v3569_v12 }
0x2765   :  { %v1723_v47 = vpop.permute.xlu1 %1722 }
0x2766   :  { %v1725_v48 = vmul.f32 %v1723_v47, %v1719_v1  ;;  %v1628_v47 = vadd.f32 %v3625_v32, %v3630_v40 }
0x2768   :  { %1727 = vrot.lane.b32.xlu0 %v1725_v48, %s3110_s24 }
0x27da   :  { %v1728_v50 = vpop.permute.xlu0 %1727 }
0x27db   :  { %v1730_v51 = vadd.f32 %v1728_v50, %v1720_v30 }
0x27dd   :  { %3041 = vtanh.f32 %v1730_v51 }
0x27ea   :  { %v3042_v54 = vpop.eup %3041 }
0x27eb   :  { %1733 = vrot.lane.b32.xlu1 %v3042_v54, %s3109_s2 }
0x27ef   :  { %1516 = vrot.lane.b32.xlu1 %v1513_v56, %s3109_s2 }
0x285d   :  { %v1734_v57 = vpop.permute.xlu1 %1733 }
0x285e   :  { %v3641_v5 = vmul.f32 %v1734_v57, %v1719_v1 }
0x2860   :  { %v1743_v58 = vpack.c.bf16 %v3641_v5, %v3641_v5 }
0x2861   :  { %v1517_v60 = vpop.permute.xlu1 %1516 }
0x2862   :  { %v1519_v55 = vmul.f32 %v1517_v60, %v1513_v56  ;;  %1745 = vrot.lane.b32.xlu0 %v1743_v58, %s3110_s24 }
0x2864   :  { %1521 = vrot.lane.b32.xlu1 %v1519_v55, %s3110_s24 }
0x28d4   :  { %v1746_v59 = vpop.permute.xlu0 %1745 }
0x28d5   :  { %2894 = vmatmul.mubr.msk.bf16.vlgmr.msra.gmra.mxu1 %vm212_vm6, %v1746_v59 }
0x28d6   :  { %v1522_v53 = vpop.permute.xlu1 %1521  ;;  %2906 = vmatpush3.bf16.msra.mxu1 %v3597_v16  ;;  %2909 = vmatprep.mubr.msk.bf16.mxu1 %vm3106_vm2, %v3105_v6 }
0x28d7   :  { %v1524_v49 = vadd.f32 %v1522_v53, %v1514_v61  ;;  %2907 = vmatprep.subr.bf16.mxu1 %v3105_v6 }
0x28d9   :  { %3043 = vtanh.f32 %v1524_v49 }
0x28da   :  { %2908 = vmatpush3.bf16.msra.mxu1 %v3605_v11 }
0x28db   :  { %2921 = vmatprep.subr.bf16.mxu1 %v3105_v6 }
0x28e6   :  { %v3044_v25 = vpop.eup %3043 }
0x28e7   :  { %1527 = vrot.lane.b32.xlu1 %v3044_v25, %s3109_s2 }
0x28eb   :  { %1310 = vrot.lane.b32.xlu1 %v3534_v34, %s3110_s24 }
0x28ef   :  { %1458 = vrot.lane.b32.xlu1 %v3586_v18, %s3110_s24 }
0x2959   :  { %v1528_v62 = vpop.permute.xlu1 %1527 }
0x295a   :  { %v1530_v31 = vmul.f32 %v1528_v62, %v1513_v56  ;;  %v1631_v62 = vadd.f32 %v3662_v7, %v3630_v40 }
0x295d   :  { %v1311_v12 = vpop.permute.xlu1 %1310 }
0x295e   :  { %1313 = vst.msk [vmem:[#allocation2 + $0x20] sm:$0xff] %vm212_vm6, %v1311_v12 }
0x2961   :  { %v1459_v2 = vpop.permute.xlu1 %1458 }
0x2962   :  { %1461 = vst.msk [vmem:[#allocation2 + $0x30] sm:$0xff] %vm212_vm6, %v1459_v2 }
0x2965   :  { %v1540_v42 = vld [vmem:[#allocation2 + $0x20] sm:$0xff] }
0x2969   :  { %v1542_v44 = vld [vmem:[#allocation2 + $0x30] sm:$0xff] }
0x2995   :  { %v1784_v17 = vpop.f32.mrf.mxu1 }
0x2996   :  { %v1790_v15 = vadd.f32 %v1784_v17, %v1623_v41 }
0x2997   :  { %v2895_v20 = vpop.f32.mrf.mxu1 }
0x2998   :  { %3045 = vtanh.f32 %v1790_v15 }
0x2999   :  { %v1787_v34 = vpop.f32.mrf.mxu1 }
0x299b   :  { %v2896_v21 = vpop.f32.mrf.mxu1 }
0x29a5   :  { %v3046_v22 = vpop.eup %3045 }
0x29a6   :  { %v1792_v18 = vmul.f32 %v3046_v22, %v3234_v27 }
0x29a8   :  { %v1793_v33 = vadd.f32 %v1792_v18, %v3236_v29 }
0x29aa   :  { %1796 = vrot.lane.b32.xlu0 %v1793_v33, %s3109_s2  ;;  %v1794_v63 = vmul.f32 %v1793_v33, %v1730_v51 }
0x2a1c   :  { %v1797_v3 = vpop.permute.xlu0 %1796 }
0x2a1d   :  { %v1799_v13 = vmul.f32 %v1797_v3, %v1793_v33 }
0x2a1f   :  { %1801 = vrot.lane.b32.xlu0 %v1799_v13, %s3110_s24 }
0x2a91   :  { %v1802_v23 = vpop.permute.xlu0 %1801 }
0x2a92   :  { %v1804_v14 = vadd.f32 %v1802_v23, %v1794_v63 }
0x2a94   :  { %3047 = vtanh.f32 %v1804_v14 }
0x2aa1   :  { %v3048_v9 = vpop.eup %3047 }
0x2aa2   :  { %1807 = vrot.lane.b32.xlu0 %v3048_v9, %s3109_s2 }
0x2aa6   :  { %1384 = vrot.lane.b32.xlu0 %v3553_v52, %s3110_s24 }
0x2aaa   :  { %1532 = vrot.lane.b32.xlu0 %v1530_v31, %s3110_s24 }
0x2b14   :  { %v1808_v35 = vpop.permute.xlu0 %1807 }
0x2b15   :  { %v3673_v36 = vmul.f32 %v1808_v35, %v1793_v33 }
0x2b17   :  { %v1817_v37 = vpack.c.bf16 %v3673_v36, %v3673_v36 }
0x2b18   :  { %v1385_v10 = vpop.permute.xlu0 %1384 }
0x2b19   :  { %1387 = vst.msk [vmem:[#allocation2 + $0x28] sm:$0xff] %vm212_vm6, %v1385_v10  ;;  %1819 = vrot.lane.b32.xlu1 %v1817_v37, %s3110_s24 }
0x2b1c   :  { %v1533_v38 = vpop.permute.xlu0 %1532 }
0x2b1d   :  { %1535 = vst.msk [vmem:[#allocation2 + $0x38] sm:$0xff] %vm212_vm6, %v1533_v38 }
0x2b20   :  { %v1541_v43 = vld [vmem:[#allocation2 + $0x28] sm:$0xff] }
0x2b21   :  { %v1546_v52 = vpack.c.bf16 %v1541_v43, %v1540_v42 }
0x2b23   :  { %2877 = vmatprep.mubr.msk.bf16.mxu0 %vm212_vm6, %v1546_v52 }
0x2b24   :  { %v1543_v45 = vld [vmem:[#allocation2 + $0x38] sm:$0xff] }
0x2b25   :  { %v1547_v0 = vpack.c.bf16 %v1543_v45, %v1542_v44 }
0x2b27   :  { %2878 = vmatmul.mubr.msk.bf16.gmra.mxu0 %vm212_vm6, %v1547_v0 }
0x2b28   :  { %2901 = vmatprep.mubr.msk.bf16.mxu0 %vm3106_vm2, %v3105_v6 }
0x2b8b   :  { %v1820_v19 = vpop.permute.xlu1 %1819 }
0x2b8c   :  { %2902 = vmatmul.mubr.msk.bf16.vlgmr.msra.gmra.mxu0 %vm212_vm6, %v1820_v19 }
0x2b8d   :  { %2914 = vmatpush3.bf16.msra.mxu0 %v3597_v16  ;;  %2917 = vmatprep.mubr.msk.bf16.mxu0 %vm3106_vm2, %v3105_v6 }
0x2b8e   :  { %2915 = vmatprep.subr.bf16.mxu0 %v3105_v6 }
0x2b91   :  { %2916 = vmatpush3.bf16.msra.mxu0 %v3605_v11 }
0x2b92   :  { %2929 = vmatprep.subr.bf16.mxu0 %v3105_v6 }
0x2be7   :  { %v3691_v26 = vpop.f32.mrf.mxu0 }
0x2be9   :  { %v3693_v4 = vpop.f32.mrf.mxu0 }
0x2bea   :  { %v1636_v9 = vadd.f32 %v3630_v40, %v3693_v4 }
0x2beb   :  { %v3695_v46 = vpop.f32.mrf.mxu0 }
0x2bed   :  { %v3697_v1 = vpop.f32.mrf.mxu0 }
0x2c4c   :  { %v1858_v48 = vpop.f32.mrf.mxu0 }
0x2c4d   :  { %v1864_v30 = vadd.f32 %v1858_v48, %v1628_v47 }
0x2c4e   :  { %v2903_v50 = vpop.f32.mrf.mxu0 }
0x2c4f   :  { %3049 = vtanh.f32 %v1864_v30 }
0x2c50   :  { %v1861_v51 = vpop.f32.mrf.mxu0 }
0x2c52   :  { %v2904_v39 = vpop.f32.mrf.mxu0 }
0x2c53   :  { %v1639_v39 = vadd.f32 %v3630_v40, %v3697_v1 }
0x2c5c   :  { %v3050_v28 = vpop.eup %3049 }
0x2c5d   :  { %v1866_v54 = vmul.f32 %v3050_v28, %v3234_v27 }
0x2c5f   :  { %v1867_v56 = vadd.f32 %v1866_v54, %v3236_v29 }
0x2c61   :  { %1870 = vrot.lane.b32.xlu0 %v1867_v56, %s3109_s2  ;;  %v1868_v60 = vmul.f32 %v1867_v56, %v1804_v14 }
0x2cd3   :  { %v1871_v57 = vpop.permute.xlu0 %1870 }
0x2cd4   :  { %v1873_v58 = vmul.f32 %v1871_v57, %v1867_v56 }
0x2cd6   :  { %1875 = vrot.lane.b32.xlu1 %v1873_v58, %s3110_s24 }
0x2d48   :  { %v1876_v55 = vpop.permute.xlu1 %1875 }
0x2d49   :  { %v1878_v32 = vadd.f32 %v1876_v55, %v1868_v60 }
0x2d4b   :  { %3051 = vtanh.f32 %v1878_v32 }
0x2d58   :  { %v3052_v59 = vpop.eup %3051 }
0x2d59   :  { %1881 = vrot.lane.b32.xlu0 %v3052_v59, %s3109_s2 }
0x2dcb   :  { %v1882_v61 = vpop.permute.xlu0 %1881 }
0x2dcc   :  { %v3706_v53 = vmul.f32 %v1882_v61, %v1867_v56 }
0x2dce   :  { %v1891_v49 = vpack.c.bf16 %v3706_v53, %v3706_v53 }
0x2dd0   :  { %1893 = vrot.lane.b32.xlu1 %v1891_v49, %s3110_s24 }
0x2e42   :  { %v1894_v25 = vpop.permute.xlu1 %1893 }
0x2e43   :  { %2910 = vmatmul.mubr.msk.bf16.vlgmr.msra.gmra.mxu1 %vm212_vm6, %v1894_v25 }
0x2e44   :  { %2922 = vmatpush3.bf16.msra.mxu1 %v3597_v16  ;;  %2925 = vmatprep.mubr.msk.bf16.mxu1 %vm3106_vm2, %v3105_v6 }
0x2e45   :  { %2923 = vmatprep.subr.bf16.mxu1 %v3105_v6 }
0x2e48   :  { %2924 = vmatpush3.bf16.msra.mxu1 %v3605_v11 }
0x2e49   :  { %2937 = vmatprep.subr.bf16.mxu1 %v3105_v6 }
0x2f03   :  { %v1932_v12 = vpop.f32.mrf.mxu1 }
0x2f04   :  { %v1938_v2 = vadd.f32 %v1932_v12, %v1631_v62 }
0x2f05   :  { %v2911_v8 = vpop.f32.mrf.mxu1 }
0x2f06   :  { %3053 = vtanh.f32 %v1938_v2  ;;  %v1644_v2 = vadd.f32 %v3691_v26, %v3630_v40 }
0x2f07   :  { %v1935_v41 = vpop.f32.mrf.mxu1 }
0x2f09   :  { %v2912_v17 = vpop.f32.mrf.mxu1 }
0x2f13   :  { %v3054_v15 = vpop.eup %3053 }
0x2f14   :  { %v1940_v20 = vmul.f32 %v3054_v15, %v3234_v27 }
0x2f16   :  { %v1941_v34 = vadd.f32 %v1940_v20, %v3236_v29 }
0x2f18   :  { %1944 = vrot.lane.b32.xlu0 %v1941_v34, %s3109_s2  ;;  %v1942_v18 = vmul.f32 %v1941_v34, %v1878_v32 }
0x2f8a   :  { %v1945_v21 = vpop.permute.xlu0 %1944 }
0x2f8b   :  { %v1947_v22 = vmul.f32 %v1945_v21, %v1941_v34 }
0x2f8d   :  { %1949 = vrot.lane.b32.xlu1 %v1947_v22, %s3110_s24 }
0x2fff   :  { %v1950_v33 = vpop.permute.xlu1 %1949 }
0x3000   :  { %v1952_v7 = vadd.f32 %v1950_v33, %v1942_v18 }
0x3002   :  { %3055 = vtanh.f32 %v1952_v7 }
0x300f   :  { %v3056_v3 = vpop.eup %3055 }
0x3010   :  { %1955 = vrot.lane.b32.xlu0 %v3056_v3, %s3109_s2 }
0x3082   :  { %v1956_v13 = vpop.permute.xlu0 %1955 }
0x3083   :  { %v3725_v63 = vmul.f32 %v1956_v13, %v1941_v34 }
0x3085   :  { %v1965_v23 = vpack.c.bf16 %v3725_v63, %v3725_v63 }
0x3087   :  { %1967 = vrot.lane.b32.xlu1 %v1965_v23, %s3110_s24 }
0x30f9   :  { %v1968_v14 = vpop.permute.xlu1 %1967 }
0x30fa   :  { %2918 = vmatmul.mubr.msk.bf16.vlgmr.msra.gmra.mxu0 %vm212_vm6, %v1968_v14 }
0x30fb   :  { %2930 = vmatpush3.bf16.msra.mxu0 %v3597_v16  ;;  %2933 = vmatprep.mubr.msk.bf16.mxu0 %vm3106_vm2, %v3105_v6 }
0x30fc   :  { %2931 = vmatprep.subr.bf16.mxu0 %v3105_v6 }
0x30ff   :  { %2932 = vmatpush3.bf16.msra.mxu0 %v3605_v11 }
0x31ba   :  { %v2006_v31 = vpop.f32.mrf.mxu0 }
0x31bb   :  { %v2012_v35 = vadd.f32 %v2006_v31, %v1636_v9 }
0x31bc   :  { %v2919_v37 = vpop.f32.mrf.mxu0 }
0x31bd   :  { %3057 = vtanh.f32 %v2012_v35  ;;  %v1647_v35 = vadd.f32 %v3695_v46, %v3630_v40 }
0x31be   :  { %v2009_v10 = vpop.f32.mrf.mxu0 }
0x31c0   :  { %v2920_v38 = vpop.f32.mrf.mxu0 }
0x31ca   :  { %v3058_v42 = vpop.eup %3057 }
0x31cb   :  { %v2014_v43 = vmul.f32 %v3058_v42, %v3234_v27 }
0x31cd   :  { %v2015_v52 = vadd.f32 %v2014_v43, %v3236_v29 }
0x31cf   :  { %2018 = vrot.lane.b32.xlu0 %v2015_v52, %s3109_s2  ;;  %v2016_v0 = vmul.f32 %v2015_v52, %v1952_v7 }
0x3241   :  { %v2019_v44 = vpop.permute.xlu0 %2018 }
0x3242   :  { %v2021_v45 = vmul.f32 %v2019_v44, %v2015_v52 }
0x3244   :  { %2023 = vrot.lane.b32.xlu1 %v2021_v45, %s3110_s24 }
0x32b6   :  { %v2024_v19 = vpop.permute.xlu1 %2023 }
0x32b7   :  { %v2026_v4 = vadd.f32 %v2024_v19, %v2016_v0 }
0x32b9   :  { %3059 = vtanh.f32 %v2026_v4 }
0x32c6   :  { %v3060_v47 = vpop.eup %3059 }
0x32c7   :  { %2029 = vrot.lane.b32.xlu0 %v3060_v47, %s3109_s2 }
0x3339   :  { %v2030_v48 = vpop.permute.xlu0 %2029 }
0x333a   :  { %v3743_v30 = vmul.f32 %v2030_v48, %v2015_v52 }
0x333c   :  { %v2039_v50 = vpack.c.bf16 %v3743_v30, %v3743_v30 }
0x333e   :  { %2041 = vrot.lane.b32.xlu1 %v2039_v50, %s3110_s24 }
0x33b0   :  { %v2042_v51 = vpop.permute.xlu1 %2041 }
0x33b1   :  { %2926 = vmatmul.mubr.msk.bf16.vlgmr.msra.gmra.mxu1 %vm212_vm6, %v2042_v51 }
0x33b2   :  { %2938 = vmatpush3.bf16.msra.mxu1 %v3597_v16  ;;  %2941 = vmatprep.mubr.msk.bf16.mxu1 %vm3106_vm2, %v3105_v6 }
0x33b3   :  { %2939 = vmatprep.subr.bf16.mxu1 %v3105_v6 }
0x33b6   :  { %2940 = vmatpush3.bf16.msra.mxu1 %v3605_v11 }
0x3471   :  { %v2080_v28 = vpop.f32.mrf.mxu1 }
0x3472   :  { %v2086_v54 = vadd.f32 %v2080_v28, %v1639_v39 }
0x3473   :  { %v2927_v56 = vpop.f32.mrf.mxu1 }
0x3474   :  { %3061 = vtanh.f32 %v2086_v54 }
0x3475   :  { %v2083_v57 = vpop.f32.mrf.mxu1 }
0x3477   :  { %v2928_v58 = vpop.f32.mrf.mxu1 }
0x3481   :  { %v3062_v60 = vpop.eup %3061 }
0x3482   :  { %v2088_v55 = vmul.f32 %v3062_v60, %v3234_v27 }
0x3484   :  { %v2089_v16 = vadd.f32 %v2088_v55, %v3236_v29 }
0x3486   :  { %2092 = vrot.lane.b32.xlu0 %v2089_v16, %s3109_s2  ;;  %v2090_v11 = vmul.f32 %v2089_v16, %v2026_v4 }
0x34f8   :  { %v2093_v32 = vpop.permute.xlu0 %2092 }
0x34f9   :  { %v2095_v6 = vmul.f32 %v2093_v32, %v2089_v16 }
0x34fb   :  { %2097 = vrot.lane.b32.xlu1 %v2095_v6, %s3110_s24 }
0x356d   :  { %v2098_v59 = vpop.permute.xlu1 %2097 }
0x356e   :  { %v2100_v1 = vadd.f32 %v2098_v59, %v2090_v11 }
0x3570   :  { %3063 = vtanh.f32 %v2100_v1 }
0x357d   :  { %v3064_v61 = vpop.eup %3063 }
0x357e   :  { %2103 = vrot.lane.b32.xlu0 %v3064_v61, %s3109_s2  ;;  %v3818_v61 = vld [vmem:[%s3948_s7] ss:$0 sm:$0xff] }
0x35f0   :  { %v2104_v49 = vpop.permute.xlu0 %2103 }
0x35f1   :  { %v3761_v25 = vmul.f32 %v2104_v49, %v2089_v16 }
0x35f3   :  { %v2113_v62 = vpack.c.bf16 %v3761_v25, %v3761_v25 }
0x35f5   :  { %2115 = vrot.lane.b32.xlu1 %v2113_v62, %s3110_s24 }
0x3667   :  { %v2116_v12 = vpop.permute.xlu1 %2115 }
0x3668   :  { %2934 = vmatmul.mubr.msk.bf16.vlgmr.msra.gmra.mxu0 %vm212_vm6, %v2116_v12 }
0x3728   :  { %v2154_v8 = vpop.f32.mrf.mxu0 }
0x3729   :  { %v2160_v41 = vadd.f32 %v2154_v8, %v1644_v2 }
0x372a   :  { %v2935_v17 = vpop.f32.mrf.mxu0 }
0x372b   :  { %3065 = vtanh.f32 %v2160_v41 }
0x372c   :  { %v2157_v15 = vpop.f32.mrf.mxu0 }
0x372e   :  { %v2936_v20 = vpop.f32.mrf.mxu0 }
0x3738   :  { %v3066_v34 = vpop.eup %3065 }
0x3739   :  { %v2162_v21 = vmul.f32 %v3066_v34, %v3234_v27 }
0x373b   :  { %v2163_v22 = vadd.f32 %v2162_v21, %v3236_v29 }
0x373d   :  { %2166 = vrot.lane.b32.xlu0 %v2163_v22, %s3109_s2  ;;  %v2164_v7 = vmul.f32 %v2163_v22, %v2100_v1 }
0x37af   :  { %v2167_v18 = vpop.permute.xlu0 %2166 }
0x37b0   :  { %v2169_v33 = vmul.f32 %v2167_v18, %v2163_v22 }
0x37b2   :  { %2171 = vrot.lane.b32.xlu1 %v2169_v33, %s3110_s24 }
0x3824   :  { %v2172_v3 = vpop.permute.xlu1 %2171 }
0x3825   :  { %v2174_v26 = vadd.f32 %v2172_v3, %v2164_v7 }
0x3827   :  { %3067 = vtanh.f32 %v2174_v26 }
0x3834   :  { %v3068_v13 = vpop.eup %3067 }
0x3835   :  { %2177 = vrot.lane.b32.xlu0 %v3068_v13, %s3109_s2 }
0x38a7   :  { %v2178_v23 = vpop.permute.xlu0 %2177 }
0x38a8   :  { %v2180_v14 = vmul.f32 %v2178_v23, %v2163_v22 }
0x38aa   :  { %v2187_v9 = vpack.c.bf16 %v2180_v14, %v2180_v14 }
0x38ac   :  { %2189 = vrot.lane.b32.xlu1 %v2187_v9, %s3110_s24 }
0x391e   :  { %v2190_v31 = vpop.permute.xlu1 %2189 }
0x391f   :  { %2942 = vmatmul.mubr.msk.bf16.vlgmr.msra.gmra.mxu1 %vm212_vm6, %v2190_v31 }
0x39df   :  { %v2228_v37 = vpop.f32.mrf.mxu1 }
0x39e0   :  { %v2234_v10 = vadd.f32 %v2228_v37, %v1647_v35 }
0x39e1   :  { %v2943_v38 = vpop.f32.mrf.mxu1 }
0x39e2   :  { %3069 = vtanh.f32 %v2234_v10 }
0x39e3   :  { %v2231_v42 = vpop.f32.mrf.mxu1 }
0x39e5   :  { %v2944_v43 = vpop.f32.mrf.mxu1 }
0x39ef   :  { %v3070_v52 = vpop.eup %3069 }
0x39f0   :  { %v2236_v44 = vmul.f32 %v3070_v52, %v3234_v27 }
0x39f2   :  { %v2237_v45 = vadd.f32 %v2236_v44, %v3236_v29 }
0x39f4   :  { %2240 = vrot.lane.b32.xlu0 %v2237_v45, %s3109_s2  ;;  %v2238_v27 = vmul.f32 %v2237_v45, %v2174_v26 }
0x3a66   :  { %v2241_v0 = vpop.permute.xlu0 %2240 }
0x3a67   :  { %v2243_v19 = vmul.f32 %v2241_v0, %v2237_v45 }
0x3a69   :  { %2245 = vrot.lane.b32.xlu1 %v2243_v19, %s3110_s24 }
0x3a6d   :  { %1738 = vrot.lane.b32.xlu1 %v3641_v5, %s3110_s24  ;;  %v2975_v5 = vld [vmem:[%s3947_s6 + $0x8] sm:$0xff]  }
0x3a6e   :  { %2945 = vmatprep.subr.bf16.mxu0 %v2975_v5 }
0x3a6f   :  { %2946 = vmatpush3.bf16.msra.mxu0 %v2975_v5 }
0x3a71   :  { %1886 = vrot.lane.b32.xlu1 %v3706_v53, %s3110_s24 }
0x3a75   :  { %2034 = vrot.lane.b32.xlu1 %v3743_v30, %s3110_s24  ;;  %v2976_v30 = vld [vmem:[%s3947_s6] sm:$0xff]  }
0x3a76   :  { %2947 = vmatprep.subr.bf16.mxu0 %v2976_v30 }
0x3a77   :  { %2948 = vmatpush3.bf16.msra.mxu0 %v2976_v30 }
0x3a79   :  { %2182 = vrot.lane.b32.xlu1 %v2180_v14, %s3110_s24 }
0x3adb   :  { %v2246_v40 = vpop.permute.xlu1 %2245 }
0x3adc   :  { %v2248_v29 = vadd.f32 %v2246_v40, %v2238_v27 }
0x3ade   :  { %3071 = vtanh.f32 %v2248_v29 }
0x3adf   :  { %v1739_v46 = vpop.permute.xlu1 %1738 }
0x3ae0   :  { %1741 = vst.msk [vmem:[#allocation2] sm:$0xff] %vm212_vm6, %v1739_v46 }
0x3ae3   :  { %v1887_v4 = vpop.permute.xlu1 %1886 }
0x3ae4   :  { %1889 = vst.msk [vmem:[#allocation2 + $0x10] sm:$0xff] %vm212_vm6, %v1887_v4 }
0x3ae7   :  { %v2035_v47 = vpop.permute.xlu1 %2034  ;;  %v2260_v56 = vld [vmem:[#allocation2] sm:$0xff] }
0x3ae8   :  { %2037 = vst.msk [vmem:[#allocation2 + $0x20] sm:$0xff] %vm212_vm6, %v2035_v47 }
0x3aeb   :  { %v3072_v53 = vpop.eup %3071  ;;  %v2183_v48 = vpop.permute.xlu1 %2182 }
0x3aec   :  { %2185 = vst.msk [vmem:[#allocation2 + $0x30] sm:$0xff] %vm212_vm6, %v2183_v48  ;;  %2251 = vrot.lane.b32.xlu0 %v3072_v53, %s3109_s2 }
0x3aef   :  { %v2264_v55 = vld [vmem:[#allocation2 + $0x20] sm:$0xff] }
0x3af0   :  { %1812 = vrot.lane.b32.xlu0 %v3673_v36, %s3110_s24 }
0x3af3   :  { %v2266_v11 = vld [vmem:[#allocation2 + $0x30] sm:$0xff] }
0x3af4   :  { %1960 = vrot.lane.b32.xlu0 %v3725_v63, %s3110_s24  ;;  %v2262_v63 = vld [vmem:[#allocation2 + $0x10] sm:$0xff] }
0x3af8   :  { %2108 = vrot.lane.b32.xlu0 %v3761_v25, %s3110_s24 }
0x3b5e   :  { %v2252_v50 = vpop.permute.xlu0 %2251 }
0x3b5f   :  { %v2254_v51 = vmul.f32 %v2252_v50, %v2237_v45 }
0x3b61   :  { %2256 = vrot.lane.b32.xlu0 %v2254_v51, %s3110_s24 }
0x3b62   :  { %v1813_v39 = vpop.permute.xlu0 %1812 }
0x3b63   :  { %1815 = vst.msk [vmem:[#allocation2 + $0x8] sm:$0xff] %vm212_vm6, %v1813_v39 }
0x3b66   :  { %v1961_v28 = vpop.permute.xlu0 %1960 }
0x3b67   :  { %1963 = vst.msk [vmem:[#allocation2 + $0x18] sm:$0xff] %vm212_vm6, %v1961_v28 }
0x3b6a   :  { %v2109_v54 = vpop.permute.xlu0 %2108  ;;  %v2261_v57 = vld [vmem:[#allocation2 + $0x8] sm:$0xff] }
0x3b6b   :  { %2111 = vst.msk [vmem:[#allocation2 + $0x28] sm:$0xff] %vm212_vm6, %v2109_v54  ;;  %v2268_v36 = vpack.c.bf16 %v2261_v57, %v2260_v56 }
0x3b6d   :  { %2949 = vmatprep.mubr.msk.bf16.mxu0 %vm212_vm6, %v2268_v36 }
0x3b6e   :  { %v2263_v58 = vld [vmem:[#allocation2 + $0x18] sm:$0xff] }
0x3b6f   :  { %v2269_v60 = vpack.c.bf16 %v2263_v58, %v2262_v63 }
0x3b71   :  { %2950 = vmatmul.mubr.msk.bf16.vlgmr.msra.gmra.mxu0 %vm212_vm6, %v2269_v60 }
0x3b72   :  { %v2265_v16 = vld [vmem:[#allocation2 + $0x28] sm:$0xff] }
0x3b73   :  { %v2270_v32 = vpack.c.bf16 %v2265_v16, %v2264_v55 }
0x3b75   :  { %2953 = vmatprep.mubr.msk.bf16.mxu0 %vm212_vm6, %v2270_v32 }
0x3bd3   :  { %v2257_v6 = vpop.permute.xlu0 %2256 }
0x3bd4   :  { %2259 = vst.msk [vmem:[#allocation2 + $0x38] sm:$0xff] %vm212_vm6, %v2257_v6 }
0x3bdb   :  { %v2267_v59 = vld [vmem:[#allocation2 + $0x38] sm:$0xff] }
0x3bdc   :  { %v2271_v1 = vpack.c.bf16 %v2267_v59, %v2266_v11 }
0x3bde   :  { %2954 = vmatmul.mubr.msk.bf16.gmra.mxu0 %vm212_vm6, %v2271_v1 }
0x3c31   :  { %v2951_v49 = vpop.f32.mrf.mxu0 }
0x3c32   :  { %v3821_v25 = vadd.f32 %v2951_v49, %v3818_v61 }
0x3c33   :  { %v2341_v62 = vpop.f32.mrf.mxu0 }
0x3c34   :  { %v2399_v12 = vand.u32 2147483647, %v3821_v25  ;;  %v3825_v2 = vadd.f32 %v3818_v61, %v2341_v62  ;;  %v2375_v5 = vmax.f32 %v3821_v25, 0.0  ;;  %vm2383_vm10 = vcmp.ne.f32.partialorder %v3821_v25, %v3821_v25 }
0x3c35   :  { %v2952_v8 = vpop.f32.mrf.mxu0 }
0x3c36   :  { %v2407_v41 = vsub.f32 0.0, %v2399_v12  ;;  %v2397_v17 = vand.u32 2147483647, %v3825_v2  ;;  %v3829_v15 = vadd.f32 %v2952_v8, %v3818_v61  ;;  %v2373_v28 = vmax.f32 %v3825_v2, 0.0 }
0x3c37   :  { %v2344_v20 = vpop.f32.mrf.mxu0  ;;  %vm2381_vm11 = vcmp.ne.f32.partialorder %v3825_v2, %v3825_v2 }
0x3c38   :  { %v2417_v34 = vmul.f32 1.442695, %v2407_v41  ;;  %v2405_v21 = vsub.f32 0.0, %v2397_v17  ;;  %v3832_v22 = vadd.f32 %v3818_v61, %v2344_v20  ;;  %v2400_v18 = vand.u32 2147483647, %v3829_v15 }
0x3c39   :  { %v2376_v6 = vmax.f32 %v3829_v15, 0.0  ;;  %vm2384_vm14 = vcmp.ne.f32.partialorder %v3829_v15, %v3829_v15 }
0x3c3a   :  { %3073 = vpow2.f32 %v2417_v34  ;;  %v2413_v33 = vmul.f32 1.442695, %v2405_v21  ;;  %v2408_v7 = vsub.f32 0.0, %v2400_v18  ;;  %v2398_v3 = vand.u32 2147483647, %v3832_v22 }
0x3c3b   :  { %v2374_v11 = vmax.f32 %v3832_v22, 0.0  ;;  %vm2382_vm15 = vcmp.ne.f32.partialorder %v3832_v22, %v3832_v22 }
0x3c3c   :  { %3075 = vpow2.f32 %v2413_v33  ;;  %v2419_v26 = vmul.f32 1.442695, %v2408_v7  ;;  %v2406_v13 = vsub.f32 0.0, %v2398_v3 }
0x3c3e   :  { %3077 = vpow2.f32 %v2419_v26  ;;  %v2415_v23 = vmul.f32 1.442695, %v2406_v13 }
0x3c40   :  { %3079 = vpow2.f32 %v2415_v23 }
0x3c47   :  { %v3074_v14 = vpop.eup %3073 }
0x3c48   :  { %v2447_v9 = vadd.f32 1.0, %v3074_v14  ;;  %v2450_v43 = vmul.f32 -0.5, %v3074_v14  ;;  %v2453_v45 = vand.u32 2147483647, %v3074_v14 }
0x3c49   :  { %v3076_v31 = vpop.eup %3075 }
0x3c4a   :  { %3081 = vlog2.f32 %v2447_v9  ;;  %v2429_v35 = vadd.f32 1.0, %v3076_v31  ;;  %v2432_v52 = vmul.f32 -0.5, %v3076_v31  ;;  %v2451_v44 = vadd.f32 1.0, %v2450_v43 }
0x3c4b   :  { %v3078_v37 = vpop.eup %3077  ;;  %v2435_v40 = vand.u32 2147483647, %v3076_v31  ;;  %vm2454_vm8 = vcmp.lt.f32.partialorder %v2453_v45, 0.0004427343 }
0x3c4c   :  { %3083 = vlog2.f32 %v2429_v35  ;;  %v2456_v10 = vadd.f32 1.0, %v3078_v37  ;;  %v2459_v0 = vmul.f32 -0.5, %v3078_v37  ;;  %v2433_v19 = vadd.f32 1.0, %v2432_v52 }
0x3c4d   :  { %v3080_v38 = vpop.eup %3079  ;;  %v2452_v4 = vmul.f32 %v3074_v14, %v2451_v44  ;;  %v2462_v51 = vand.u32 2147483647, %v3078_v37  ;;  %vm2436_vm9 = vcmp.lt.f32.partialorder %v2435_v40, 0.0004427343 }
0x3c4e   :  { %3085 = vlog2.f32 %v2456_v10  ;;  %v2438_v42 = vadd.f32 1.0, %v3080_v38  ;;  %v2441_v29 = vmul.f32 -0.5, %v3080_v38  ;;  %v2460_v53 = vadd.f32 1.0, %v2459_v0 }
0x3c4f   :  { %v2434_v50 = vmul.f32 %v3076_v31, %v2433_v19  ;;  %v2444_v36 = vand.u32 2147483647, %v3080_v38  ;;  %vm2463_vm12 = vcmp.lt.f32.partialorder %v2462_v51, 0.0004427343 }
0x3c50   :  { %3087 = vlog2.f32 %v2438_v42  ;;  %v2442_v54 = vadd.f32 1.0, %v2441_v29  ;;  %v2461_v55 = vmul.f32 %v3078_v37, %v2460_v53 }
0x3c51   :  { %vm2445_vm13 = vcmp.lt.f32.partialorder %v2444_v36, 0.0004427343 }
0x3c52   :  { %v2443_v62 = vmul.f32 %v3080_v38, %v2442_v54 }
0x3c57   :  { %v3082_v27 = vpop.eup %3081 }
0x3c58   :  { %v2449_v46 = vmul.f32 0.6931472, %v3082_v27 }
0x3c59   :  { %v3084_v47 = vpop.eup %3083 }
0x3c5a   :  { %v2455_v48 = vsel %vm2454_vm8, %v2452_v4, %v2449_v46  ;;  %v2431_v30 = vmul.f32 0.6931472, %v3084_v47 }
0x3c5b   :  { %v2503_v39 = vadd.f32 %v2455_v48, %v2375_v5  ;;  %v3086_v56 = vpop.eup %3085 }
0x3c5c   :  { %v2437_v57 = vsel %vm2436_vm9, %v2434_v50, %v2431_v30  ;;  %v2458_v60 = vmul.f32 0.6931472, %v3086_v56 }
0x3c5d   :  { %v2511_v63 = vsel %vm2383_vm10, %v3821_v25, %v2503_v39  ;;  %v2501_v58 = vadd.f32 %v2437_v57, %v2373_v28  ;;  %v3088_v16 = vpop.eup %3087 }
0x3c5e   :  { %v2519_v32 = vadd.f32 1e-06, %v2511_v63  ;;  %v2464_v1 = vsel %vm2463_vm12, %v2461_v55, %v2458_v60  ;;  %v2440_v49 = vmul.f32 0.6931472, %v3088_v16 }
0x3c5f   :  { %v2509_v59 = vsel %vm2381_vm11, %v3825_v2, %v2501_v58  ;;  %v2504_v41 = vadd.f32 %v2464_v1, %v2376_v6 }
0x3c60   :  { %v2527_v12 = vsel %vm2372_vm7, %v3821_v25, %v2519_v32  ;;  %v2517_v8 = vadd.f32 1e-06, %v2509_v59  ;;  %v2446_v17 = vsel %vm2445_vm13, %v2443_v62, %v2440_v49 }
0x3c61   :  { %2535 = vst.msk [vmem:[%s3949_s8 + $0x10] sm:$0xff] %vm53_vm1, %v2527_v12  ;;  %v2512_v34 = vsel %vm2384_vm14, %v3829_v15, %v2504_v41  ;;  %v2502_v21 = vadd.f32 %v2446_v17, %v2374_v11 }
0x3c62   :  { %v2525_v20 = vsel %vm2372_vm7, %v3825_v2, %v2517_v8  ;;  %v2520_v25 = vadd.f32 1e-06, %v2512_v34 }
0x3c63   :  { %2533 = vst.msk [vmem:[%s3949_s8] sm:$0xff] %vm53_vm1, %v2525_v20  ;;  %v2510_v18 = vsel %vm2382_vm15, %v3832_v22, %v2502_v21 }
0x3c64   :  { %v2528_v33 = vsel %vm2372_vm7, %v3829_v15, %v2520_v25  ;;  %v2518_v7 = vadd.f32 1e-06, %v2510_v18 }
0x3c65   :  { %2536 = vst.msk [vmem:[%s3949_s8 + $0x18] sm:$0xff] %vm53_vm1, %v2528_v33 }
0x3c66   :  { %v2526_v2 = vsel %vm2372_vm7, %v3832_v22, %v2518_v7 }
0x3c67   :  { %2534 = vst.msk [vmem:[%s3949_s8 + $0x8] sm:$0xff] %vm53_vm1, %v2526_v2 }
0x3c9e   :  { %v2955_v3 = vpop.f32.mrf.mxu0 }
0x3c9f   :  { %v3882_v26 = vadd.f32 %v2955_v3, %v3818_v61 }
0x3ca0   :  { %v2357_v15 = vpop.f32.mrf.mxu0 }
0x3ca1   :  { %v2403_v13 = vand.u32 2147483647, %v3882_v26  ;;  %v3886_v23 = vadd.f32 %v3818_v61, %v2357_v15  ;;  %v2379_v58 = vmax.f32 %v3882_v26, 0.0  ;;  %vm2387_vm3 = vcmp.ne.f32.partialorder %v3882_v26, %v3882_v26 }
0x3ca2   :  { %v2956_v14 = vpop.f32.mrf.mxu0 }
0x3ca3   :  { %v2411_v9 = vsub.f32 0.0, %v2403_v13  ;;  %v2401_v31 = vand.u32 2147483647, %v3886_v23  ;;  %v3890_v22 = vadd.f32 %v2956_v14, %v3818_v61  ;;  %v2377_v59 = vmax.f32 %v3886_v23, 0.0 }
0x3ca4   :  { %v2360_v35 = vpop.f32.mrf.mxu0  ;;  %vm2385_vm4 = vcmp.ne.f32.partialorder %v3886_v23, %v3886_v23 }
0x3ca5   :  { %v2425_v37 = vmul.f32 1.442695, %v2411_v9  ;;  %v2409_v10 = vsub.f32 0.0, %v2401_v31  ;;  %v3893_v38 = vadd.f32 %v3818_v61, %v2360_v35  ;;  %v2404_v42 = vand.u32 2147483647, %v3890_v22 }
0x3ca6   :  { %v2380_v25 = vmax.f32 %v3890_v22, 0.0  ;;  %vm2388_vm8 = vcmp.ne.f32.partialorder %v3890_v22, %v3890_v22 }
0x3ca7   :  { %3089 = vpow2.f32 %v2425_v37  ;;  %v2421_v43 = vmul.f32 1.442695, %v2409_v10  ;;  %v2412_v52 = vsub.f32 0.0, %v2404_v42  ;;  %v2402_v44 = vand.u32 2147483647, %v3893_v38 }
0x3ca8   :  { %v2378_v18 = vmax.f32 %v3893_v38, 0.0  ;;  %vm2386_vm9 = vcmp.ne.f32.partialorder %v3893_v38, %v3893_v38 }
0x3ca9   :  { %3091 = vpow2.f32 %v2421_v43  ;;  %v2427_v45 = vmul.f32 1.442695, %v2412_v52  ;;  %v2410_v0 = vsub.f32 0.0, %v2402_v44 }
0x3cab   :  { %3093 = vpow2.f32 %v2427_v45  ;;  %v2423_v19 = vmul.f32 1.442695, %v2410_v0 }
0x3cad   :  { %3095 = vpow2.f32 %v2423_v19 }
0x3cb4   :  { %v3090_v27 = vpop.eup %3089 }
0x3cb5   :  { %v2483_v40 = vadd.f32 1.0, %v3090_v27  ;;  %v2486_v53 = vmul.f32 -0.5, %v3090_v27  ;;  %v2489_v50 = vand.u32 2147483647, %v3090_v27 }
0x3cb6   :  { %v3092_v29 = vpop.eup %3091 }
0x3cb7   :  { %3097 = vlog2.f32 %v2483_v40  ;;  %v2465_v46 = vadd.f32 1.0, %v3092_v29  ;;  %v2468_v48 = vmul.f32 -0.5, %v3092_v29  ;;  %v2487_v30 = vadd.f32 1.0, %v2486_v53 }
0x3cb8   :  { %v3094_v61 = vpop.eup %3093  ;;  %v2471_v54 = vand.u32 2147483647, %v3092_v29  ;;  %vm2490_vm0 = vcmp.lt.f32.partialorder %v2489_v50, 0.0004427343 }
0x3cb9   :  { %3099 = vlog2.f32 %v2465_v46  ;;  %v2492_v4 = vadd.f32 1.0, %v3094_v61  ;;  %v2495_v51 = vmul.f32 -0.5, %v3094_v61  ;;  %v2469_v39 = vadd.f32 1.0, %v2468_v48 }
0x3cba   :  { %v3096_v47 = vpop.eup %3095  ;;  %v2488_v36 = vmul.f32 %v3090_v27, %v2487_v30  ;;  %v2498_v6 = vand.u32 2147483647, %v3094_v61  ;;  %vm2472_vm2 = vcmp.lt.f32.partialorder %v2471_v54, 0.0004427343 }
0x3cbb   :  { %3101 = vlog2.f32 %v2492_v4  ;;  %v2474_v5 = vadd.f32 1.0, %v3096_v47  ;;  %v2477_v56 = vmul.f32 -0.5, %v3096_v47  ;;  %v2496_v60 = vadd.f32 1.0, %v2495_v51 }
0x3cbc   :  { %v2470_v32 = vmul.f32 %v3092_v29, %v2469_v39  ;;  %v2480_v12 = vand.u32 2147483647, %v3096_v47  ;;  %vm2499_vm5 = vcmp.lt.f32.partialorder %v2498_v6, 0.0004427343 }
0x3cbd   :  { %3103 = vlog2.f32 %v2474_v5  ;;  %v2478_v1 = vadd.f32 1.0, %v2477_v56  ;;  %v2497_v20 = vmul.f32 %v3094_v61, %v2496_v60 }
0x3cbe   :  { %vm2481_vm6 = vcmp.lt.f32.partialorder %v2480_v12, 0.0004427343 }
0x3cbf   :  { %v2479_v3 = vmul.f32 %v3096_v47, %v2478_v1 }
0x3cc4   :  { %v3098_v28 = vpop.eup %3097 }
0x3cc5   :  { %v2485_v57 = vmul.f32 0.6931472, %v3098_v28 }
0x3cc6   :  { %v3100_v63 = vpop.eup %3099 }
0x3cc7   :  { %v2491_v55 = vsel %vm2490_vm0, %v2488_v36, %v2485_v57  ;;  %v2467_v16 = vmul.f32 0.6931472, %v3100_v63 }
0x3cc8   :  { %v2507_v11 = vadd.f32 %v2491_v55, %v2379_v58  ;;  %v3102_v49 = vpop.eup %3101 }
0x3cc9   :  { %v2473_v62 = vsel %vm2472_vm2, %v2470_v32, %v2467_v16  ;;  %v2494_v17 = vmul.f32 0.6931472, %v3102_v49 }
0x3cca   :  { %v2515_v8 = vsel %vm2387_vm3, %v3882_v26, %v2507_v11  ;;  %v2505_v41 = vadd.f32 %v2473_v62, %v2377_v59  ;;  %v3104_v34 = vpop.eup %3103 }
0x3ccb   :  { %v2523_v21 = vadd.f32 1e-06, %v2515_v8  ;;  %v2500_v7 = vsel %vm2499_vm5, %v2497_v20, %v2494_v17  ;;  %v2476_v2 = vmul.f32 0.6931472, %v3104_v34 }
0x3ccc   :  { %v2513_v33 = vsel %vm2385_vm4, %v3886_v23, %v2505_v41  ;;  %v2508_v14 = vadd.f32 %v2500_v7, %v2380_v25 }
0x3ccd   :  { %v2531_v15 = vsel %vm2372_vm7, %v3882_v26, %v2523_v21  ;;  %v2521_v13 = vadd.f32 1e-06, %v2513_v33  ;;  %v2482_v9 = vsel %vm2481_vm6, %v2479_v3, %v2476_v2 }
0x3cce   :  { %2539 = vst.msk [vmem:[%s3949_s8 + $0x30] sm:$0xff] %vm53_vm1, %v2531_v15  ;;  %v2516_v35 = vsel %vm2388_vm8, %v3890_v22, %v2508_v14  ;;  %v2506_v37 = vadd.f32 %v2482_v9, %v2378_v18 }
0x3ccf   :  { %v2529_v31 = vsel %vm2372_vm7, %v3886_v23, %v2521_v13  ;;  %v2524_v26 = vadd.f32 1e-06, %v2516_v35 }
0x3cd0   :  { %2537 = vst.msk [vmem:[%s3949_s8 + $0x20] sm:$0xff] %vm53_vm1, %v2529_v31  ;;  %v2514_v10 = vsel %vm2386_vm9, %v3893_v38, %v2506_v37 }
0x3cd1   :  { %v2532_v42 = vsel %vm2372_vm7, %v3890_v22, %v2524_v26  ;;  %v2522_v43 = vadd.f32 1e-06, %v2514_v10 }
0x3cd2   :  { %2540 = vst.msk [vmem:[%s3949_s8 + $0x38] sm:$0xff] %vm53_vm1, %v2532_v42 }
0x3cd3   :  { %v2530_v23 = vsel %vm2372_vm7, %v3893_v38, %v2522_v43 }
0x3cd4   :  { %2538 = vst.msk [vmem:[%s3949_s8 + $0x28] sm:$0xff] %vm53_vm1, %v2530_v23 }

</bundles_post_ra>
